<compile_context>
chip_gen: v5e
topology: v5e:2x2
jax: 0.10.0
libtpu: 0.0.40
codegen_flags: <defaults>
</compile_context>

<pallas_src>
import functools
import math

import jax
import jax.numpy as jnp
from jax import lax
from jax.experimental import pallas as pl
from jax.experimental.pallas import tpu as pltpu


_NEG_INF = -1e9  # additive mask value (finite: fully-masked rows stay NaN-free)


def _round_up(x, m):
    return ((x + m - 1) // m) * m


# ----------------------------------------------------------------------------
# Tiling policy (shared by weight preparation and the linear() wrapper)
# ----------------------------------------------------------------------------
def _pol_n(n):
    """Lane (output) tiling: 512-wide tiles at scale, one lane-dense tile else."""
    if n >= 512:
        return 512, _round_up(n, 512)
    t = _round_up(n, 128)
    return t, t


def _pol_k(k):
    """Contraction tiling: whole K when it fits, else 1024-deep tiles."""
    if k > 1024:
        return 1024, _round_up(k, 1024)
    return k, k


def _tiles_from_padded(kp, np_):
    tk = kp if kp <= 1024 else 1024
    tn = np_ if np_ <= 512 else 512
    return tk, tn


def _prep_linear(w, b):
    """Pre-pad + pre-cast one weight/bias pair (done once, outside the fwd)."""
    k, n = w.shape
    _, kp = _pol_k(k)
    _, np_ = _pol_n(n)
    if (kp, np_) != (k, n):
        w = jnp.pad(w, ((0, kp - k), (0, np_ - n)))
    if np_ != n:
        b = jnp.pad(b, ((0, np_ - n),))
    return dict(w=w.astype(jnp.bfloat16), b=b.reshape(1, np_).astype(jnp.float32))


# ----------------------------------------------------------------------------
# Tiled matmul kernels:  Y = X @ W + b   (+ fused ReLU, or fused residual+LN)
# ----------------------------------------------------------------------------
def _matmul_kernel(x_ref, w_ref, b_ref, o_ref, acc_ref, *, activation):
    @pl.when(pl.program_id(2) == 0)
    def _():
        acc_ref[...] = jnp.zeros_like(acc_ref)

    acc_ref[...] += jnp.dot(x_ref[...], w_ref[...],
                            preferred_element_type=jnp.float32)

    @pl.when(pl.program_id(2) == pl.num_programs(2) - 1)
    def _():
        y = acc_ref[...] + b_ref[...]
        if activation == "relu":
            y = jnp.maximum(y, 0.0)
        o_ref[...] = y.astype(o_ref.dtype)


def _matmul_add_ln_kernel(x_ref, w_ref, b_ref, r_ref, g_ref, bt_ref, o_ref,
                          acc_ref, *, d_real, eps):
    @pl.when(pl.program_id(2) == 0)
    def _():
        acc_ref[...] = jnp.zeros_like(acc_ref)

    acc_ref[...] += jnp.dot(x_ref[...], w_ref[...],
                            preferred_element_type=jnp.float32)

    @pl.when(pl.program_id(2) == pl.num_programs(2) - 1)
    def _():
        # residual add + LayerNorm epilogue.  Padded feature columns are exactly
        # zero (zero weight cols / bias / residual / gamma / beta), so sums over
        # the padded row equal sums over the real d_model columns.
        x = acc_ref[...] + b_ref[...] + r_ref[...].astype(jnp.float32)
        inv_d = 1.0 / d_real
        mu = jnp.sum(x, axis=-1, keepdims=True) * inv_d
        var = jnp.sum(x * x, axis=-1, keepdims=True) * inv_d - mu * mu
        var = jnp.maximum(var, 0.0)
        y = (x - mu) * lax.rsqrt(var + eps)
        o_ref[...] = (y * g_ref[...] + bt_ref[...]).astype(o_ref.dtype)


def linear(x, lin, n_out, *, activation=None, residual=None, gamma=None,
           beta=None, out_dtype=jnp.bfloat16, eps=1e-5):
    """y = x @ W + b (optional fused ReLU, or fused residual-add + LayerNorm).

    `lin` holds the pre-padded bf16 weight [Kp, Np] and f32 bias [1, Np]
    prepared once in prepare_params(); `n_out` is the real output width.
    """
    M, K = x.shape
    w, b = lin["w"], lin["b"]
    Kp, Np = w.shape
    tk, tn = _tiles_from_padded(Kp, Np)
    if M >= 512:
        tm, Mp = 512, _round_up(M, 512)
    else:
        tm, Mp = M, M                      # full-dim block: no row padding

    fuse_ln = residual is not None and Np == tn   # full LN row in one lane tile
    if residual is not None and not fuse_ln:
        # Fallback (d_model wider than one 512 lane tile): separate LN pass.
        y = linear(x, lin, n_out, activation=activation, out_dtype=out_dtype,
                   eps=eps)
        return add_layer_norm(y, residual, gamma, beta, eps=eps,
                              out_dtype=out_dtype)

    xb = x.astype(jnp.bfloat16)
    if (Mp, Kp) != (M, K):
        xb = jnp.pad(xb, ((0, Mp - M), (0, Kp - K)))

    args = [xb, w, b]
    in_specs = [
        pl.BlockSpec((tm, tk), lambda i, j, k: (i, k)),
        pl.BlockSpec((tk, tn), lambda i, j, k: (k, j)),
        pl.BlockSpec((1, tn), lambda i, j, k: (0, j)),
    ]
    if fuse_ln:
        r = residual.astype(jnp.bfloat16)
        if r.shape != (Mp, Np):
            r = jnp.pad(r, ((0, Mp - r.shape[0]), (0, Np - r.shape[1])))
        g = gamma.reshape(1, -1).astype(jnp.float32)
        bt = beta.reshape(1, -1).astype(jnp.float32)
        if g.shape[1] != Np:
            g = jnp.pad(g, ((0, 0), (0, Np - g.shape[1])))
            bt = jnp.pad(bt, ((0, 0), (0, Np - bt.shape[1])))
        args += [r, g, bt]
        in_specs += [
            pl.BlockSpec((tm, tn), lambda i, j, k: (i, j)),
            pl.BlockSpec((1, tn), lambda i, j, k: (0, j)),
            pl.BlockSpec((1, tn), lambda i, j, k: (0, j)),
        ]
        kernel = functools.partial(_matmul_add_ln_kernel,
                                   d_real=float(n_out), eps=eps)
    else:
        kernel = functools.partial(_matmul_kernel, activation=activation)

    out_bytes = jnp.dtype(out_dtype).itemsize
    est = (2 * (tm * tk * 2 + tk * tn * 2 + tn * 4)
           + 2 * tm * tn * out_bytes + tm * tn * 4)
    if fuse_ln:
        est += 2 * (tm * tn * 2 + 2 * tn * 4)
    vmem_limit = int(min(max(2 * est + (4 << 20), 32 << 20), 56 << 20))

    cost = pl.CostEstimate(
        flops=2 * Mp * Np * Kp,
        transcendentals=Mp if fuse_ln else 0,
        bytes_accessed=(Mp * Kp * 2 + Kp * Np * 2 + Mp * Np * out_bytes
                        + (Mp * Np * 2 if fuse_ln else 0)),
    )

    out = pl.pallas_call(
        kernel,
        out_shape=jax.ShapeDtypeStruct((Mp, Np), out_dtype),
        grid=(Mp // tm, Np // tn, Kp // tk),
        in_specs=in_specs,
        out_specs=pl.BlockSpec((tm, tn), lambda i, j, k: (i, j)),
        scratch_shapes=[pltpu.VMEM((tm, tn), jnp.float32)],
        compiler_params=pltpu.CompilerParams(
            dimension_semantics=("parallel", "parallel", "arbitrary"),
            vmem_limit_bytes=vmem_limit),
        cost_estimate=cost,
    )(*args)

    if (Mp, Np) != (M, n_out):
        out = out[:M, :n_out]
    return out


# ----------------------------------------------------------------------------
# Standalone residual-add + LayerNorm (fallback only: d_model > one lane tile)
# ----------------------------------------------------------------------------
def _add_ln_kernel(x_ref, r_ref, g_ref, b_ref, o_ref, *, eps):
    x = x_ref[...].astype(jnp.float32) + r_ref[...].astype(jnp.float32)
    mu = jnp.mean(x, axis=-1, keepdims=True)
    var = jnp.mean((x - mu) * (x - mu), axis=-1, keepdims=True)
    y = (x - mu) * lax.rsqrt(var + eps)
    o_ref[...] = (y * g_ref[...] + b_ref[...]).astype(o_ref.dtype)


def add_layer_norm(x, res, gamma, beta, eps=1e-5, out_dtype=jnp.bfloat16):
    M, D = x.shape
    if M >= 512:
        tm, Mp = 512, _round_up(M, 512)
    else:
        tm, Mp = M, M
    xp, rp = x, res
    if Mp != M:
        xp = jnp.pad(xp, ((0, Mp - M), (0, 0)))
        rp = jnp.pad(rp, ((0, Mp - M), (0, 0)))
    out = pl.pallas_call(
        functools.partial(_add_ln_kernel, eps=eps),
        out_shape=jax.ShapeDtypeStruct((Mp, D), out_dtype),
        grid=(Mp // tm,),
        in_specs=[
            pl.BlockSpec((tm, D), lambda i: (i, 0)),
            pl.BlockSpec((tm, D), lambda i: (i, 0)),
            pl.BlockSpec((1, D), lambda i: (0, 0)),
            pl.BlockSpec((1, D), lambda i: (0, 0)),
        ],
        out_specs=pl.BlockSpec((tm, D), lambda i: (i, 0)),
        compiler_params=pltpu.CompilerParams(dimension_semantics=("parallel",)),
    )(xp, rp, gamma.reshape(1, D).astype(jnp.float32),
      beta.reshape(1, D).astype(jnp.float32))
    return out[:M] if Mp != M else out


# ----------------------------------------------------------------------------
# Attention kernels
# ----------------------------------------------------------------------------
def _flash_attn_kernel(q_ref, k_ref, v_ref, mask_ref, o_ref,
                       m_scr, l_scr, acc_scr, *, scale, causal, kv_tile):
    kv = pl.program_id(2)

    @pl.when(kv == 0)
    def _():
        m_scr[...] = jnp.full_like(m_scr, -1e30)
        l_scr[...] = jnp.zeros_like(l_scr)
        acc_scr[...] = jnp.zeros_like(acc_scr)

    # fold 1/sqrt(dh) into Q (Lq*dh muls instead of Lq*Lk)
    q = (q_ref[0, 0].astype(jnp.float32) * scale).astype(jnp.bfloat16)  # [Lq, dh]
    k = k_ref[0, 0]                                                     # [tkv, dh]
    v = v_ref[0, 0]                                                     # [tkv, dh]

    # scores contracting the head dim (no in-kernel K transpose), f32 accumulate
    s = lax.dot_general(q, k, (((1,), (1,)), ((), ())),
                        preferred_element_type=jnp.float32)             # [Lq, tkv]
    s = s + mask_ref[0]                                                 # additive key-pad mask
    if causal:
        lq, tkv = s.shape
        q_pos = lax.broadcasted_iota(jnp.int32, (lq, tkv), 0)
        k_pos = lax.broadcasted_iota(jnp.int32, (lq, tkv), 1) + kv * kv_tile
        s = jnp.where(k_pos <= q_pos, s, _NEG_INF)

    m_prev = m_scr[...]
    m_new = jnp.maximum(m_prev, jnp.max(s, axis=-1, keepdims=True))
    alpha = jnp.exp(m_prev - m_new)
    p = jnp.exp(s - m_new)
    l_scr[...] = alpha * l_scr[...] + jnp.sum(p, axis=-1, keepdims=True)
    acc_scr[...] = alpha * acc_scr[...] + jnp.dot(
        p.astype(jnp.bfloat16), v, preferred_element_type=jnp.float32)
    m_scr[...] = m_new

    @pl.when(kv == pl.num_programs(2) - 1)
    def _():
        o_ref[0, 0] = (acc_scr[...] *
                       pl.reciprocal(l_scr[...], approx=True)).astype(o_ref.dtype)


def flash_attention(q, k, v, add_key_mask, scale, causal):
    """q: [B,H,Lq,dh] bf16, k/v: [B,H,Lk,dh] bf16, add_key_mask: [B,1,Lk] f32."""
    B, H, Lq, dh = q.shape
    Lk = k.shape[2]
    kv_tile = Lk if Lk <= 512 else 512
    Lkp = _round_up(Lk, kv_tile)
    if Lkp != Lk:
        k = jnp.pad(k, ((0, 0), (0, 0), (0, Lkp - Lk), (0, 0)))
        v = jnp.pad(v, ((0, 0), (0, 0), (0, Lkp - Lk), (0, 0)))
        add_key_mask = jnp.pad(add_key_mask, ((0, 0), (0, 0), (0, Lkp - Lk)),
                               constant_values=_NEG_INF)
    n_kv = Lkp // kv_tile

    cost = pl.CostEstimate(
        flops=4 * B * H * Lq * Lkp * dh,
        transcendentals=B * H * Lq * Lkp,
        bytes_accessed=(2 * B * H * (Lq + 2 * Lkp) * dh + 4 * B * Lkp
                        + 2 * B * H * Lq * dh),
    )

    return pl.pallas_call(
        functools.partial(_flash_attn_kernel, scale=scale, causal=causal,
                          kv_tile=kv_tile),
        out_shape=jax.ShapeDtypeStruct((B, H, Lq, dh), jnp.bfloat16),
        grid=(B, H, n_kv),
        in_specs=[
            pl.BlockSpec((1, 1, Lq, dh), lambda b, h, i: (b, h, 0, 0)),
            pl.BlockSpec((1, 1, kv_tile, dh), lambda b, h, i: (b, h, i, 0)),
            pl.BlockSpec((1, 1, kv_tile, dh), lambda b, h, i: (b, h, i, 0)),
            pl.BlockSpec((1, 1, kv_tile), lambda b, h, i: (b, 0, i)),
        ],
        out_specs=pl.BlockSpec((1, 1, Lq, dh), lambda b, h, i: (b, h, 0, 0)),
        scratch_shapes=[
            pltpu.VMEM((Lq, 1), jnp.float32),
            pltpu.VMEM((Lq, 1), jnp.float32),
            pltpu.VMEM((Lq, dh), jnp.float32),
        ],
        compiler_params=pltpu.CompilerParams(
            dimension_semantics=("parallel", "parallel", "arbitrary")),
        cost_estimate=cost,
    )(q, k, v, add_key_mask)


def _attn_weights_kernel(q_ref, k_ref, v_ref, mask_ref, o_ref, w_ref, *, scale):
    q = (q_ref[0, 0].astype(jnp.float32) * scale).astype(jnp.bfloat16)
    k = k_ref[0, 0]
    v = v_ref[0, 0]
    s = lax.dot_general(q, k, (((1,), (1,)), ((), ())),
                        preferred_element_type=jnp.float32)
    s = s + mask_ref[0]
    s = s - jnp.max(s, axis=-1, keepdims=True)
    e = jnp.exp(s)
    p = e * pl.reciprocal(jnp.sum(e, axis=-1, keepdims=True))  # exact: rows sum to 1
    w_ref[0, 0] = p
    o_ref[0, 0] = jnp.dot(p.astype(jnp.bfloat16), v,
                          preferred_element_type=jnp.float32).astype(o_ref.dtype)


def attention_with_weights(q, k, v, add_key_mask, scale):
    """Only used by the last decoder layer's cross-attention (weights returned)."""
    B, H, Lq, dh = q.shape
    Lk = k.shape[2]
    return pl.pallas_call(
        functools.partial(_attn_weights_kernel, scale=scale),
        out_shape=(jax.ShapeDtypeStruct((B, H, Lq, dh), jnp.bfloat16),
                   jax.ShapeDtypeStruct((B, H, Lq, Lk), jnp.float32)),
        grid=(B, H),
        in_specs=[
            pl.BlockSpec((1, 1, Lq, dh), lambda b, h: (b, h, 0, 0)),
            pl.BlockSpec((1, 1, Lk, dh), lambda b, h: (b, h, 0, 0)),
            pl.BlockSpec((1, 1, Lk, dh), lambda b, h: (b, h, 0, 0)),
            pl.BlockSpec((1, 1, Lk), lambda b, h: (b, 0, 0)),
        ],
        out_specs=(pl.BlockSpec((1, 1, Lq, dh), lambda b, h: (b, h, 0, 0)),
                   pl.BlockSpec((1, 1, Lq, Lk), lambda b, h: (b, h, 0, 0))),
        compiler_params=pltpu.CompilerParams(
            dimension_semantics=("parallel", "parallel")),
    )(q, k, v, add_key_mask)


# ----------------------------------------------------------------------------
# Multi-head attention wrappers (plain-JAX orchestration over the kernels)
# ----------------------------------------------------------------------------
def self_attention(p, x2, B, L, n_heads, add_key_mask, causal):
    """Fused QKV projection + per-(batch, head) flash attention.  Returns the
    concatenated heads [B*L, D]; the wo projection (+ residual LN) is applied
    by the caller so it can be fused."""
    D = x2.shape[1]
    dh = D // n_heads
    qkv = linear(x2, p["wqkv"], 3 * D)
    # TODO(synk): fold this head-split transpose into the attention kernel's
    # layout to avoid the XLA relayout at large L*D (negligible at these sizes).
    qkv = qkv.reshape(B, L, 3, n_heads, dh).transpose(2, 0, 3, 1, 4)
    q, k, v = qkv[0], qkv[1], qkv[2]
    out = flash_attention(q, k, v, add_key_mask, 1.0 / math.sqrt(dh), causal)
    return out.transpose(0, 2, 1, 3).reshape(B * L, D)


def cross_attention(p, x2, enc2, B, Lq, Lk, n_heads, add_key_mask, need_weights):
    D = x2.shape[1]
    dh = D // n_heads
    q = linear(x2, p["wq"], D).reshape(B, Lq, n_heads, dh).transpose(0, 2, 1, 3)
    kv = linear(enc2, p["wkv"], 2 * D).reshape(B, Lk, 2, n_heads, dh)
    kv = kv.transpose(2, 0, 3, 1, 4)
    k, v = kv[0], kv[1]
    scale = 1.0 / math.sqrt(dh)
    if need_weights:
        out, attn = attention_with_weights(q, k, v, add_key_mask, scale)
    else:
        out = flash_attention(q, k, v, add_key_mask, scale, causal=False)
        attn = None
    return out.transpose(0, 2, 1, 3).reshape(B * Lq, D), attn


# ----------------------------------------------------------------------------
# Encoder / decoder layers and model forward
# ----------------------------------------------------------------------------
def encoder_layer(p, x2, B, L, n_heads, d_ff, src_key_mask):
    D = x2.shape[1]
    a = self_attention(p["attn"], x2, B, L, n_heads, src_key_mask, causal=False)
    x2 = linear(a, p["attn"]["wo"], D, residual=x2,
                gamma=p["ln1_g"], beta=p["ln1_b"])
    h = linear(x2, p["ff"]["w1"], d_ff, activation="relu")
    x2 = linear(h, p["ff"]["w2"], D, residual=x2,
                gamma=p["ln2_g"], beta=p["ln2_b"])
    return x2


def decoder_layer(p, x2, enc2, B, Ld, Ls, n_heads, d_ff,
                  dest_key_mask, src_key_mask, need_weights):
    D = x2.shape[1]
    a = self_attention(p["self_attn"], x2, B, Ld, n_heads, dest_key_mask,
                       causal=True)
    x2 = linear(a, p["self_attn"]["wo"], D, residual=x2,
                gamma=p["ln1_g"], beta=p["ln1_b"])
    a2, attn = cross_attention(p["cross_attn"], x2, enc2, B, Ld, Ls, n_heads,
                               src_key_mask, need_weights)
    x2 = linear(a2, p["cross_attn"]["wo"], D, residual=x2,
                gamma=p["ln2_g"], beta=p["ln2_b"])
    h = linear(x2, p["ff"]["w1"], d_ff, activation="relu")
    x2 = linear(h, p["ff"]["w2"], D, residual=x2,
                gamma=p["ln3_g"], beta=p["ln3_b"])
    return x2, attn


def _embed(tok_emb, pos_emb, tokens):
    B, L = tokens.shape
    D = tok_emb.shape[1]
    x = jnp.take(tok_emb, tokens, axis=0) * math.sqrt(D)
    x = x + pos_emb[None, :L, :]
    return x.astype(jnp.bfloat16).reshape(B * L, D)


def encoder_forward(p, src_sequences, src_key_mask, n_heads, d_ff):
    B, Ls = src_sequences.shape
    x2 = _embed(p["tok_emb"], p["pos_emb"], src_sequences)
    for lp in p["layers"]:
        x2 = encoder_layer(lp, x2, B, Ls, n_heads, d_ff, src_key_mask)
    return x2


def decoder_forward(p, dest_sequences, enc2, B, Ls, dest_key_mask, src_key_mask,
                    n_heads, d_ff, dst_vocab):
    _, Ld = dest_sequences.shape
    x2 = _embed(p["tok_emb"], p["pos_emb"], dest_sequences)
    attention = None
    n_layers = len(p["layers"])
    for li, lp in enumerate(p["layers"]):
        need_w = li == n_layers - 1   # only last layer's cross-attn is returned
        x2, attn = decoder_layer(lp, x2, enc2, B, Ld, Ls, n_heads, d_ff,
                                 dest_key_mask, src_key_mask, need_w)
        if need_w:
            attention = attn
    logits = linear(x2, p["fc_out"], dst_vocab, out_dtype=jnp.float32)
    return logits.reshape(B, Ld, dst_vocab), attention


def make_src_mask(src_sequences, src_pad_index):
    """Additive key-pad mask [B, 1, Ls]: 0 at real tokens, -1e9 at <pad>."""
    m = jnp.where(src_sequences != src_pad_index, 0.0, _NEG_INF)
    return m[:, None, :].astype(jnp.float32)


def make_dest_mask(dest_sequences, dest_pad_index):
    """Additive key-pad mask [B, 1, Ld]; the causal (tril) part of the PyTorch
    dest mask is built in-kernel from iota compares."""
    m = jnp.where(dest_sequences != dest_pad_index, 0.0, _NEG_INF)
    return m[:, None, :].astype(jnp.float32)


def transformer_forward(params, src_sequences, dest_sequences,
                        src_pad_index, dest_pad_index, n_heads, d_ff, dst_vocab):
    src_key_mask = make_src_mask(src_sequences, src_pad_index)
    dest_key_mask = make_dest_mask(dest_sequences, dest_pad_index)
    B, Ls = src_sequences.shape
    enc2 = encoder_forward(params["encoder"], src_sequences, src_key_mask,
                           n_heads, d_ff)
    logits, attention_weights = decoder_forward(
        params["decoder"], dest_sequences, enc2, B, Ls,
        dest_key_mask, src_key_mask, n_heads, d_ff, dst_vocab)
    return logits, attention_weights


# ----------------------------------------------------------------------------
# Parameter init (PyTorch-like, f32) and one-time kernel-ready preparation
# ----------------------------------------------------------------------------
def _dense(key, fan_in, fan_out):
    w = jax.random.normal(key, (fan_in, fan_out), jnp.float32) * 0.02
    b = jnp.zeros((fan_out,), jnp.float32)
    return w, b


def _mha_params(key, d_model):
    ks = jax.random.split(key, 4)
    wq, bq = _dense(ks[0], d_model, d_model)
    wk, bk = _dense(ks[1], d_model, d_model)
    wv, bv = _dense(ks[2], d_model, d_model)
    wo, bo = _dense(ks[3], d_model, d_model)
    return dict(wq=wq, bq=bq, wk=wk, bk=bk, wv=wv, bv=bv, wo=wo, bo=bo)


def _ff_params(key, d_model, d_ff):
    k1, k2 = jax.random.split(key)
    w1, b1 = _dense(k1, d_model, d_ff)
    w2, b2 = _dense(k2, d_ff, d_model)
    return dict(w1=w1, b1=b1, w2=w2, b2=b2)


def init_params(key, src_vocab, dst_vocab, d_model, d_ff, n_layers, max_len):
    keys = jax.random.split(key, 8)
    ones = lambda: jnp.ones((d_model,), jnp.float32)
    zeros = lambda: jnp.zeros((d_model,), jnp.float32)

    enc_layers = []
    for i in range(n_layers):
        lk = jax.random.fold_in(keys[0], i)
        lks = jax.random.split(lk, 2)
        enc_layers.append(dict(
            attn=_mha_params(lks[0], d_model),
            ff=_ff_params(lks[1], d_model, d_ff),
            ln1_g=ones(), ln1_b=zeros(), ln2_g=ones(), ln2_b=zeros(),
        ))
    encoder = dict(
        tok_emb=jax.random.normal(keys[1], (src_vocab, d_model), jnp.float32) * 0.02,
        pos_emb=jax.random.normal(keys[2], (max_len, d_model), jnp.float32) * 0.02,
        layers=enc_layers,
    )

    dec_layers = []
    for i in range(n_layers):
        lk = jax.random.fold_in(keys[3], i)
        lks = jax.random.split(lk, 3)
        dec_layers.append(dict(
            self_attn=_mha_params(lks[0], d_model),
            cross_attn=_mha_params(lks[1], d_model),
            ff=_ff_params(lks[2], d_model, d_ff),
            ln1_g=ones(), ln1_b=zeros(),
            ln2_g=ones(), ln2_b=zeros(),
            ln3_g=ones(), ln3_b=zeros(),
        ))
    fc_w, fc_b = _dense(keys[4], d_model, dst_vocab)
    decoder = dict(
        tok_emb=jax.random.normal(keys[5], (dst_vocab, d_model), jnp.float32) * 0.02,
        pos_emb=jax.random.normal(keys[6], (max_len, d_model), jnp.float32) * 0.02,
        layers=dec_layers,
        fc_out_w=fc_w, fc_out_b=fc_b,
    )
    return dict(encoder=encoder, decoder=decoder)


def prepare_params(params):
    """One-time: concat QKV/KV, pad to tile multiples, cast weights to bf16."""
    def prep_mha_self(m):
        wqkv = jnp.concatenate([m["wq"], m["wk"], m["wv"]], axis=1)
        bqkv = jnp.concatenate([m["bq"], m["bk"], m["bv"]], axis=0)
        return dict(wqkv=_prep_linear(wqkv, bqkv),
                    wo=_prep_linear(m["wo"], m["bo"]))

    def prep_mha_cross(m):
        wkv = jnp.concatenate([m["wk"], m["wv"]], axis=1)
        bkv = jnp.concatenate([m["bk"], m["bv"]], axis=0)
        return dict(wq=_prep_linear(m["wq"], m["bq"]),
                    wkv=_prep_linear(wkv, bkv),
                    wo=_prep_linear(m["wo"], m["bo"]))

    def prep_ff(f):
        return dict(w1=_prep_linear(f["w1"], f["b1"]),
                    w2=_prep_linear(f["w2"], f["b2"]))

    enc = params["encoder"]
    enc_layers = [dict(attn=prep_mha_self(l["attn"]), ff=prep_ff(l["ff"]),
                       ln1_g=l["ln1_g"], ln1_b=l["ln1_b"],
                       ln2_g=l["ln2_g"], ln2_b=l["ln2_b"])
                  for l in enc["layers"]]
    dec = params["decoder"]
    dec_layers = [dict(self_attn=prep_mha_self(l["self_attn"]),
                       cross_attn=prep_mha_cross(l["cross_attn"]),
                       ff=prep_ff(l["ff"]),
                       ln1_g=l["ln1_g"], ln1_b=l["ln1_b"],
                       ln2_g=l["ln2_g"], ln2_b=l["ln2_b"],
                       ln3_g=l["ln3_g"], ln3_b=l["ln3_b"])
                  for l in dec["layers"]]
    encoder = dict(tok_emb=enc["tok_emb"], pos_emb=enc["pos_emb"],
                   layers=enc_layers)
    decoder = dict(tok_emb=dec["tok_emb"], pos_emb=dec["pos_emb"],
                   layers=dec_layers,
                   fc_out=_prep_linear(dec["fc_out_w"], dec["fc_out_b"]))
    return dict(encoder=encoder, decoder=decoder)


# ----------------------------------------------------------------------------
# Main
# ----------------------------------------------------------------------------
if __name__ == "__main__":
    # small config
    BATCH = 2
    SRC_LEN = 10
    DST_LEN = 8
    D_MODEL = 32
    N_HEADS = 4
    D_FF = 64
    N_LAYERS = 2
    SRC_VOCAB = 40
    DST_VOCAB = 50
    MAX_LEN = 64
    SRC_PAD = 0
    DST_PAD = 0

    key = jax.random.PRNGKey(0)
    pkey, skey, dkey = jax.random.split(key, 3)
    raw_params = init_params(pkey, SRC_VOCAB, DST_VOCAB, D_MODEL, D_FF,
                             N_LAYERS, MAX_LEN)
    params = prepare_params(raw_params)   # kernel-ready weights, built once

    # token ids in [1, vocab); pad the tails with PAD=0 to exercise the masks
    src = jax.random.randint(skey, (BATCH, SRC_LEN), 1, SRC_VOCAB, dtype=jnp.int32)
    dst = jax.random.randint(dkey, (BATCH, DST_LEN), 1, DST_VOCAB, dtype=jnp.int32)
    src = src.at[0, 7:].set(SRC_PAD).at[1, 5:].set(SRC_PAD)
    dst = dst.at[1, 6:].set(DST_PAD)

    fwd = jax.jit(functools.partial(
        transformer_forward,
        src_pad_index=SRC_PAD, dest_pad_index=DST_PAD,
        n_heads=N_HEADS, d_ff=D_FF, dst_vocab=DST_VOCAB))

    logits, attention_weights = fwd(params, src, dst)
    jax.block_until_ready((logits, attention_weights))

    assert logits.shape == (BATCH, DST_LEN, DST_VOCAB), logits.shape
    assert attention_weights.shape == (BATCH, N_HEADS, DST_LEN, SRC_LEN), \
        attention_weights.shape
    assert bool(jnp.all(jnp.isfinite(logits)))
    assert bool(jnp.all(jnp.isfinite(attention_weights)))
    # attention rows are softmax distributions over (unmasked) source positions
    assert bool(jnp.allclose(jnp.sum(attention_weights, axis=-1), 1.0, atol=1e-4))

    print("KERNEL_OK")
</pallas_src>

<mosaic_0001>
module attributes {stable_mosaic.version = 11 : i64} {
  func.func @_flash_attn_kernel(%arg0: i32, %arg1: i32, %arg2: i32, %arg3: memref<1x1x10x8xbf16, #tpu.memory_space<vmem>>, %arg4: memref<1x1x10x8xbf16, #tpu.memory_space<vmem>>, %arg5: memref<1x1x10x8xbf16, #tpu.memory_space<vmem>>, %arg6: memref<1x1x10xf32, #tpu.memory_space<vmem>>, %arg7: memref<1x1x10x8xbf16, #tpu.memory_space<vmem>>, %arg8: memref<10x1xf32, #tpu.memory_space<vmem>>, %arg9: memref<10x1xf32, #tpu.memory_space<vmem>>, %arg10: memref<10x8xf32, #tpu.memory_space<vmem>>) attributes {dimension_semantics = [#tpu.dimension_semantics<parallel>, #tpu.dimension_semantics<parallel>, #tpu.dimension_semantics<arbitrary>], iteration_bounds = array<i64: 2, 4, 1>, scalar_prefetch = 0 : i64, scratch_operands = 3 : i64, tpu.core_type = #tpu.core_type<tc>, window_params = [{transform_indices = @transform_0, window_bounds = array<i64: 1, 1, 10, 8>}, {transform_indices = @transform_1, window_bounds = array<i64: 1, 1, 10, 8>}, {transform_indices = @transform_2, window_bounds = array<i64: 1, 1, 10, 8>}, {transform_indices = @transform_3, window_bounds = array<i64: 1, 1, 10>}, {transform_indices = @transform_4, window_bounds = array<i64: 1, 1, 10, 8>}]} {
    %c0_i32 = arith.constant 0 : i32
    %0 = arith.cmpi eq, %arg2, %c0_i32 : i32
    %1 = arith.extui %0 : i1 to i32
    %c0_i32_0 = arith.constant 0 : i32
    %2 = arith.cmpi ne, %1, %c0_i32_0 : i32
    scf.if %2 {
      %cst_33 = arith.constant -1.000000e+30 : f32
      %44 = vector.broadcast %cst_33 : f32 to vector<10x1xf32>
      %c0_34 = arith.constant 0 : index
      %c0_35 = arith.constant 0 : index
      %45 = vector.load %arg8[%c0_34, %c0_35] : memref<10x1xf32, #tpu.memory_space<vmem>>, vector<10x1xf32>
      tpu.vector_store %arg8[%c0_34, %c0_35], %44 {strides = array<i32>} : memref<10x1xf32, #tpu.memory_space<vmem>>, vector<10x1xf32>,
      %cst_36 = arith.constant 0.000000e+00 : f32
      %46 = vector.broadcast %cst_36 : f32 to vector<10x1xf32>
      %c0_37 = arith.constant 0 : index
      %c0_38 = arith.constant 0 : index
      %47 = vector.load %arg9[%c0_37, %c0_38] : memref<10x1xf32, #tpu.memory_space<vmem>>, vector<10x1xf32>
      tpu.vector_store %arg9[%c0_37, %c0_38], %46 {strides = array<i32>} : memref<10x1xf32, #tpu.memory_space<vmem>>, vector<10x1xf32>,
      %cst_39 = arith.constant 0.000000e+00 : f32
      %48 = vector.broadcast %cst_39 : f32 to vector<10x8xf32>
      %c0_40 = arith.constant 0 : index
      %c0_41 = arith.constant 0 : index
      %49 = vector.load %arg10[%c0_40, %c0_41] : memref<10x8xf32, #tpu.memory_space<vmem>>, vector<10x8xf32>
      tpu.vector_store %arg10[%c0_40, %c0_41], %48 {strides = array<i32>} : memref<10x8xf32, #tpu.memory_space<vmem>>, vector<10x8xf32>,
    } else {
    }
    %c0 = arith.constant 0 : index
    %c0_1 = arith.constant 0 : index
    %c0_2 = arith.constant 0 : index
    %c0_3 = arith.constant 0 : index
    %3 = vector.load %arg3[%c0, %c0_1, %c0_2, %c0_3] : memref<1x1x10x8xbf16, #tpu.memory_space<vmem>>, vector<1x1x10x8xbf16>
    %4 = vector.shape_cast %3 : vector<1x1x10x8xbf16> to vector<10x8xbf16>
    %5 = arith.extf %4 : vector<10x8xbf16> to vector<10x8xf32>
    %cst = arith.constant 0.353553385 : f32
    %6 = vector.broadcast %cst : f32 to vector<10x8xf32>
    %7 = arith.mulf %5, %6 : vector<10x8xf32>
    %8 = arith.truncf %7 : vector<10x8xf32> to vector<10x8xbf16>
    %c0_4 = arith.constant 0 : index
    %c0_5 = arith.constant 0 : index
    %c0_6 = arith.constant 0 : index
    %c0_7 = arith.constant 0 : index
    %9 = vector.load %arg4[%c0_4, %c0_5, %c0_6, %c0_7] : memref<1x1x10x8xbf16, #tpu.memory_space<vmem>>, vector<1x1x10x8xbf16>
    %10 = vector.shape_cast %9 : vector<1x1x10x8xbf16> to vector<10x8xbf16>
    %c0_8 = arith.constant 0 : index
    %c0_9 = arith.constant 0 : index
    %c0_10 = arith.constant 0 : index
    %c0_11 = arith.constant 0 : index
    %11 = vector.load %arg5[%c0_8, %c0_9, %c0_10, %c0_11] : memref<1x1x10x8xbf16, #tpu.memory_space<vmem>>, vector<1x1x10x8xbf16>
    %12 = vector.shape_cast %11 : vector<1x1x10x8xbf16> to vector<10x8xbf16>
    %cst_12 = arith.constant dense<0.000000e+00> : vector<10x10xf32>
    %13 = tpu.matmul %8, %10, %cst_12 {dimension_numbers = #tpu.dot_dimension_numbers<[1], [1], [0], [0], [0, 0, 1, 0], [], []>} : vector<10x8xbf16>, vector<10x8xbf16>, vector<10x10xf32> -> vector<10x10xf32>
    %c0_13 = arith.constant 0 : index
    %c0_14 = arith.constant 0 : index
    %c0_15 = arith.constant 0 : index
    %14 = vector.load %arg6[%c0_13, %c0_14, %c0_15] : memref<1x1x10xf32, #tpu.memory_space<vmem>>, vector<1x1x10xf32>
    %15 = vector.shape_cast %14 : vector<1x1x10xf32> to vector<1x10xf32>
    %16 = vector.broadcast %15 : vector<1x10xf32> to vector<10x10xf32>
    %17 = arith.addf %13, %16 : vector<10x10xf32>
    %c0_16 = arith.constant 0 : index
    %c0_17 = arith.constant 0 : index
    %18 = vector.load %arg8[%c0_16, %c0_17] : memref<10x1xf32, #tpu.memory_space<vmem>>, vector<10x1xf32>
    %cst_18 = arith.constant dense<0xFF800000> : vector<10xf32>
    %19 = vector.multi_reduction <maximumf>, %17, %cst_18 [1] : vector<10x10xf32> to vector<10xf32>
    %20 = vector.shape_cast %19 : vector<10xf32> to vector<10x1xf32>
    %21 = arith.maximumf %18, %20 : vector<10x1xf32>
    %22 = arith.subf %18, %21 : vector<10x1xf32>
    %23 = math.exp %22 : vector<10x1xf32>
    %24 = vector.broadcast %21 : vector<10x1xf32> to vector<10x10xf32>
    %25 = arith.subf %17, %24 : vector<10x10xf32>
    %26 = math.exp %25 : vector<10x10xf32>
    %c0_19 = arith.constant 0 : index
    %c0_20 = arith.constant 0 : index
    %27 = vector.load %arg9[%c0_19, %c0_20] : memref<10x1xf32, #tpu.memory_space<vmem>>, vector<10x1xf32>
    %28 = arith.mulf %23, %27 : vector<10x1xf32>
    %cst_21 = arith.constant dense<0.000000e+00> : vector<10xf32>
    %29 = vector.multi_reduction <add>, %26, %cst_21 [1] : vector<10x10xf32> to vector<10xf32>
    %30 = vector.shape_cast %29 : vector<10xf32> to vector<10x1xf32>
    %31 = arith.addf %28, %30 : vector<10x1xf32>
    %c0_22 = arith.constant 0 : index
    %c0_23 = arith.constant 0 : index
    %32 = vector.load %arg9[%c0_22, %c0_23] : memref<10x1xf32, #tpu.memory_space<vmem>>, vector<10x1xf32>
    tpu.vector_store %arg9[%c0_22, %c0_23], %31 {strides = array<i32>} : memref<10x1xf32, #tpu.memory_space<vmem>>, vector<10x1xf32>,
    %c0_24 = arith.constant 0 : index
    %c0_25 = arith.constant 0 : index
    %33 = vector.load %arg10[%c0_24, %c0_25] : memref<10x8xf32, #tpu.memory_space<vmem>>, vector<10x8xf32>
    %34 = vector.broadcast %23 : vector<10x1xf32> to vector<10x8xf32>
    %35 = arith.mulf %34, %33 : vector<10x8xf32>
    %36 = arith.truncf %26 : vector<10x10xf32> to vector<10x10xbf16>
    %cst_26 = arith.constant dense<0.000000e+00> : vector<10x8xf32>
    %37 = tpu.matmul %36, %12, %cst_26 {dimension_numbers = #tpu.dot_dimension_numbers<[1], [0], [0], [1], [0, 0, 1, 1], [], []>} : vector<10x10xbf16>, vector<10x8xbf16>, vector<10x8xf32> -> vector<10x8xf32>
    %38 = arith.addf %35, %37 : vector<10x8xf32>
    %c0_27 = arith.constant 0 : index
    %c0_28 = arith.constant 0 : index
    %39 = vector.load %arg10[%c0_27, %c0_28] : memref<10x8xf32, #tpu.memory_space<vmem>>, vector<10x8xf32>
    tpu.vector_store %arg10[%c0_27, %c0_28], %38 {strides = array<i32>} : memref<10x8xf32, #tpu.memory_space<vmem>>, vector<10x8xf32>,
    %c0_29 = arith.constant 0 : index
    %c0_30 = arith.constant 0 : index
    %40 = vector.load %arg8[%c0_29, %c0_30] : memref<10x1xf32, #tpu.memory_space<vmem>>, vector<10x1xf32>
    tpu.vector_store %arg8[%c0_29, %c0_30], %21 {strides = array<i32>} : memref<10x1xf32, #tpu.memory_space<vmem>>, vector<10x1xf32>,
    %c0_i32_31 = arith.constant 0 : i32
    %41 = arith.cmpi eq, %arg2, %c0_i32_31 : i32
    %42 = arith.extui %41 : i1 to i32
    %c0_i32_32 = arith.constant 0 : i32
    %43 = arith.cmpi ne, %42, %c0_i32_32 : i32
    scf.if %43 {
      %c0_33 = arith.constant 0 : index
      %c0_34 = arith.constant 0 : index
      %44 = vector.load %arg10[%c0_33, %c0_34] : memref<10x8xf32, #tpu.memory_space<vmem>>, vector<10x8xf32>
      %c0_35 = arith.constant 0 : index
      %c0_36 = arith.constant 0 : index
      %45 = vector.load %arg9[%c0_35, %c0_36] : memref<10x1xf32, #tpu.memory_space<vmem>>, vector<10x1xf32>
      %46 = tpu.reciprocal %45 {approx = true} : vector<10x1xf32> -> vector<10x1xf32>
      %47 = vector.broadcast %46 : vector<10x1xf32> to vector<10x8xf32>
      %48 = arith.mulf %44, %47 : vector<10x8xf32>
      %49 = arith.truncf %48 : vector<10x8xf32> to vector<10x8xbf16>
      %c0_37 = arith.constant 0 : index
      %c0_38 = arith.constant 0 : index
      %c0_39 = arith.constant 0 : index
      %c0_40 = arith.constant 0 : index
      %50 = vector.load %arg7[%c0_37, %c0_38, %c0_39, %c0_40] : memref<1x1x10x8xbf16, #tpu.memory_space<vmem>>, vector<1x1x10x8xbf16>
      %51 = vector.shape_cast %50 : vector<1x1x10x8xbf16> to vector<10x8xbf16>
      %52 = vector.shape_cast %49 : vector<10x8xbf16> to vector<1x1x10x8xbf16>
      tpu.vector_store %arg7[%c0_37, %c0_38, %c0_39, %c0_40], %52 {strides = array<i32>} : memref<1x1x10x8xbf16, #tpu.memory_space<vmem>>, vector<1x1x10x8xbf16>,
    } else {
    }
    return
  }
  func.func @transform_0(%arg0: i32, %arg1: i32, %arg2: i32) -> (i32, i32, i32, i32) {
    %c0_i32 = arith.constant 0 : i32
    %c0_i32_0 = arith.constant 0 : i32
    %c0_i32_1 = arith.constant 0 : i32
    return %arg0, %arg1, %c0_i32, %c0_i32_0 : i32, i32, i32, i32
  }
  func.func @transform_1(%arg0: i32, %arg1: i32, %arg2: i32) -> (i32, i32, i32, i32) {
    %c0_i32 = arith.constant 0 : i32
    %c0_i32_0 = arith.constant 0 : i32
    return %arg0, %arg1, %arg2, %c0_i32 : i32, i32, i32, i32
  }
  func.func @transform_2(%arg0: i32, %arg1: i32, %arg2: i32) -> (i32, i32, i32, i32) {
    %c0_i32 = arith.constant 0 : i32
    %c0_i32_0 = arith.constant 0 : i32
    return %arg0, %arg1, %arg2, %c0_i32 : i32, i32, i32, i32
  }
  func.func @transform_3(%arg0: i32, %arg1: i32, %arg2: i32) -> (i32, i32, i32) {
    %c0_i32 = arith.constant 0 : i32
    %c0_i32_0 = arith.constant 0 : i32
    return %arg0, %c0_i32, %arg2 : i32, i32, i32
  }
  func.func @transform_4(%arg0: i32, %arg1: i32, %arg2: i32) -> (i32, i32, i32, i32) {
    %c0_i32 = arith.constant 0 : i32
    %c0_i32_0 = arith.constant 0 : i32
    %c0_i32_1 = arith.constant 0 : i32
    return %arg0, %arg1, %c0_i32, %c0_i32_0 : i32, i32, i32, i32
  }
}

module attributes {stable_mosaic.version = 11 : i64} {
  func.func @_matmul_kernel(%arg0: i32, %arg1: i32, %arg2: i32, %arg3: memref<20x32xbf16, #tpu.memory_space<vmem>>, %arg4: memref<32x128xbf16, #tpu.memory_space<vmem>>, %arg5: memref<1x128xf32, #tpu.memory_space<vmem>>, %arg6: memref<20x128xbf16, #tpu.memory_space<vmem>>, %arg7: memref<20x128xf32, #tpu.memory_space<vmem>>) attributes {dimension_semantics = [#tpu.dimension_semantics<parallel>, #tpu.dimension_semantics<parallel>, #tpu.dimension_semantics<arbitrary>], iteration_bounds = array<i64: 1, 1, 1>, scalar_prefetch = 0 : i64, scratch_operands = 1 : i64, tpu.core_type = #tpu.core_type<tc>, window_params = [{transform_indices = @transform_0, window_bounds = array<i64: 20, 32>}, {transform_indices = @transform_1, window_bounds = array<i64: 32, 128>}, {transform_indices = @transform_2, window_bounds = array<i64: 1, 128>}, {transform_indices = @transform_3, window_bounds = array<i64: 20, 128>}]} {
    %c0_i32 = arith.constant 0 : i32
    %0 = arith.cmpi eq, %arg2, %c0_i32 : i32
    %1 = arith.extui %0 : i1 to i32
    %c0_i32_0 = arith.constant 0 : i32
    %2 = arith.cmpi ne, %1, %c0_i32_0 : i32
    scf.if %2 {
      %cst_10 = arith.constant 0.000000e+00 : f32
      %12 = vector.broadcast %cst_10 : f32 to vector<20x128xf32>
      %c0_11 = arith.constant 0 : index
      %c0_12 = arith.constant 0 : index
      %13 = vector.load %arg7[%c0_11, %c0_12] : memref<20x128xf32, #tpu.memory_space<vmem>>, vector<20x128xf32>
      tpu.vector_store %arg7[%c0_11, %c0_12], %12 {strides = array<i32>} : memref<20x128xf32, #tpu.memory_space<vmem>>, vector<20x128xf32>,
    } else {
    }
    %c0 = arith.constant 0 : index
    %c0_1 = arith.constant 0 : index
    %3 = vector.load %arg7[%c0, %c0_1] : memref<20x128xf32, #tpu.memory_space<vmem>>, vector<20x128xf32>
    %c0_2 = arith.constant 0 : index
    %c0_3 = arith.constant 0 : index
    %4 = vector.load %arg3[%c0_2, %c0_3] : memref<20x32xbf16, #tpu.memory_space<vmem>>, vector<20x32xbf16>
    %c0_4 = arith.constant 0 : index
    %c0_5 = arith.constant 0 : index
    %5 = vector.load %arg4[%c0_4, %c0_5] : memref<32x128xbf16, #tpu.memory_space<vmem>>, vector<32x128xbf16>
    %cst = arith.constant dense<0.000000e+00> : vector<20x128xf32>
    %6 = tpu.matmul %4, %5, %cst {dimension_numbers = #tpu.dot_dimension_numbers<[1], [0], [0], [1], [0, 0, 1, 1], [], []>} : vector<20x32xbf16>, vector<32x128xbf16>, vector<20x128xf32> -> vector<20x128xf32>
    %7 = arith.addf %3, %6 : vector<20x128xf32>
    %c0_6 = arith.constant 0 : index
    %c0_7 = arith.constant 0 : index
    %8 = vector.load %arg7[%c0_6, %c0_7] : memref<20x128xf32, #tpu.memory_space<vmem>>, vector<20x128xf32>
    tpu.vector_store %arg7[%c0_6, %c0_7], %7 {strides = array<i32>} : memref<20x128xf32, #tpu.memory_space<vmem>>, vector<20x128xf32>,
    %c0_i32_8 = arith.constant 0 : i32
    %9 = arith.cmpi eq, %arg2, %c0_i32_8 : i32
    %10 = arith.extui %9 : i1 to i32
    %c0_i32_9 = arith.constant 0 : i32
    %11 = arith.cmpi ne, %10, %c0_i32_9 : i32
    scf.if %11 {
      %c0_10 = arith.constant 0 : index
      %c0_11 = arith.constant 0 : index
      %12 = vector.load %arg7[%c0_10, %c0_11] : memref<20x128xf32, #tpu.memory_space<vmem>>, vector<20x128xf32>
      %c0_12 = arith.constant 0 : index
      %c0_13 = arith.constant 0 : index
      %13 = vector.load %arg5[%c0_12, %c0_13] : memref<1x128xf32, #tpu.memory_space<vmem>>, vector<1x128xf32>
      %14 = vector.broadcast %13 : vector<1x128xf32> to vector<20x128xf32>
      %15 = arith.addf %12, %14 : vector<20x128xf32>
      %16 = arith.truncf %15 : vector<20x128xf32> to vector<20x128xbf16>
      %c0_14 = arith.constant 0 : index
      %c0_15 = arith.constant 0 : index
      %17 = vector.load %arg6[%c0_14, %c0_15] : memref<20x128xbf16, #tpu.memory_space<vmem>>, vector<20x128xbf16>
      tpu.vector_store %arg6[%c0_14, %c0_15], %16 {strides = array<i32>} : memref<20x128xbf16, #tpu.memory_space<vmem>>, vector<20x128xbf16>,
    } else {
    }
    return
  }
  func.func @transform_0(%arg0: i32, %arg1: i32, %arg2: i32) -> (i32, i32) {
    %c0_i32 = arith.constant 0 : i32
    return %arg0, %arg2 : i32, i32
  }
  func.func @transform_1(%arg0: i32, %arg1: i32, %arg2: i32) -> (i32, i32) {
    %c0_i32 = arith.constant 0 : i32
    return %arg2, %arg1 : i32, i32
  }
  func.func @transform_2(%arg0: i32, %arg1: i32, %arg2: i32) -> (i32, i32) {
    %c0_i32 = arith.constant 0 : i32
    %c0_i32_0 = arith.constant 0 : i32
    return %c0_i32, %arg1 : i32, i32
  }
  func.func @transform_3(%arg0: i32, %arg1: i32, %arg2: i32) -> (i32, i32) {
    %c0_i32 = arith.constant 0 : i32
    return %arg0, %arg1 : i32, i32
  }
}

module attributes {stable_mosaic.version = 11 : i64} {
  func.func @_matmul_kernel(%arg0: i32, %arg1: i32, %arg2: i32, %arg3: memref<20x32xbf16, #tpu.memory_space<vmem>>, %arg4: memref<32x128xbf16, #tpu.memory_space<vmem>>, %arg5: memref<1x128xf32, #tpu.memory_space<vmem>>, %arg6: memref<20x128xbf16, #tpu.memory_space<vmem>>, %arg7: memref<20x128xf32, #tpu.memory_space<vmem>>) attributes {dimension_semantics = [#tpu.dimension_semantics<parallel>, #tpu.dimension_semantics<parallel>, #tpu.dimension_semantics<arbitrary>], iteration_bounds = array<i64: 1, 1, 1>, scalar_prefetch = 0 : i64, scratch_operands = 1 : i64, tpu.core_type = #tpu.core_type<tc>, window_params = [{transform_indices = @transform_0, window_bounds = array<i64: 20, 32>}, {transform_indices = @transform_1, window_bounds = array<i64: 32, 128>}, {transform_indices = @transform_2, window_bounds = array<i64: 1, 128>}, {transform_indices = @transform_3, window_bounds = array<i64: 20, 128>}]} {
    %c0_i32 = arith.constant 0 : i32
    %0 = arith.cmpi eq, %arg2, %c0_i32 : i32
    %1 = arith.extui %0 : i1 to i32
    %c0_i32_0 = arith.constant 0 : i32
    %2 = arith.cmpi ne, %1, %c0_i32_0 : i32
    scf.if %2 {
      %cst_10 = arith.constant 0.000000e+00 : f32
      %12 = vector.broadcast %cst_10 : f32 to vector<20x128xf32>
      %c0_11 = arith.constant 0 : index
      %c0_12 = arith.constant 0 : index
      %13 = vector.load %arg7[%c0_11, %c0_12] : memref<20x128xf32, #tpu.memory_space<vmem>>, vector<20x128xf32>
      tpu.vector_store %arg7[%c0_11, %c0_12], %12 {strides = array<i32>} : memref<20x128xf32, #tpu.memory_space<vmem>>, vector<20x128xf32>,
    } else {
    }
    %c0 = arith.constant 0 : index
    %c0_1 = arith.constant 0 : index
    %3 = vector.load %arg7[%c0, %c0_1] : memref<20x128xf32, #tpu.memory_space<vmem>>, vector<20x128xf32>
    %c0_2 = arith.constant 0 : index
    %c0_3 = arith.constant 0 : index
    %4 = vector.load %arg3[%c0_2, %c0_3] : memref<20x32xbf16, #tpu.memory_space<vmem>>, vector<20x32xbf16>
    %c0_4 = arith.constant 0 : index
    %c0_5 = arith.constant 0 : index
    %5 = vector.load %arg4[%c0_4, %c0_5] : memref<32x128xbf16, #tpu.memory_space<vmem>>, vector<32x128xbf16>
    %cst = arith.constant dense<0.000000e+00> : vector<20x128xf32>
    %6 = tpu.matmul %4, %5, %cst {dimension_numbers = #tpu.dot_dimension_numbers<[1], [0], [0], [1], [0, 0, 1, 1], [], []>} : vector<20x32xbf16>, vector<32x128xbf16>, vector<20x128xf32> -> vector<20x128xf32>
    %7 = arith.addf %3, %6 : vector<20x128xf32>
    %c0_6 = arith.constant 0 : index
    %c0_7 = arith.constant 0 : index
    %8 = vector.load %arg7[%c0_6, %c0_7] : memref<20x128xf32, #tpu.memory_space<vmem>>, vector<20x128xf32>
    tpu.vector_store %arg7[%c0_6, %c0_7], %7 {strides = array<i32>} : memref<20x128xf32, #tpu.memory_space<vmem>>, vector<20x128xf32>,
    %c0_i32_8 = arith.constant 0 : i32
    %9 = arith.cmpi eq, %arg2, %c0_i32_8 : i32
    %10 = arith.extui %9 : i1 to i32
    %c0_i32_9 = arith.constant 0 : i32
    %11 = arith.cmpi ne, %10, %c0_i32_9 : i32
    scf.if %11 {
      %c0_10 = arith.constant 0 : index
      %c0_11 = arith.constant 0 : index
      %12 = vector.load %arg7[%c0_10, %c0_11] : memref<20x128xf32, #tpu.memory_space<vmem>>, vector<20x128xf32>
      %c0_12 = arith.constant 0 : index
      %c0_13 = arith.constant 0 : index
      %13 = vector.load %arg5[%c0_12, %c0_13] : memref<1x128xf32, #tpu.memory_space<vmem>>, vector<1x128xf32>
      %14 = vector.broadcast %13 : vector<1x128xf32> to vector<20x128xf32>
      %15 = arith.addf %12, %14 : vector<20x128xf32>
      %cst_14 = arith.constant 0.000000e+00 : f32
      %16 = vector.broadcast %cst_14 : f32 to vector<20x128xf32>
      %17 = arith.maximumf %15, %16 : vector<20x128xf32>
      %18 = arith.truncf %17 : vector<20x128xf32> to vector<20x128xbf16>
      %c0_15 = arith.constant 0 : index
      %c0_16 = arith.constant 0 : index
      %19 = vector.load %arg6[%c0_15, %c0_16] : memref<20x128xbf16, #tpu.memory_space<vmem>>, vector<20x128xbf16>
      tpu.vector_store %arg6[%c0_15, %c0_16], %18 {strides = array<i32>} : memref<20x128xbf16, #tpu.memory_space<vmem>>, vector<20x128xbf16>,
    } else {
    }
    return
  }
  func.func @transform_0(%arg0: i32, %arg1: i32, %arg2: i32) -> (i32, i32) {
    %c0_i32 = arith.constant 0 : i32
    return %arg0, %arg2 : i32, i32
  }
  func.func @transform_1(%arg0: i32, %arg1: i32, %arg2: i32) -> (i32, i32) {
    %c0_i32 = arith.constant 0 : i32
    return %arg2, %arg1 : i32, i32
  }
  func.func @transform_2(%arg0: i32, %arg1: i32, %arg2: i32) -> (i32, i32) {
    %c0_i32 = arith.constant 0 : i32
    %c0_i32_0 = arith.constant 0 : i32
    return %c0_i32, %arg1 : i32, i32
  }
  func.func @transform_3(%arg0: i32, %arg1: i32, %arg2: i32) -> (i32, i32) {
    %c0_i32 = arith.constant 0 : i32
    return %arg0, %arg1 : i32, i32
  }
}

module attributes {stable_mosaic.version = 11 : i64} {
  func.func @_matmul_add_ln_kernel(%arg0: i32, %arg1: i32, %arg2: i32, %arg3: memref<20x32xbf16, #tpu.memory_space<vmem>>, %arg4: memref<32x128xbf16, #tpu.memory_space<vmem>>, %arg5: memref<1x128xf32, #tpu.memory_space<vmem>>, %arg6: memref<20x128xbf16, #tpu.memory_space<vmem>>, %arg7: memref<1x128xf32, #tpu.memory_space<vmem>>, %arg8: memref<1x128xf32, #tpu.memory_space<vmem>>, %arg9: memref<20x128xbf16, #tpu.memory_space<vmem>>, %arg10: memref<20x128xf32, #tpu.memory_space<vmem>>) attributes {dimension_semantics = [#tpu.dimension_semantics<parallel>, #tpu.dimension_semantics<parallel>, #tpu.dimension_semantics<arbitrary>], iteration_bounds = array<i64: 1, 1, 1>, scalar_prefetch = 0 : i64, scratch_operands = 1 : i64, tpu.core_type = #tpu.core_type<tc>, window_params = [{transform_indices = @transform_0, window_bounds = array<i64: 20, 32>}, {transform_indices = @transform_1, window_bounds = array<i64: 32, 128>}, {transform_indices = @transform_2, window_bounds = array<i64: 1, 128>}, {transform_indices = @transform_3, window_bounds = array<i64: 20, 128>}, {transform_indices = @transform_4, window_bounds = array<i64: 1, 128>}, {transform_indices = @transform_5, window_bounds = array<i64: 1, 128>}, {transform_indices = @transform_6, window_bounds = array<i64: 20, 128>}]} {
    %c0_i32 = arith.constant 0 : i32
    %0 = arith.cmpi eq, %arg2, %c0_i32 : i32
    %1 = arith.extui %0 : i1 to i32
    %c0_i32_0 = arith.constant 0 : i32
    %2 = arith.cmpi ne, %1, %c0_i32_0 : i32
    scf.if %2 {
      %cst_10 = arith.constant 0.000000e+00 : f32
      %12 = vector.broadcast %cst_10 : f32 to vector<20x128xf32>
      %c0_11 = arith.constant 0 : index
      %c0_12 = arith.constant 0 : index
      %13 = vector.load %arg10[%c0_11, %c0_12] : memref<20x128xf32, #tpu.memory_space<vmem>>, vector<20x128xf32>
      tpu.vector_store %arg10[%c0_11, %c0_12], %12 {strides = array<i32>} : memref<20x128xf32, #tpu.memory_space<vmem>>, vector<20x128xf32>,
    } else {
    }
    %c0 = arith.constant 0 : index
    %c0_1 = arith.constant 0 : index
    %3 = vector.load %arg10[%c0, %c0_1] : memref<20x128xf32, #tpu.memory_space<vmem>>, vector<20x128xf32>
    %c0_2 = arith.constant 0 : index
    %c0_3 = arith.constant 0 : index
    %4 = vector.load %arg3[%c0_2, %c0_3] : memref<20x32xbf16, #tpu.memory_space<vmem>>, vector<20x32xbf16>
    %c0_4 = arith.constant 0 : index
    %c0_5 = arith.constant 0 : index
    %5 = vector.load %arg4[%c0_4, %c0_5] : memref<32x128xbf16, #tpu.memory_space<vmem>>, vector<32x128xbf16>
    %cst = arith.constant dense<0.000000e+00> : vector<20x128xf32>
    %6 = tpu.matmul %4, %5, %cst {dimension_numbers = #tpu.dot_dimension_numbers<[1], [0], [0], [1], [0, 0, 1, 1], [], []>} : vector<20x32xbf16>, vector<32x128xbf16>, vector<20x128xf32> -> vector<20x128xf32>
    %7 = arith.addf %3, %6 : vector<20x128xf32>
    %c0_6 = arith.constant 0 : index
    %c0_7 = arith.constant 0 : index
    %8 = vector.load %arg10[%c0_6, %c0_7] : memref<20x128xf32, #tpu.memory_space<vmem>>, vector<20x128xf32>
    tpu.vector_store %arg10[%c0_6, %c0_7], %7 {strides = array<i32>} : memref<20x128xf32, #tpu.memory_space<vmem>>, vector<20x128xf32>,
    %c0_i32_8 = arith.constant 0 : i32
    %9 = arith.cmpi eq, %arg2, %c0_i32_8 : i32
    %10 = arith.extui %9 : i1 to i32
    %c0_i32_9 = arith.constant 0 : i32
    %11 = arith.cmpi ne, %10, %c0_i32_9 : i32
    scf.if %11 {
      %c0_10 = arith.constant 0 : index
      %c0_11 = arith.constant 0 : index
      %12 = vector.load %arg10[%c0_10, %c0_11] : memref<20x128xf32, #tpu.memory_space<vmem>>, vector<20x128xf32>
      %c0_12 = arith.constant 0 : index
      %c0_13 = arith.constant 0 : index
      %13 = vector.load %arg5[%c0_12, %c0_13] : memref<1x128xf32, #tpu.memory_space<vmem>>, vector<1x128xf32>
      %14 = vector.broadcast %13 : vector<1x128xf32> to vector<20x128xf32>
      %15 = arith.addf %12, %14 : vector<20x128xf32>
      %c0_14 = arith.constant 0 : index
      %c0_15 = arith.constant 0 : index
      %16 = vector.load %arg6[%c0_14, %c0_15] : memref<20x128xbf16, #tpu.memory_space<vmem>>, vector<20x128xbf16>
      %17 = arith.extf %16 : vector<20x128xbf16> to vector<20x128xf32>
      %18 = arith.addf %15, %17 : vector<20x128xf32>
      %cst_16 = arith.constant dense<0.000000e+00> : vector<20xf32>
      %19 = vector.multi_reduction <add>, %18, %cst_16 [1] : vector<20x128xf32> to vector<20xf32>
      %20 = vector.shape_cast %19 : vector<20xf32> to vector<20x1xf32>
      %cst_17 = arith.constant 3.125000e-02 : f32
      %21 = vector.broadcast %cst_17 : f32 to vector<20x1xf32>
      %22 = arith.mulf %20, %21 : vector<20x1xf32>
      %23 = arith.mulf %18, %18 : vector<20x128xf32>
      %cst_18 = arith.constant dense<0.000000e+00> : vector<20xf32>
      %24 = vector.multi_reduction <add>, %23, %cst_18 [1] : vector<20x128xf32> to vector<20xf32>
      %25 = vector.shape_cast %24 : vector<20xf32> to vector<20x1xf32>
      %cst_19 = arith.constant 3.125000e-02 : f32
      %26 = vector.broadcast %cst_19 : f32 to vector<20x1xf32>
      %27 = arith.mulf %25, %26 : vector<20x1xf32>
      %28 = arith.mulf %22, %22 : vector<20x1xf32>
      %29 = arith.subf %27, %28 : vector<20x1xf32>
      %cst_20 = arith.constant 0.000000e+00 : f32
      %30 = vector.broadcast %cst_20 : f32 to vector<20x1xf32>
      %31 = arith.maximumf %29, %30 : vector<20x1xf32>
      %32 = vector.broadcast %22 : vector<20x1xf32> to vector<20x128xf32>
      %33 = arith.subf %18, %32 : vector<20x128xf32>
      %cst_21 = arith.constant 9.99999974E-6 : f32
      %34 = vector.broadcast %cst_21 : f32 to vector<20x1xf32>
      %35 = arith.addf %31, %34 : vector<20x1xf32>
      %36 = math.rsqrt %35 : vector<20x1xf32>
      %37 = vector.broadcast %36 : vector<20x1xf32> to vector<20x128xf32>
      %38 = arith.mulf %33, %37 : vector<20x128xf32>
      %c0_22 = arith.constant 0 : index
      %c0_23 = arith.constant 0 : index
      %39 = vector.load %arg7[%c0_22, %c0_23] : memref<1x128xf32, #tpu.memory_space<vmem>>, vector<1x128xf32>
      %40 = vector.broadcast %39 : vector<1x128xf32> to vector<20x128xf32>
      %41 = arith.mulf %38, %40 : vector<20x128xf32>
      %c0_24 = arith.constant 0 : index
      %c0_25 = arith.constant 0 : index
      %42 = vector.load %arg8[%c0_24, %c0_25] : memref<1x128xf32, #tpu.memory_space<vmem>>, vector<1x128xf32>
      %43 = vector.broadcast %42 : vector<1x128xf32> to vector<20x128xf32>
      %44 = arith.addf %41, %43 : vector<20x128xf32>
      %45 = arith.truncf %44 : vector<20x128xf32> to vector<20x128xbf16>
      %c0_26 = arith.constant 0 : index
      %c0_27 = arith.constant 0 : index
      %46 = vector.load %arg9[%c0_26, %c0_27] : memref<20x128xbf16, #tpu.memory_space<vmem>>, vector<20x128xbf16>
      tpu.vector_store %arg9[%c0_26, %c0_27], %45 {strides = array<i32>} : memref<20x128xbf16, #tpu.memory_space<vmem>>, vector<20x128xbf16>,
    } else {
    }
    return
  }
  func.func @transform_0(%arg0: i32, %arg1: i32, %arg2: i32) -> (i32, i32) {
    %c0_i32 = arith.constant 0 : i32
    return %arg0, %arg2 : i32, i32
  }
  func.func @transform_1(%arg0: i32, %arg1: i32, %arg2: i32) -> (i32, i32) {
    %c0_i32 = arith.constant 0 : i32
    return %arg2, %arg1 : i32, i32
  }
  func.func @transform_2(%arg0: i32, %arg1: i32, %arg2: i32) -> (i32, i32) {
    %c0_i32 = arith.constant 0 : i32
    %c0_i32_0 = arith.constant 0 : i32
    return %c0_i32, %arg1 : i32, i32
  }
  func.func @transform_3(%arg0: i32, %arg1: i32, %arg2: i32) -> (i32, i32) {
    %c0_i32 = arith.constant 0 : i32
    return %arg0, %arg1 : i32, i32
  }
  func.func @transform_4(%arg0: i32, %arg1: i32, %arg2: i32) -> (i32, i32) {
    %c0_i32 = arith.constant 0 : i32
    %c0_i32_0 = arith.constant 0 : i32
    return %c0_i32, %arg1 : i32, i32
  }
  func.func @transform_5(%arg0: i32, %arg1: i32, %arg2: i32) -> (i32, i32) {
    %c0_i32 = arith.constant 0 : i32
    %c0_i32_0 = arith.constant 0 : i32
    return %c0_i32, %arg1 : i32, i32
  }
  func.func @transform_6(%arg0: i32, %arg1: i32, %arg2: i32) -> (i32, i32) {
    %c0_i32 = arith.constant 0 : i32
    return %arg0, %arg1 : i32, i32
  }
}

module attributes {stable_mosaic.version = 11 : i64} {
  func.func @_matmul_add_ln_kernel(%arg0: i32, %arg1: i32, %arg2: i32, %arg3: memref<20x64xbf16, #tpu.memory_space<vmem>>, %arg4: memref<64x128xbf16, #tpu.memory_space<vmem>>, %arg5: memref<1x128xf32, #tpu.memory_space<vmem>>, %arg6: memref<20x128xbf16, #tpu.memory_space<vmem>>, %arg7: memref<1x128xf32, #tpu.memory_space<vmem>>, %arg8: memref<1x128xf32, #tpu.memory_space<vmem>>, %arg9: memref<20x128xbf16, #tpu.memory_space<vmem>>, %arg10: memref<20x128xf32, #tpu.memory_space<vmem>>) attributes {dimension_semantics = [#tpu.dimension_semantics<parallel>, #tpu.dimension_semantics<parallel>, #tpu.dimension_semantics<arbitrary>], iteration_bounds = array<i64: 1, 1, 1>, scalar_prefetch = 0 : i64, scratch_operands = 1 : i64, tpu.core_type = #tpu.core_type<tc>, window_params = [{transform_indices = @transform_0, window_bounds = array<i64: 20, 64>}, {transform_indices = @transform_1, window_bounds = array<i64: 64, 128>}, {transform_indices = @transform_2, window_bounds = array<i64: 1, 128>}, {transform_indices = @transform_3, window_bounds = array<i64: 20, 128>}, {transform_indices = @transform_4, window_bounds = array<i64: 1, 128>}, {transform_indices = @transform_5, window_bounds = array<i64: 1, 128>}, {transform_indices = @transform_6, window_bounds = array<i64: 20, 128>}]} {
    %c0_i32 = arith.constant 0 : i32
    %0 = arith.cmpi eq, %arg2, %c0_i32 : i32
    %1 = arith.extui %0 : i1 to i32
    %c0_i32_0 = arith.constant 0 : i32
    %2 = arith.cmpi ne, %1, %c0_i32_0 : i32
    scf.if %2 {
      %cst_10 = arith.constant 0.000000e+00 : f32
      %12 = vector.broadcast %cst_10 : f32 to vector<20x128xf32>
      %c0_11 = arith.constant 0 : index
      %c0_12 = arith.constant 0 : index
      %13 = vector.load %arg10[%c0_11, %c0_12] : memref<20x128xf32, #tpu.memory_space<vmem>>, vector<20x128xf32>
      tpu.vector_store %arg10[%c0_11, %c0_12], %12 {strides = array<i32>} : memref<20x128xf32, #tpu.memory_space<vmem>>, vector<20x128xf32>,
    } else {
    }
    %c0 = arith.constant 0 : index
    %c0_1 = arith.constant 0 : index
    %3 = vector.load %arg10[%c0, %c0_1] : memref<20x128xf32, #tpu.memory_space<vmem>>, vector<20x128xf32>
    %c0_2 = arith.constant 0 : index
    %c0_3 = arith.constant 0 : index
    %4 = vector.load %arg3[%c0_2, %c0_3] : memref<20x64xbf16, #tpu.memory_space<vmem>>, vector<20x64xbf16>
    %c0_4 = arith.constant 0 : index
    %c0_5 = arith.constant 0 : index
    %5 = vector.load %arg4[%c0_4, %c0_5] : memref<64x128xbf16, #tpu.memory_space<vmem>>, vector<64x128xbf16>
    %cst = arith.constant dense<0.000000e+00> : vector<20x128xf32>
    %6 = tpu.matmul %4, %5, %cst {dimension_numbers = #tpu.dot_dimension_numbers<[1], [0], [0], [1], [0, 0, 1, 1], [], []>} : vector<20x64xbf16>, vector<64x128xbf16>, vector<20x128xf32> -> vector<20x128xf32>
    %7 = arith.addf %3, %6 : vector<20x128xf32>
    %c0_6 = arith.constant 0 : index
    %c0_7 = arith.constant 0 : index
    %8 = vector.load %arg10[%c0_6, %c0_7] : memref<20x128xf32, #tpu.memory_space<vmem>>, vector<20x128xf32>
    tpu.vector_store %arg10[%c0_6, %c0_7], %7 {strides = array<i32>} : memref<20x128xf32, #tpu.memory_space<vmem>>, vector<20x128xf32>,
    %c0_i32_8 = arith.constant 0 : i32
    %9 = arith.cmpi eq, %arg2, %c0_i32_8 : i32
    %10 = arith.extui %9 : i1 to i32
    %c0_i32_9 = arith.constant 0 : i32
    %11 = arith.cmpi ne, %10, %c0_i32_9 : i32
    scf.if %11 {
      %c0_10 = arith.constant 0 : index
      %c0_11 = arith.constant 0 : index
      %12 = vector.load %arg10[%c0_10, %c0_11] : memref<20x128xf32, #tpu.memory_space<vmem>>, vector<20x128xf32>
      %c0_12 = arith.constant 0 : index
      %c0_13 = arith.constant 0 : index
      %13 = vector.load %arg5[%c0_12, %c0_13] : memref<1x128xf32, #tpu.memory_space<vmem>>, vector<1x128xf32>
      %14 = vector.broadcast %13 : vector<1x128xf32> to vector<20x128xf32>
      %15 = arith.addf %12, %14 : vector<20x128xf32>
      %c0_14 = arith.constant 0 : index
      %c0_15 = arith.constant 0 : index
      %16 = vector.load %arg6[%c0_14, %c0_15] : memref<20x128xbf16, #tpu.memory_space<vmem>>, vector<20x128xbf16>
      %17 = arith.extf %16 : vector<20x128xbf16> to vector<20x128xf32>
      %18 = arith.addf %15, %17 : vector<20x128xf32>
      %cst_16 = arith.constant dense<0.000000e+00> : vector<20xf32>
      %19 = vector.multi_reduction <add>, %18, %cst_16 [1] : vector<20x128xf32> to vector<20xf32>
      %20 = vector.shape_cast %19 : vector<20xf32> to vector<20x1xf32>
      %cst_17 = arith.constant 3.125000e-02 : f32
      %21 = vector.broadcast %cst_17 : f32 to vector<20x1xf32>
      %22 = arith.mulf %20, %21 : vector<20x1xf32>
      %23 = arith.mulf %18, %18 : vector<20x128xf32>
      %cst_18 = arith.constant dense<0.000000e+00> : vector<20xf32>
      %24 = vector.multi_reduction <add>, %23, %cst_18 [1] : vector<20x128xf32> to vector<20xf32>
      %25 = vector.shape_cast %24 : vector<20xf32> to vector<20x1xf32>
      %cst_19 = arith.constant 3.125000e-02 : f32
      %26 = vector.broadcast %cst_19 : f32 to vector<20x1xf32>
      %27 = arith.mulf %25, %26 : vector<20x1xf32>
      %28 = arith.mulf %22, %22 : vector<20x1xf32>
      %29 = arith.subf %27, %28 : vector<20x1xf32>
      %cst_20 = arith.constant 0.000000e+00 : f32
      %30 = vector.broadcast %cst_20 : f32 to vector<20x1xf32>
      %31 = arith.maximumf %29, %30 : vector<20x1xf32>
      %32 = vector.broadcast %22 : vector<20x1xf32> to vector<20x128xf32>
      %33 = arith.subf %18, %32 : vector<20x128xf32>
      %cst_21 = arith.constant 9.99999974E-6 : f32
      %34 = vector.broadcast %cst_21 : f32 to vector<20x1xf32>
      %35 = arith.addf %31, %34 : vector<20x1xf32>
      %36 = math.rsqrt %35 : vector<20x1xf32>
      %37 = vector.broadcast %36 : vector<20x1xf32> to vector<20x128xf32>
      %38 = arith.mulf %33, %37 : vector<20x128xf32>
      %c0_22 = arith.constant 0 : index
      %c0_23 = arith.constant 0 : index
      %39 = vector.load %arg7[%c0_22, %c0_23] : memref<1x128xf32, #tpu.memory_space<vmem>>, vector<1x128xf32>
      %40 = vector.broadcast %39 : vector<1x128xf32> to vector<20x128xf32>
      %41 = arith.mulf %38, %40 : vector<20x128xf32>
      %c0_24 = arith.constant 0 : index
      %c0_25 = arith.constant 0 : index
      %42 = vector.load %arg8[%c0_24, %c0_25] : memref<1x128xf32, #tpu.memory_space<vmem>>, vector<1x128xf32>
      %43 = vector.broadcast %42 : vector<1x128xf32> to vector<20x128xf32>
      %44 = arith.addf %41, %43 : vector<20x128xf32>
      %45 = arith.truncf %44 : vector<20x128xf32> to vector<20x128xbf16>
      %c0_26 = arith.constant 0 : index
      %c0_27 = arith.constant 0 : index
      %46 = vector.load %arg9[%c0_26, %c0_27] : memref<20x128xbf16, #tpu.memory_space<vmem>>, vector<20x128xbf16>
      tpu.vector_store %arg9[%c0_26, %c0_27], %45 {strides = array<i32>} : memref<20x128xbf16, #tpu.memory_space<vmem>>, vector<20x128xbf16>,
    } else {
    }
    return
  }
  func.func @transform_0(%arg0: i32, %arg1: i32, %arg2: i32) -> (i32, i32) {
    %c0_i32 = arith.constant 0 : i32
    return %arg0, %arg2 : i32, i32
  }
  func.func @transform_1(%arg0: i32, %arg1: i32, %arg2: i32) -> (i32, i32) {
    %c0_i32 = arith.constant 0 : i32
    return %arg2, %arg1 : i32, i32
  }
  func.func @transform_2(%arg0: i32, %arg1: i32, %arg2: i32) -> (i32, i32) {
    %c0_i32 = arith.constant 0 : i32
    %c0_i32_0 = arith.constant 0 : i32
    return %c0_i32, %arg1 : i32, i32
  }
  func.func @transform_3(%arg0: i32, %arg1: i32, %arg2: i32) -> (i32, i32) {
    %c0_i32 = arith.constant 0 : i32
    return %arg0, %arg1 : i32, i32
  }
  func.func @transform_4(%arg0: i32, %arg1: i32, %arg2: i32) -> (i32, i32) {
    %c0_i32 = arith.constant 0 : i32
    %c0_i32_0 = arith.constant 0 : i32
    return %c0_i32, %arg1 : i32, i32
  }
  func.func @transform_5(%arg0: i32, %arg1: i32, %arg2: i32) -> (i32, i32) {
    %c0_i32 = arith.constant 0 : i32
    %c0_i32_0 = arith.constant 0 : i32
    return %c0_i32, %arg1 : i32, i32
  }
  func.func @transform_6(%arg0: i32, %arg1: i32, %arg2: i32) -> (i32, i32) {
    %c0_i32 = arith.constant 0 : i32
    return %arg0, %arg1 : i32, i32
  }
}

module attributes {stable_mosaic.version = 11 : i64} {
  func.func @_matmul_kernel(%arg0: i32, %arg1: i32, %arg2: i32, %arg3: memref<16x32xbf16, #tpu.memory_space<vmem>>, %arg4: memref<32x128xbf16, #tpu.memory_space<vmem>>, %arg5: memref<1x128xf32, #tpu.memory_space<vmem>>, %arg6: memref<16x128xbf16, #tpu.memory_space<vmem>>, %arg7: memref<16x128xf32, #tpu.memory_space<vmem>>) attributes {dimension_semantics = [#tpu.dimension_semantics<parallel>, #tpu.dimension_semantics<parallel>, #tpu.dimension_semantics<arbitrary>], iteration_bounds = array<i64: 1, 1, 1>, scalar_prefetch = 0 : i64, scratch_operands = 1 : i64, tpu.core_type = #tpu.core_type<tc>, window_params = [{transform_indices = @transform_0, window_bounds = array<i64: 16, 32>}, {transform_indices = @transform_1, window_bounds = array<i64: 32, 128>}, {transform_indices = @transform_2, window_bounds = array<i64: 1, 128>}, {transform_indices = @transform_3, window_bounds = array<i64: 16, 128>}]} {
    %c0_i32 = arith.constant 0 : i32
    %0 = arith.cmpi eq, %arg2, %c0_i32 : i32
    %1 = arith.extui %0 : i1 to i32
    %c0_i32_0 = arith.constant 0 : i32
    %2 = arith.cmpi ne, %1, %c0_i32_0 : i32
    scf.if %2 {
      %cst_10 = arith.constant 0.000000e+00 : f32
      %12 = vector.broadcast %cst_10 : f32 to vector<16x128xf32>
      %c0_11 = arith.constant 0 : index
      %c0_12 = arith.constant 0 : index
      %13 = vector.load %arg7[%c0_11, %c0_12] : memref<16x128xf32, #tpu.memory_space<vmem>>, vector<16x128xf32>
      tpu.vector_store %arg7[%c0_11, %c0_12], %12 {strides = array<i32>} : memref<16x128xf32, #tpu.memory_space<vmem>>, vector<16x128xf32>,
    } else {
    }
    %c0 = arith.constant 0 : index
    %c0_1 = arith.constant 0 : index
    %3 = vector.load %arg7[%c0, %c0_1] : memref<16x128xf32, #tpu.memory_space<vmem>>, vector<16x128xf32>
    %c0_2 = arith.constant 0 : index
    %c0_3 = arith.constant 0 : index
    %4 = vector.load %arg3[%c0_2, %c0_3] : memref<16x32xbf16, #tpu.memory_space<vmem>>, vector<16x32xbf16>
    %c0_4 = arith.constant 0 : index
    %c0_5 = arith.constant 0 : index
    %5 = vector.load %arg4[%c0_4, %c0_5] : memref<32x128xbf16, #tpu.memory_space<vmem>>, vector<32x128xbf16>
    %cst = arith.constant dense<0.000000e+00> : vector<16x128xf32>
    %6 = tpu.matmul %4, %5, %cst {dimension_numbers = #tpu.dot_dimension_numbers<[1], [0], [0], [1], [0, 0, 1, 1], [], []>} : vector<16x32xbf16>, vector<32x128xbf16>, vector<16x128xf32> -> vector<16x128xf32>
    %7 = arith.addf %3, %6 : vector<16x128xf32>
    %c0_6 = arith.constant 0 : index
    %c0_7 = arith.constant 0 : index
    %8 = vector.load %arg7[%c0_6, %c0_7] : memref<16x128xf32, #tpu.memory_space<vmem>>, vector<16x128xf32>
    tpu.vector_store %arg7[%c0_6, %c0_7], %7 {strides = array<i32>} : memref<16x128xf32, #tpu.memory_space<vmem>>, vector<16x128xf32>,
    %c0_i32_8 = arith.constant 0 : i32
    %9 = arith.cmpi eq, %arg2, %c0_i32_8 : i32
    %10 = arith.extui %9 : i1 to i32
    %c0_i32_9 = arith.constant 0 : i32
    %11 = arith.cmpi ne, %10, %c0_i32_9 : i32
    scf.if %11 {
      %c0_10 = arith.constant 0 : index
      %c0_11 = arith.constant 0 : index
      %12 = vector.load %arg7[%c0_10, %c0_11] : memref<16x128xf32, #tpu.memory_space<vmem>>, vector<16x128xf32>
      %c0_12 = arith.constant 0 : index
      %c0_13 = arith.constant 0 : index
      %13 = vector.load %arg5[%c0_12, %c0_13] : memref<1x128xf32, #tpu.memory_space<vmem>>, vector<1x128xf32>
      %14 = vector.broadcast %13 : vector<1x128xf32> to vector<16x128xf32>
      %15 = arith.addf %12, %14 : vector<16x128xf32>
      %16 = arith.truncf %15 : vector<16x128xf32> to vector<16x128xbf16>
      %c0_14 = arith.constant 0 : index
      %c0_15 = arith.constant 0 : index
      %17 = vector.load %arg6[%c0_14, %c0_15] : memref<16x128xbf16, #tpu.memory_space<vmem>>, vector<16x128xbf16>
      tpu.vector_store %arg6[%c0_14, %c0_15], %16 {strides = array<i32>} : memref<16x128xbf16, #tpu.memory_space<vmem>>, vector<16x128xbf16>,
    } else {
    }
    return
  }
  func.func @transform_0(%arg0: i32, %arg1: i32, %arg2: i32) -> (i32, i32) {
    %c0_i32 = arith.constant 0 : i32
    return %arg0, %arg2 : i32, i32
  }
  func.func @transform_1(%arg0: i32, %arg1: i32, %arg2: i32) -> (i32, i32) {
    %c0_i32 = arith.constant 0 : i32
    return %arg2, %arg1 : i32, i32
  }
  func.func @transform_2(%arg0: i32, %arg1: i32, %arg2: i32) -> (i32, i32) {
    %c0_i32 = arith.constant 0 : i32
    %c0_i32_0 = arith.constant 0 : i32
    return %c0_i32, %arg1 : i32, i32
  }
  func.func @transform_3(%arg0: i32, %arg1: i32, %arg2: i32) -> (i32, i32) {
    %c0_i32 = arith.constant 0 : i32
    return %arg0, %arg1 : i32, i32
  }
}

module attributes {stable_mosaic.version = 11 : i64} {
  func.func @_flash_attn_kernel(%arg0: i32, %arg1: i32, %arg2: i32, %arg3: memref<1x1x8x8xbf16, #tpu.memory_space<vmem>>, %arg4: memref<1x1x8x8xbf16, #tpu.memory_space<vmem>>, %arg5: memref<1x1x8x8xbf16, #tpu.memory_space<vmem>>, %arg6: memref<1x1x8xf32, #tpu.memory_space<vmem>>, %arg7: memref<1x1x8x8xbf16, #tpu.memory_space<vmem>>, %arg8: memref<8x1xf32, #tpu.memory_space<vmem>>, %arg9: memref<8x1xf32, #tpu.memory_space<vmem>>, %arg10: memref<8x8xf32, #tpu.memory_space<vmem>>) attributes {dimension_semantics = [#tpu.dimension_semantics<parallel>, #tpu.dimension_semantics<parallel>, #tpu.dimension_semantics<arbitrary>], iteration_bounds = array<i64: 2, 4, 1>, scalar_prefetch = 0 : i64, scratch_operands = 3 : i64, tpu.core_type = #tpu.core_type<tc>, window_params = [{transform_indices = @transform_0, window_bounds = array<i64: 1, 1, 8, 8>}, {transform_indices = @transform_1, window_bounds = array<i64: 1, 1, 8, 8>}, {transform_indices = @transform_2, window_bounds = array<i64: 1, 1, 8, 8>}, {transform_indices = @transform_3, window_bounds = array<i64: 1, 1, 8>}, {transform_indices = @transform_4, window_bounds = array<i64: 1, 1, 8, 8>}]} {
    %c0_i32 = arith.constant 0 : i32
    %0 = arith.cmpi eq, %arg2, %c0_i32 : i32
    %1 = arith.extui %0 : i1 to i32
    %c0_i32_0 = arith.constant 0 : i32
    %2 = arith.cmpi ne, %1, %c0_i32_0 : i32
    scf.if %2 {
      %cst_34 = arith.constant -1.000000e+30 : f32
      %52 = vector.broadcast %cst_34 : f32 to vector<8x1xf32>
      %c0_35 = arith.constant 0 : index
      %c0_36 = arith.constant 0 : index
      %53 = vector.load %arg8[%c0_35, %c0_36] : memref<8x1xf32, #tpu.memory_space<vmem>>, vector<8x1xf32>
      tpu.vector_store %arg8[%c0_35, %c0_36], %52 {strides = array<i32>} : memref<8x1xf32, #tpu.memory_space<vmem>>, vector<8x1xf32>,
      %cst_37 = arith.constant 0.000000e+00 : f32
      %54 = vector.broadcast %cst_37 : f32 to vector<8x1xf32>
      %c0_38 = arith.constant 0 : index
      %c0_39 = arith.constant 0 : index
      %55 = vector.load %arg9[%c0_38, %c0_39] : memref<8x1xf32, #tpu.memory_space<vmem>>, vector<8x1xf32>
      tpu.vector_store %arg9[%c0_38, %c0_39], %54 {strides = array<i32>} : memref<8x1xf32, #tpu.memory_space<vmem>>, vector<8x1xf32>,
      %cst_40 = arith.constant 0.000000e+00 : f32
      %56 = vector.broadcast %cst_40 : f32 to vector<8x8xf32>
      %c0_41 = arith.constant 0 : index
      %c0_42 = arith.constant 0 : index
      %57 = vector.load %arg10[%c0_41, %c0_42] : memref<8x8xf32, #tpu.memory_space<vmem>>, vector<8x8xf32>
      tpu.vector_store %arg10[%c0_41, %c0_42], %56 {strides = array<i32>} : memref<8x8xf32, #tpu.memory_space<vmem>>, vector<8x8xf32>,
    } else {
    }
    %c0 = arith.constant 0 : index
    %c0_1 = arith.constant 0 : index
    %c0_2 = arith.constant 0 : index
    %c0_3 = arith.constant 0 : index
    %3 = vector.load %arg3[%c0, %c0_1, %c0_2, %c0_3] : memref<1x1x8x8xbf16, #tpu.memory_space<vmem>>, vector<1x1x8x8xbf16>
    %4 = vector.shape_cast %3 : vector<1x1x8x8xbf16> to vector<8x8xbf16>
    %5 = arith.extf %4 : vector<8x8xbf16> to vector<8x8xf32>
    %cst = arith.constant 0.353553385 : f32
    %6 = vector.broadcast %cst : f32 to vector<8x8xf32>
    %7 = arith.mulf %5, %6 : vector<8x8xf32>
    %8 = arith.truncf %7 : vector<8x8xf32> to vector<8x8xbf16>
    %c0_4 = arith.constant 0 : index
    %c0_5 = arith.constant 0 : index
    %c0_6 = arith.constant 0 : index
    %c0_7 = arith.constant 0 : index
    %9 = vector.load %arg4[%c0_4, %c0_5, %c0_6, %c0_7] : memref<1x1x8x8xbf16, #tpu.memory_space<vmem>>, vector<1x1x8x8xbf16>
    %10 = vector.shape_cast %9 : vector<1x1x8x8xbf16> to vector<8x8xbf16>
    %c0_8 = arith.constant 0 : index
    %c0_9 = arith.constant 0 : index
    %c0_10 = arith.constant 0 : index
    %c0_11 = arith.constant 0 : index
    %11 = vector.load %arg5[%c0_8, %c0_9, %c0_10, %c0_11] : memref<1x1x8x8xbf16, #tpu.memory_space<vmem>>, vector<1x1x8x8xbf16>
    %12 = vector.shape_cast %11 : vector<1x1x8x8xbf16> to vector<8x8xbf16>
    %cst_12 = arith.constant dense<0.000000e+00> : vector<8x8xf32>
    %13 = tpu.matmul %8, %10, %cst_12 {dimension_numbers = #tpu.dot_dimension_numbers<[1], [1], [0], [0], [0, 0, 1, 0], [], []>} : vector<8x8xbf16>, vector<8x8xbf16>, vector<8x8xf32> -> vector<8x8xf32>
    %c0_13 = arith.constant 0 : index
    %c0_14 = arith.constant 0 : index
    %c0_15 = arith.constant 0 : index
    %14 = vector.load %arg6[%c0_13, %c0_14, %c0_15] : memref<1x1x8xf32, #tpu.memory_space<vmem>>, vector<1x1x8xf32>
    %15 = vector.shape_cast %14 : vector<1x1x8xf32> to vector<1x8xf32>
    %16 = vector.broadcast %15 : vector<1x8xf32> to vector<8x8xf32>
    %17 = arith.addf %13, %16 : vector<8x8xf32>
    %18 = tpu.iota {dimensions = array<i32: 0>} : vector<8x8xi32>
    %19 = tpu.iota {dimensions = array<i32: 1>} : vector<8x8xi32>
    %c8_i32 = arith.constant 8 : i32
    %20 = arith.muli %arg2, %c8_i32 : i32
    %21 = vector.broadcast %20 : i32 to vector<8x8xi32>
    %22 = arith.addi %19, %21 : vector<8x8xi32>
    %23 = arith.cmpi sle, %22, %18 : vector<8x8xi32>
    %cst_16 = arith.constant -1.000000e+09 : f32
    %24 = vector.broadcast %cst_16 : f32 to vector<8x8xf32>
    %25 = arith.select %23, %17, %24 : vector<8x8xi1>, vector<8x8xf32>
    %c0_17 = arith.constant 0 : index
    %c0_18 = arith.constant 0 : index
    %26 = vector.load %arg8[%c0_17, %c0_18] : memref<8x1xf32, #tpu.memory_space<vmem>>, vector<8x1xf32>
    %cst_19 = arith.constant dense<0xFF800000> : vector<8xf32>
    %27 = vector.multi_reduction <maximumf>, %25, %cst_19 [1] : vector<8x8xf32> to vector<8xf32>
    %28 = vector.shape_cast %27 : vector<8xf32> to vector<8x1xf32>
    %29 = arith.maximumf %26, %28 : vector<8x1xf32>
    %30 = arith.subf %26, %29 : vector<8x1xf32>
    %31 = math.exp %30 : vector<8x1xf32>
    %32 = vector.broadcast %29 : vector<8x1xf32> to vector<8x8xf32>
    %33 = arith.subf %25, %32 : vector<8x8xf32>
    %34 = math.exp %33 : vector<8x8xf32>
    %c0_20 = arith.constant 0 : index
    %c0_21 = arith.constant 0 : index
    %35 = vector.load %arg9[%c0_20, %c0_21] : memref<8x1xf32, #tpu.memory_space<vmem>>, vector<8x1xf32>
    %36 = arith.mulf %31, %35 : vector<8x1xf32>
    %cst_22 = arith.constant dense<0.000000e+00> : vector<8xf32>
    %37 = vector.multi_reduction <add>, %34, %cst_22 [1] : vector<8x8xf32> to vector<8xf32>
    %38 = vector.shape_cast %37 : vector<8xf32> to vector<8x1xf32>
    %39 = arith.addf %36, %38 : vector<8x1xf32>
    %c0_23 = arith.constant 0 : index
    %c0_24 = arith.constant 0 : index
    %40 = vector.load %arg9[%c0_23, %c0_24] : memref<8x1xf32, #tpu.memory_space<vmem>>, vector<8x1xf32>
    tpu.vector_store %arg9[%c0_23, %c0_24], %39 {strides = array<i32>} : memref<8x1xf32, #tpu.memory_space<vmem>>, vector<8x1xf32>,
    %c0_25 = arith.constant 0 : index
    %c0_26 = arith.constant 0 : index
    %41 = vector.load %arg10[%c0_25, %c0_26] : memref<8x8xf32, #tpu.memory_space<vmem>>, vector<8x8xf32>
    %42 = vector.broadcast %31 : vector<8x1xf32> to vector<8x8xf32>
    %43 = arith.mulf %42, %41 : vector<8x8xf32>
    %44 = arith.truncf %34 : vector<8x8xf32> to vector<8x8xbf16>
    %cst_27 = arith.constant dense<0.000000e+00> : vector<8x8xf32>
    %45 = tpu.matmul %44, %12, %cst_27 {dimension_numbers = #tpu.dot_dimension_numbers<[1], [0], [0], [1], [0, 0, 1, 1], [], []>} : vector<8x8xbf16>, vector<8x8xbf16>, vector<8x8xf32> -> vector<8x8xf32>
    %46 = arith.addf %43, %45 : vector<8x8xf32>
    %c0_28 = arith.constant 0 : index
    %c0_29 = arith.constant 0 : index
    %47 = vector.load %arg10[%c0_28, %c0_29] : memref<8x8xf32, #tpu.memory_space<vmem>>, vector<8x8xf32>
    tpu.vector_store %arg10[%c0_28, %c0_29], %46 {strides = array<i32>} : memref<8x8xf32, #tpu.memory_space<vmem>>, vector<8x8xf32>,
    %c0_30 = arith.constant 0 : index
    %c0_31 = arith.constant 0 : index
    %48 = vector.load %arg8[%c0_30, %c0_31] : memref<8x1xf32, #tpu.memory_space<vmem>>, vector<8x1xf32>
    tpu.vector_store %arg8[%c0_30, %c0_31], %29 {strides = array<i32>} : memref<8x1xf32, #tpu.memory_space<vmem>>, vector<8x1xf32>,
    %c0_i32_32 = arith.constant 0 : i32
    %49 = arith.cmpi eq, %arg2, %c0_i32_32 : i32
    %50 = arith.extui %49 : i1 to i32
    %c0_i32_33 = arith.constant 0 : i32
    %51 = arith.cmpi ne, %50, %c0_i32_33 : i32
    scf.if %51 {
      %c0_34 = arith.constant 0 : index
      %c0_35 = arith.constant 0 : index
      %52 = vector.load %arg10[%c0_34, %c0_35] : memref<8x8xf32, #tpu.memory_space<vmem>>, vector<8x8xf32>
      %c0_36 = arith.constant 0 : index
      %c0_37 = arith.constant 0 : index
      %53 = vector.load %arg9[%c0_36, %c0_37] : memref<8x1xf32, #tpu.memory_space<vmem>>, vector<8x1xf32>
      %54 = tpu.reciprocal %53 {approx = true} : vector<8x1xf32> -> vector<8x1xf32>
      %55 = vector.broadcast %54 : vector<8x1xf32> to vector<8x8xf32>
      %56 = arith.mulf %52, %55 : vector<8x8xf32>
      %57 = arith.truncf %56 : vector<8x8xf32> to vector<8x8xbf16>
      %c0_38 = arith.constant 0 : index
      %c0_39 = arith.constant 0 : index
      %c0_40 = arith.constant 0 : index
      %c0_41 = arith.constant 0 : index
      %58 = vector.load %arg7[%c0_38, %c0_39, %c0_40, %c0_41] : memref<1x1x8x8xbf16, #tpu.memory_space<vmem>>, vector<1x1x8x8xbf16>
      %59 = vector.shape_cast %58 : vector<1x1x8x8xbf16> to vector<8x8xbf16>
      %60 = vector.shape_cast %57 : vector<8x8xbf16> to vector<1x1x8x8xbf16>
      tpu.vector_store %arg7[%c0_38, %c0_39, %c0_40, %c0_41], %60 {strides = array<i32>} : memref<1x1x8x8xbf16, #tpu.memory_space<vmem>>, vector<1x1x8x8xbf16>,
    } else {
    }
    return
  }
  func.func @transform_0(%arg0: i32, %arg1: i32, %arg2: i32) -> (i32, i32, i32, i32) {
    %c0_i32 = arith.constant 0 : i32
    %c0_i32_0 = arith.constant 0 : i32
    %c0_i32_1 = arith.constant 0 : i32
    return %arg0, %arg1, %c0_i32, %c0_i32_0 : i32, i32, i32, i32
  }
  func.func @transform_1(%arg0: i32, %arg1: i32, %arg2: i32) -> (i32, i32, i32, i32) {
    %c0_i32 = arith.constant 0 : i32
    %c0_i32_0 = arith.constant 0 : i32
    return %arg0, %arg1, %arg2, %c0_i32 : i32, i32, i32, i32
  }
  func.func @transform_2(%arg0: i32, %arg1: i32, %arg2: i32) -> (i32, i32, i32, i32) {
    %c0_i32 = arith.constant 0 : i32
    %c0_i32_0 = arith.constant 0 : i32
    return %arg0, %arg1, %arg2, %c0_i32 : i32, i32, i32, i32
  }
  func.func @transform_3(%arg0: i32, %arg1: i32, %arg2: i32) -> (i32, i32, i32) {
    %c0_i32 = arith.constant 0 : i32
    %c0_i32_0 = arith.constant 0 : i32
    return %arg0, %c0_i32, %arg2 : i32, i32, i32
  }
  func.func @transform_4(%arg0: i32, %arg1: i32, %arg2: i32) -> (i32, i32, i32, i32) {
    %c0_i32 = arith.constant 0 : i32
    %c0_i32_0 = arith.constant 0 : i32
    %c0_i32_1 = arith.constant 0 : i32
    return %arg0, %arg1, %c0_i32, %c0_i32_0 : i32, i32, i32, i32
  }
}

module attributes {stable_mosaic.version = 11 : i64} {
  func.func @_matmul_add_ln_kernel(%arg0: i32, %arg1: i32, %arg2: i32, %arg3: memref<16x32xbf16, #tpu.memory_space<vmem>>, %arg4: memref<32x128xbf16, #tpu.memory_space<vmem>>, %arg5: memref<1x128xf32, #tpu.memory_space<vmem>>, %arg6: memref<16x128xbf16, #tpu.memory_space<vmem>>, %arg7: memref<1x128xf32, #tpu.memory_space<vmem>>, %arg8: memref<1x128xf32, #tpu.memory_space<vmem>>, %arg9: memref<16x128xbf16, #tpu.memory_space<vmem>>, %arg10: memref<16x128xf32, #tpu.memory_space<vmem>>) attributes {dimension_semantics = [#tpu.dimension_semantics<parallel>, #tpu.dimension_semantics<parallel>, #tpu.dimension_semantics<arbitrary>], iteration_bounds = array<i64: 1, 1, 1>, scalar_prefetch = 0 : i64, scratch_operands = 1 : i64, tpu.core_type = #tpu.core_type<tc>, window_params = [{transform_indices = @transform_0, window_bounds = array<i64: 16, 32>}, {transform_indices = @transform_1, window_bounds = array<i64: 32, 128>}, {transform_indices = @transform_2, window_bounds = array<i64: 1, 128>}, {transform_indices = @transform_3, window_bounds = array<i64: 16, 128>}, {transform_indices = @transform_4, window_bounds = array<i64: 1, 128>}, {transform_indices = @transform_5, window_bounds = array<i64: 1, 128>}, {transform_indices = @transform_6, window_bounds = array<i64: 16, 128>}]} {
    %c0_i32 = arith.constant 0 : i32
    %0 = arith.cmpi eq, %arg2, %c0_i32 : i32
    %1 = arith.extui %0 : i1 to i32
    %c0_i32_0 = arith.constant 0 : i32
    %2 = arith.cmpi ne, %1, %c0_i32_0 : i32
    scf.if %2 {
      %cst_10 = arith.constant 0.000000e+00 : f32
      %12 = vector.broadcast %cst_10 : f32 to vector<16x128xf32>
      %c0_11 = arith.constant 0 : index
      %c0_12 = arith.constant 0 : index
      %13 = vector.load %arg10[%c0_11, %c0_12] : memref<16x128xf32, #tpu.memory_space<vmem>>, vector<16x128xf32>
      tpu.vector_store %arg10[%c0_11, %c0_12], %12 {strides = array<i32>} : memref<16x128xf32, #tpu.memory_space<vmem>>, vector<16x128xf32>,
    } else {
    }
    %c0 = arith.constant 0 : index
    %c0_1 = arith.constant 0 : index
    %3 = vector.load %arg10[%c0, %c0_1] : memref<16x128xf32, #tpu.memory_space<vmem>>, vector<16x128xf32>
    %c0_2 = arith.constant 0 : index
    %c0_3 = arith.constant 0 : index
    %4 = vector.load %arg3[%c0_2, %c0_3] : memref<16x32xbf16, #tpu.memory_space<vmem>>, vector<16x32xbf16>
    %c0_4 = arith.constant 0 : index
    %c0_5 = arith.constant 0 : index
    %5 = vector.load %arg4[%c0_4, %c0_5] : memref<32x128xbf16, #tpu.memory_space<vmem>>, vector<32x128xbf16>
    %cst = arith.constant dense<0.000000e+00> : vector<16x128xf32>
    %6 = tpu.matmul %4, %5, %cst {dimension_numbers = #tpu.dot_dimension_numbers<[1], [0], [0], [1], [0, 0, 1, 1], [], []>} : vector<16x32xbf16>, vector<32x128xbf16>, vector<16x128xf32> -> vector<16x128xf32>
    %7 = arith.addf %3, %6 : vector<16x128xf32>
    %c0_6 = arith.constant 0 : index
    %c0_7 = arith.constant 0 : index
    %8 = vector.load %arg10[%c0_6, %c0_7] : memref<16x128xf32, #tpu.memory_space<vmem>>, vector<16x128xf32>
    tpu.vector_store %arg10[%c0_6, %c0_7], %7 {strides = array<i32>} : memref<16x128xf32, #tpu.memory_space<vmem>>, vector<16x128xf32>,
    %c0_i32_8 = arith.constant 0 : i32
    %9 = arith.cmpi eq, %arg2, %c0_i32_8 : i32
    %10 = arith.extui %9 : i1 to i32
    %c0_i32_9 = arith.constant 0 : i32
    %11 = arith.cmpi ne, %10, %c0_i32_9 : i32
    scf.if %11 {
      %c0_10 = arith.constant 0 : index
      %c0_11 = arith.constant 0 : index
      %12 = vector.load %arg10[%c0_10, %c0_11] : memref<16x128xf32, #tpu.memory_space<vmem>>, vector<16x128xf32>
      %c0_12 = arith.constant 0 : index
      %c0_13 = arith.constant 0 : index
      %13 = vector.load %arg5[%c0_12, %c0_13] : memref<1x128xf32, #tpu.memory_space<vmem>>, vector<1x128xf32>
      %14 = vector.broadcast %13 : vector<1x128xf32> to vector<16x128xf32>
      %15 = arith.addf %12, %14 : vector<16x128xf32>
      %c0_14 = arith.constant 0 : index
      %c0_15 = arith.constant 0 : index
      %16 = vector.load %arg6[%c0_14, %c0_15] : memref<16x128xbf16, #tpu.memory_space<vmem>>, vector<16x128xbf16>
      %17 = arith.extf %16 : vector<16x128xbf16> to vector<16x128xf32>
      %18 = arith.addf %15, %17 : vector<16x128xf32>
      %cst_16 = arith.constant dense<0.000000e+00> : vector<16xf32>
      %19 = vector.multi_reduction <add>, %18, %cst_16 [1] : vector<16x128xf32> to vector<16xf32>
      %20 = vector.shape_cast %19 : vector<16xf32> to vector<16x1xf32>
      %cst_17 = arith.constant 3.125000e-02 : f32
      %21 = vector.broadcast %cst_17 : f32 to vector<16x1xf32>
      %22 = arith.mulf %20, %21 : vector<16x1xf32>
      %23 = arith.mulf %18, %18 : vector<16x128xf32>
      %cst_18 = arith.constant dense<0.000000e+00> : vector<16xf32>
      %24 = vector.multi_reduction <add>, %23, %cst_18 [1] : vector<16x128xf32> to vector<16xf32>
      %25 = vector.shape_cast %24 : vector<16xf32> to vector<16x1xf32>
      %cst_19 = arith.constant 3.125000e-02 : f32
      %26 = vector.broadcast %cst_19 : f32 to vector<16x1xf32>
      %27 = arith.mulf %25, %26 : vector<16x1xf32>
      %28 = arith.mulf %22, %22 : vector<16x1xf32>
      %29 = arith.subf %27, %28 : vector<16x1xf32>
      %cst_20 = arith.constant 0.000000e+00 : f32
      %30 = vector.broadcast %cst_20 : f32 to vector<16x1xf32>
      %31 = arith.maximumf %29, %30 : vector<16x1xf32>
      %32 = vector.broadcast %22 : vector<16x1xf32> to vector<16x128xf32>
      %33 = arith.subf %18, %32 : vector<16x128xf32>
      %cst_21 = arith.constant 9.99999974E-6 : f32
      %34 = vector.broadcast %cst_21 : f32 to vector<16x1xf32>
      %35 = arith.addf %31, %34 : vector<16x1xf32>
      %36 = math.rsqrt %35 : vector<16x1xf32>
      %37 = vector.broadcast %36 : vector<16x1xf32> to vector<16x128xf32>
      %38 = arith.mulf %33, %37 : vector<16x128xf32>
      %c0_22 = arith.constant 0 : index
      %c0_23 = arith.constant 0 : index
      %39 = vector.load %arg7[%c0_22, %c0_23] : memref<1x128xf32, #tpu.memory_space<vmem>>, vector<1x128xf32>
      %40 = vector.broadcast %39 : vector<1x128xf32> to vector<16x128xf32>
      %41 = arith.mulf %38, %40 : vector<16x128xf32>
      %c0_24 = arith.constant 0 : index
      %c0_25 = arith.constant 0 : index
      %42 = vector.load %arg8[%c0_24, %c0_25] : memref<1x128xf32, #tpu.memory_space<vmem>>, vector<1x128xf32>
      %43 = vector.broadcast %42 : vector<1x128xf32> to vector<16x128xf32>
      %44 = arith.addf %41, %43 : vector<16x128xf32>
      %45 = arith.truncf %44 : vector<16x128xf32> to vector<16x128xbf16>
      %c0_26 = arith.constant 0 : index
      %c0_27 = arith.constant 0 : index
      %46 = vector.load %arg9[%c0_26, %c0_27] : memref<16x128xbf16, #tpu.memory_space<vmem>>, vector<16x128xbf16>
      tpu.vector_store %arg9[%c0_26, %c0_27], %45 {strides = array<i32>} : memref<16x128xbf16, #tpu.memory_space<vmem>>, vector<16x128xbf16>,
    } else {
    }
    return
  }
  func.func @transform_0(%arg0: i32, %arg1: i32, %arg2: i32) -> (i32, i32) {
    %c0_i32 = arith.constant 0 : i32
    return %arg0, %arg2 : i32, i32
  }
  func.func @transform_1(%arg0: i32, %arg1: i32, %arg2: i32) -> (i32, i32) {
    %c0_i32 = arith.constant 0 : i32
    return %arg2, %arg1 : i32, i32
  }
  func.func @transform_2(%arg0: i32, %arg1: i32, %arg2: i32) -> (i32, i32) {
    %c0_i32 = arith.constant 0 : i32
    %c0_i32_0 = arith.constant 0 : i32
    return %c0_i32, %arg1 : i32, i32
  }
  func.func @transform_3(%arg0: i32, %arg1: i32, %arg2: i32) -> (i32, i32) {
    %c0_i32 = arith.constant 0 : i32
    return %arg0, %arg1 : i32, i32
  }
  func.func @transform_4(%arg0: i32, %arg1: i32, %arg2: i32) -> (i32, i32) {
    %c0_i32 = arith.constant 0 : i32
    %c0_i32_0 = arith.constant 0 : i32
    return %c0_i32, %arg1 : i32, i32
  }
  func.func @transform_5(%arg0: i32, %arg1: i32, %arg2: i32) -> (i32, i32) {
    %c0_i32 = arith.constant 0 : i32
    %c0_i32_0 = arith.constant 0 : i32
    return %c0_i32, %arg1 : i32, i32
  }
  func.func @transform_6(%arg0: i32, %arg1: i32, %arg2: i32) -> (i32, i32) {
    %c0_i32 = arith.constant 0 : i32
    return %arg0, %arg1 : i32, i32
  }
}

module attributes {stable_mosaic.version = 11 : i64} {
  func.func @_flash_attn_kernel(%arg0: i32, %arg1: i32, %arg2: i32, %arg3: memref<1x1x8x8xbf16, #tpu.memory_space<vmem>>, %arg4: memref<1x1x10x8xbf16, #tpu.memory_space<vmem>>, %arg5: memref<1x1x10x8xbf16, #tpu.memory_space<vmem>>, %arg6: memref<1x1x10xf32, #tpu.memory_space<vmem>>, %arg7: memref<1x1x8x8xbf16, #tpu.memory_space<vmem>>, %arg8: memref<8x1xf32, #tpu.memory_space<vmem>>, %arg9: memref<8x1xf32, #tpu.memory_space<vmem>>, %arg10: memref<8x8xf32, #tpu.memory_space<vmem>>) attributes {dimension_semantics = [#tpu.dimension_semantics<parallel>, #tpu.dimension_semantics<parallel>, #tpu.dimension_semantics<arbitrary>], iteration_bounds = array<i64: 2, 4, 1>, scalar_prefetch = 0 : i64, scratch_operands = 3 : i64, tpu.core_type = #tpu.core_type<tc>, window_params = [{transform_indices = @transform_0, window_bounds = array<i64: 1, 1, 8, 8>}, {transform_indices = @transform_1, window_bounds = array<i64: 1, 1, 10, 8>}, {transform_indices = @transform_2, window_bounds = array<i64: 1, 1, 10, 8>}, {transform_indices = @transform_3, window_bounds = array<i64: 1, 1, 10>}, {transform_indices = @transform_4, window_bounds = array<i64: 1, 1, 8, 8>}]} {
    %c0_i32 = arith.constant 0 : i32
    %0 = arith.cmpi eq, %arg2, %c0_i32 : i32
    %1 = arith.extui %0 : i1 to i32
    %c0_i32_0 = arith.constant 0 : i32
    %2 = arith.cmpi ne, %1, %c0_i32_0 : i32
    scf.if %2 {
      %cst_33 = arith.constant -1.000000e+30 : f32
      %44 = vector.broadcast %cst_33 : f32 to vector<8x1xf32>
      %c0_34 = arith.constant 0 : index
      %c0_35 = arith.constant 0 : index
      %45 = vector.load %arg8[%c0_34, %c0_35] : memref<8x1xf32, #tpu.memory_space<vmem>>, vector<8x1xf32>
      tpu.vector_store %arg8[%c0_34, %c0_35], %44 {strides = array<i32>} : memref<8x1xf32, #tpu.memory_space<vmem>>, vector<8x1xf32>,
      %cst_36 = arith.constant 0.000000e+00 : f32
      %46 = vector.broadcast %cst_36 : f32 to vector<8x1xf32>
      %c0_37 = arith.constant 0 : index
      %c0_38 = arith.constant 0 : index
      %47 = vector.load %arg9[%c0_37, %c0_38] : memref<8x1xf32, #tpu.memory_space<vmem>>, vector<8x1xf32>
      tpu.vector_store %arg9[%c0_37, %c0_38], %46 {strides = array<i32>} : memref<8x1xf32, #tpu.memory_space<vmem>>, vector<8x1xf32>,
      %cst_39 = arith.constant 0.000000e+00 : f32
      %48 = vector.broadcast %cst_39 : f32 to vector<8x8xf32>
      %c0_40 = arith.constant 0 : index
      %c0_41 = arith.constant 0 : index
      %49 = vector.load %arg10[%c0_40, %c0_41] : memref<8x8xf32, #tpu.memory_space<vmem>>, vector<8x8xf32>
      tpu.vector_store %arg10[%c0_40, %c0_41], %48 {strides = array<i32>} : memref<8x8xf32, #tpu.memory_space<vmem>>, vector<8x8xf32>,
    } else {
    }
    %c0 = arith.constant 0 : index
    %c0_1 = arith.constant 0 : index
    %c0_2 = arith.constant 0 : index
    %c0_3 = arith.constant 0 : index
    %3 = vector.load %arg3[%c0, %c0_1, %c0_2, %c0_3] : memref<1x1x8x8xbf16, #tpu.memory_space<vmem>>, vector<1x1x8x8xbf16>
    %4 = vector.shape_cast %3 : vector<1x1x8x8xbf16> to vector<8x8xbf16>
    %5 = arith.extf %4 : vector<8x8xbf16> to vector<8x8xf32>
    %cst = arith.constant 0.353553385 : f32
    %6 = vector.broadcast %cst : f32 to vector<8x8xf32>
    %7 = arith.mulf %5, %6 : vector<8x8xf32>
    %8 = arith.truncf %7 : vector<8x8xf32> to vector<8x8xbf16>
    %c0_4 = arith.constant 0 : index
    %c0_5 = arith.constant 0 : index
    %c0_6 = arith.constant 0 : index
    %c0_7 = arith.constant 0 : index
    %9 = vector.load %arg4[%c0_4, %c0_5, %c0_6, %c0_7] : memref<1x1x10x8xbf16, #tpu.memory_space<vmem>>, vector<1x1x10x8xbf16>
    %10 = vector.shape_cast %9 : vector<1x1x10x8xbf16> to vector<10x8xbf16>
    %c0_8 = arith.constant 0 : index
    %c0_9 = arith.constant 0 : index
    %c0_10 = arith.constant 0 : index
    %c0_11 = arith.constant 0 : index
    %11 = vector.load %arg5[%c0_8, %c0_9, %c0_10, %c0_11] : memref<1x1x10x8xbf16, #tpu.memory_space<vmem>>, vector<1x1x10x8xbf16>
    %12 = vector.shape_cast %11 : vector<1x1x10x8xbf16> to vector<10x8xbf16>
    %cst_12 = arith.constant dense<0.000000e+00> : vector<8x10xf32>
    %13 = tpu.matmul %8, %10, %cst_12 {dimension_numbers = #tpu.dot_dimension_numbers<[1], [1], [0], [0], [0, 0, 1, 0], [], []>} : vector<8x8xbf16>, vector<10x8xbf16>, vector<8x10xf32> -> vector<8x10xf32>
    %c0_13 = arith.constant 0 : index
    %c0_14 = arith.constant 0 : index
    %c0_15 = arith.constant 0 : index
    %14 = vector.load %arg6[%c0_13, %c0_14, %c0_15] : memref<1x1x10xf32, #tpu.memory_space<vmem>>, vector<1x1x10xf32>
    %15 = vector.shape_cast %14 : vector<1x1x10xf32> to vector<1x10xf32>
    %16 = vector.broadcast %15 : vector<1x10xf32> to vector<8x10xf32>
    %17 = arith.addf %13, %16 : vector<8x10xf32>
    %c0_16 = arith.constant 0 : index
    %c0_17 = arith.constant 0 : index
    %18 = vector.load %arg8[%c0_16, %c0_17] : memref<8x1xf32, #tpu.memory_space<vmem>>, vector<8x1xf32>
    %cst_18 = arith.constant dense<0xFF800000> : vector<8xf32>
    %19 = vector.multi_reduction <maximumf>, %17, %cst_18 [1] : vector<8x10xf32> to vector<8xf32>
    %20 = vector.shape_cast %19 : vector<8xf32> to vector<8x1xf32>
    %21 = arith.maximumf %18, %20 : vector<8x1xf32>
    %22 = arith.subf %18, %21 : vector<8x1xf32>
    %23 = math.exp %22 : vector<8x1xf32>
    %24 = vector.broadcast %21 : vector<8x1xf32> to vector<8x10xf32>
    %25 = arith.subf %17, %24 : vector<8x10xf32>
    %26 = math.exp %25 : vector<8x10xf32>
    %c0_19 = arith.constant 0 : index
    %c0_20 = arith.constant 0 : index
    %27 = vector.load %arg9[%c0_19, %c0_20] : memref<8x1xf32, #tpu.memory_space<vmem>>, vector<8x1xf32>
    %28 = arith.mulf %23, %27 : vector<8x1xf32>
    %cst_21 = arith.constant dense<0.000000e+00> : vector<8xf32>
    %29 = vector.multi_reduction <add>, %26, %cst_21 [1] : vector<8x10xf32> to vector<8xf32>
    %30 = vector.shape_cast %29 : vector<8xf32> to vector<8x1xf32>
    %31 = arith.addf %28, %30 : vector<8x1xf32>
    %c0_22 = arith.constant 0 : index
    %c0_23 = arith.constant 0 : index
    %32 = vector.load %arg9[%c0_22, %c0_23] : memref<8x1xf32, #tpu.memory_space<vmem>>, vector<8x1xf32>
    tpu.vector_store %arg9[%c0_22, %c0_23], %31 {strides = array<i32>} : memref<8x1xf32, #tpu.memory_space<vmem>>, vector<8x1xf32>,
    %c0_24 = arith.constant 0 : index
    %c0_25 = arith.constant 0 : index
    %33 = vector.load %arg10[%c0_24, %c0_25] : memref<8x8xf32, #tpu.memory_space<vmem>>, vector<8x8xf32>
    %34 = vector.broadcast %23 : vector<8x1xf32> to vector<8x8xf32>
    %35 = arith.mulf %34, %33 : vector<8x8xf32>
    %36 = arith.truncf %26 : vector<8x10xf32> to vector<8x10xbf16>
    %cst_26 = arith.constant dense<0.000000e+00> : vector<8x8xf32>
    %37 = tpu.matmul %36, %12, %cst_26 {dimension_numbers = #tpu.dot_dimension_numbers<[1], [0], [0], [1], [0, 0, 1, 1], [], []>} : vector<8x10xbf16>, vector<10x8xbf16>, vector<8x8xf32> -> vector<8x8xf32>
    %38 = arith.addf %35, %37 : vector<8x8xf32>
    %c0_27 = arith.constant 0 : index
    %c0_28 = arith.constant 0 : index
    %39 = vector.load %arg10[%c0_27, %c0_28] : memref<8x8xf32, #tpu.memory_space<vmem>>, vector<8x8xf32>
    tpu.vector_store %arg10[%c0_27, %c0_28], %38 {strides = array<i32>} : memref<8x8xf32, #tpu.memory_space<vmem>>, vector<8x8xf32>,
    %c0_29 = arith.constant 0 : index
    %c0_30 = arith.constant 0 : index
    %40 = vector.load %arg8[%c0_29, %c0_30] : memref<8x1xf32, #tpu.memory_space<vmem>>, vector<8x1xf32>
    tpu.vector_store %arg8[%c0_29, %c0_30], %21 {strides = array<i32>} : memref<8x1xf32, #tpu.memory_space<vmem>>, vector<8x1xf32>,
    %c0_i32_31 = arith.constant 0 : i32
    %41 = arith.cmpi eq, %arg2, %c0_i32_31 : i32
    %42 = arith.extui %41 : i1 to i32
    %c0_i32_32 = arith.constant 0 : i32
    %43 = arith.cmpi ne, %42, %c0_i32_32 : i32
    scf.if %43 {
      %c0_33 = arith.constant 0 : index
      %c0_34 = arith.constant 0 : index
      %44 = vector.load %arg10[%c0_33, %c0_34] : memref<8x8xf32, #tpu.memory_space<vmem>>, vector<8x8xf32>
      %c0_35 = arith.constant 0 : index
      %c0_36 = arith.constant 0 : index
      %45 = vector.load %arg9[%c0_35, %c0_36] : memref<8x1xf32, #tpu.memory_space<vmem>>, vector<8x1xf32>
      %46 = tpu.reciprocal %45 {approx = true} : vector<8x1xf32> -> vector<8x1xf32>
      %47 = vector.broadcast %46 : vector<8x1xf32> to vector<8x8xf32>
      %48 = arith.mulf %44, %47 : vector<8x8xf32>
      %49 = arith.truncf %48 : vector<8x8xf32> to vector<8x8xbf16>
      %c0_37 = arith.constant 0 : index
      %c0_38 = arith.constant 0 : index
      %c0_39 = arith.constant 0 : index
      %c0_40 = arith.constant 0 : index
      %50 = vector.load %arg7[%c0_37, %c0_38, %c0_39, %c0_40] : memref<1x1x8x8xbf16, #tpu.memory_space<vmem>>, vector<1x1x8x8xbf16>
      %51 = vector.shape_cast %50 : vector<1x1x8x8xbf16> to vector<8x8xbf16>
      %52 = vector.shape_cast %49 : vector<8x8xbf16> to vector<1x1x8x8xbf16>
      tpu.vector_store %arg7[%c0_37, %c0_38, %c0_39, %c0_40], %52 {strides = array<i32>} : memref<1x1x8x8xbf16, #tpu.memory_space<vmem>>, vector<1x1x8x8xbf16>,
    } else {
    }
    return
  }
  func.func @transform_0(%arg0: i32, %arg1: i32, %arg2: i32) -> (i32, i32, i32, i32) {
    %c0_i32 = arith.constant 0 : i32
    %c0_i32_0 = arith.constant 0 : i32
    %c0_i32_1 = arith.constant 0 : i32
    return %arg0, %arg1, %c0_i32, %c0_i32_0 : i32, i32, i32, i32
  }
  func.func @transform_1(%arg0: i32, %arg1: i32, %arg2: i32) -> (i32, i32, i32, i32) {
    %c0_i32 = arith.constant 0 : i32
    %c0_i32_0 = arith.constant 0 : i32
    return %arg0, %arg1, %arg2, %c0_i32 : i32, i32, i32, i32
  }
  func.func @transform_2(%arg0: i32, %arg1: i32, %arg2: i32) -> (i32, i32, i32, i32) {
    %c0_i32 = arith.constant 0 : i32
    %c0_i32_0 = arith.constant 0 : i32
    return %arg0, %arg1, %arg2, %c0_i32 : i32, i32, i32, i32
  }
  func.func @transform_3(%arg0: i32, %arg1: i32, %arg2: i32) -> (i32, i32, i32) {
    %c0_i32 = arith.constant 0 : i32
    %c0_i32_0 = arith.constant 0 : i32
    return %arg0, %c0_i32, %arg2 : i32, i32, i32
  }
  func.func @transform_4(%arg0: i32, %arg1: i32, %arg2: i32) -> (i32, i32, i32, i32) {
    %c0_i32 = arith.constant 0 : i32
    %c0_i32_0 = arith.constant 0 : i32
    %c0_i32_1 = arith.constant 0 : i32
    return %arg0, %arg1, %c0_i32, %c0_i32_0 : i32, i32, i32, i32
  }
}

module attributes {stable_mosaic.version = 11 : i64} {
  func.func @_matmul_kernel(%arg0: i32, %arg1: i32, %arg2: i32, %arg3: memref<16x32xbf16, #tpu.memory_space<vmem>>, %arg4: memref<32x128xbf16, #tpu.memory_space<vmem>>, %arg5: memref<1x128xf32, #tpu.memory_space<vmem>>, %arg6: memref<16x128xbf16, #tpu.memory_space<vmem>>, %arg7: memref<16x128xf32, #tpu.memory_space<vmem>>) attributes {dimension_semantics = [#tpu.dimension_semantics<parallel>, #tpu.dimension_semantics<parallel>, #tpu.dimension_semantics<arbitrary>], iteration_bounds = array<i64: 1, 1, 1>, scalar_prefetch = 0 : i64, scratch_operands = 1 : i64, tpu.core_type = #tpu.core_type<tc>, window_params = [{transform_indices = @transform_0, window_bounds = array<i64: 16, 32>}, {transform_indices = @transform_1, window_bounds = array<i64: 32, 128>}, {transform_indices = @transform_2, window_bounds = array<i64: 1, 128>}, {transform_indices = @transform_3, window_bounds = array<i64: 16, 128>}]} {
    %c0_i32 = arith.constant 0 : i32
    %0 = arith.cmpi eq, %arg2, %c0_i32 : i32
    %1 = arith.extui %0 : i1 to i32
    %c0_i32_0 = arith.constant 0 : i32
    %2 = arith.cmpi ne, %1, %c0_i32_0 : i32
    scf.if %2 {
      %cst_10 = arith.constant 0.000000e+00 : f32
      %12 = vector.broadcast %cst_10 : f32 to vector<16x128xf32>
      %c0_11 = arith.constant 0 : index
      %c0_12 = arith.constant 0 : index
      %13 = vector.load %arg7[%c0_11, %c0_12] : memref<16x128xf32, #tpu.memory_space<vmem>>, vector<16x128xf32>
      tpu.vector_store %arg7[%c0_11, %c0_12], %12 {strides = array<i32>} : memref<16x128xf32, #tpu.memory_space<vmem>>, vector<16x128xf32>,
    } else {
    }
    %c0 = arith.constant 0 : index
    %c0_1 = arith.constant 0 : index
    %3 = vector.load %arg7[%c0, %c0_1] : memref<16x128xf32, #tpu.memory_space<vmem>>, vector<16x128xf32>
    %c0_2 = arith.constant 0 : index
    %c0_3 = arith.constant 0 : index
    %4 = vector.load %arg3[%c0_2, %c0_3] : memref<16x32xbf16, #tpu.memory_space<vmem>>, vector<16x32xbf16>
    %c0_4 = arith.constant 0 : index
    %c0_5 = arith.constant 0 : index
    %5 = vector.load %arg4[%c0_4, %c0_5] : memref<32x128xbf16, #tpu.memory_space<vmem>>, vector<32x128xbf16>
    %cst = arith.constant dense<0.000000e+00> : vector<16x128xf32>
    %6 = tpu.matmul %4, %5, %cst {dimension_numbers = #tpu.dot_dimension_numbers<[1], [0], [0], [1], [0, 0, 1, 1], [], []>} : vector<16x32xbf16>, vector<32x128xbf16>, vector<16x128xf32> -> vector<16x128xf32>
    %7 = arith.addf %3, %6 : vector<16x128xf32>
    %c0_6 = arith.constant 0 : index
    %c0_7 = arith.constant 0 : index
    %8 = vector.load %arg7[%c0_6, %c0_7] : memref<16x128xf32, #tpu.memory_space<vmem>>, vector<16x128xf32>
    tpu.vector_store %arg7[%c0_6, %c0_7], %7 {strides = array<i32>} : memref<16x128xf32, #tpu.memory_space<vmem>>, vector<16x128xf32>,
    %c0_i32_8 = arith.constant 0 : i32
    %9 = arith.cmpi eq, %arg2, %c0_i32_8 : i32
    %10 = arith.extui %9 : i1 to i32
    %c0_i32_9 = arith.constant 0 : i32
    %11 = arith.cmpi ne, %10, %c0_i32_9 : i32
    scf.if %11 {
      %c0_10 = arith.constant 0 : index
      %c0_11 = arith.constant 0 : index
      %12 = vector.load %arg7[%c0_10, %c0_11] : memref<16x128xf32, #tpu.memory_space<vmem>>, vector<16x128xf32>
      %c0_12 = arith.constant 0 : index
      %c0_13 = arith.constant 0 : index
      %13 = vector.load %arg5[%c0_12, %c0_13] : memref<1x128xf32, #tpu.memory_space<vmem>>, vector<1x128xf32>
      %14 = vector.broadcast %13 : vector<1x128xf32> to vector<16x128xf32>
      %15 = arith.addf %12, %14 : vector<16x128xf32>
      %cst_14 = arith.constant 0.000000e+00 : f32
      %16 = vector.broadcast %cst_14 : f32 to vector<16x128xf32>
      %17 = arith.maximumf %15, %16 : vector<16x128xf32>
      %18 = arith.truncf %17 : vector<16x128xf32> to vector<16x128xbf16>
      %c0_15 = arith.constant 0 : index
      %c0_16 = arith.constant 0 : index
      %19 = vector.load %arg6[%c0_15, %c0_16] : memref<16x128xbf16, #tpu.memory_space<vmem>>, vector<16x128xbf16>
      tpu.vector_store %arg6[%c0_15, %c0_16], %18 {strides = array<i32>} : memref<16x128xbf16, #tpu.memory_space<vmem>>, vector<16x128xbf16>,
    } else {
    }
    return
  }
  func.func @transform_0(%arg0: i32, %arg1: i32, %arg2: i32) -> (i32, i32) {
    %c0_i32 = arith.constant 0 : i32
    return %arg0, %arg2 : i32, i32
  }
  func.func @transform_1(%arg0: i32, %arg1: i32, %arg2: i32) -> (i32, i32) {
    %c0_i32 = arith.constant 0 : i32
    return %arg2, %arg1 : i32, i32
  }
  func.func @transform_2(%arg0: i32, %arg1: i32, %arg2: i32) -> (i32, i32) {
    %c0_i32 = arith.constant 0 : i32
    %c0_i32_0 = arith.constant 0 : i32
    return %c0_i32, %arg1 : i32, i32
  }
  func.func @transform_3(%arg0: i32, %arg1: i32, %arg2: i32) -> (i32, i32) {
    %c0_i32 = arith.constant 0 : i32
    return %arg0, %arg1 : i32, i32
  }
}

module attributes {stable_mosaic.version = 11 : i64} {
  func.func @_matmul_add_ln_kernel(%arg0: i32, %arg1: i32, %arg2: i32, %arg3: memref<16x64xbf16, #tpu.memory_space<vmem>>, %arg4: memref<64x128xbf16, #tpu.memory_space<vmem>>, %arg5: memref<1x128xf32, #tpu.memory_space<vmem>>, %arg6: memref<16x128xbf16, #tpu.memory_space<vmem>>, %arg7: memref<1x128xf32, #tpu.memory_space<vmem>>, %arg8: memref<1x128xf32, #tpu.memory_space<vmem>>, %arg9: memref<16x128xbf16, #tpu.memory_space<vmem>>, %arg10: memref<16x128xf32, #tpu.memory_space<vmem>>) attributes {dimension_semantics = [#tpu.dimension_semantics<parallel>, #tpu.dimension_semantics<parallel>, #tpu.dimension_semantics<arbitrary>], iteration_bounds = array<i64: 1, 1, 1>, scalar_prefetch = 0 : i64, scratch_operands = 1 : i64, tpu.core_type = #tpu.core_type<tc>, window_params = [{transform_indices = @transform_0, window_bounds = array<i64: 16, 64>}, {transform_indices = @transform_1, window_bounds = array<i64: 64, 128>}, {transform_indices = @transform_2, window_bounds = array<i64: 1, 128>}, {transform_indices = @transform_3, window_bounds = array<i64: 16, 128>}, {transform_indices = @transform_4, window_bounds = array<i64: 1, 128>}, {transform_indices = @transform_5, window_bounds = array<i64: 1, 128>}, {transform_indices = @transform_6, window_bounds = array<i64: 16, 128>}]} {
    %c0_i32 = arith.constant 0 : i32
    %0 = arith.cmpi eq, %arg2, %c0_i32 : i32
    %1 = arith.extui %0 : i1 to i32
    %c0_i32_0 = arith.constant 0 : i32
    %2 = arith.cmpi ne, %1, %c0_i32_0 : i32
    scf.if %2 {
      %cst_10 = arith.constant 0.000000e+00 : f32
      %12 = vector.broadcast %cst_10 : f32 to vector<16x128xf32>
      %c0_11 = arith.constant 0 : index
      %c0_12 = arith.constant 0 : index
      %13 = vector.load %arg10[%c0_11, %c0_12] : memref<16x128xf32, #tpu.memory_space<vmem>>, vector<16x128xf32>
      tpu.vector_store %arg10[%c0_11, %c0_12], %12 {strides = array<i32>} : memref<16x128xf32, #tpu.memory_space<vmem>>, vector<16x128xf32>,
    } else {
    }
    %c0 = arith.constant 0 : index
    %c0_1 = arith.constant 0 : index
    %3 = vector.load %arg10[%c0, %c0_1] : memref<16x128xf32, #tpu.memory_space<vmem>>, vector<16x128xf32>
    %c0_2 = arith.constant 0 : index
    %c0_3 = arith.constant 0 : index
    %4 = vector.load %arg3[%c0_2, %c0_3] : memref<16x64xbf16, #tpu.memory_space<vmem>>, vector<16x64xbf16>
    %c0_4 = arith.constant 0 : index
    %c0_5 = arith.constant 0 : index
    %5 = vector.load %arg4[%c0_4, %c0_5] : memref<64x128xbf16, #tpu.memory_space<vmem>>, vector<64x128xbf16>
    %cst = arith.constant dense<0.000000e+00> : vector<16x128xf32>
    %6 = tpu.matmul %4, %5, %cst {dimension_numbers = #tpu.dot_dimension_numbers<[1], [0], [0], [1], [0, 0, 1, 1], [], []>} : vector<16x64xbf16>, vector<64x128xbf16>, vector<16x128xf32> -> vector<16x128xf32>
    %7 = arith.addf %3, %6 : vector<16x128xf32>
    %c0_6 = arith.constant 0 : index
    %c0_7 = arith.constant 0 : index
    %8 = vector.load %arg10[%c0_6, %c0_7] : memref<16x128xf32, #tpu.memory_space<vmem>>, vector<16x128xf32>
    tpu.vector_store %arg10[%c0_6, %c0_7], %7 {strides = array<i32>} : memref<16x128xf32, #tpu.memory_space<vmem>>, vector<16x128xf32>,
    %c0_i32_8 = arith.constant 0 : i32
    %9 = arith.cmpi eq, %arg2, %c0_i32_8 : i32
    %10 = arith.extui %9 : i1 to i32
    %c0_i32_9 = arith.constant 0 : i32
    %11 = arith.cmpi ne, %10, %c0_i32_9 : i32
    scf.if %11 {
      %c0_10 = arith.constant 0 : index
      %c0_11 = arith.constant 0 : index
      %12 = vector.load %arg10[%c0_10, %c0_11] : memref<16x128xf32, #tpu.memory_space<vmem>>, vector<16x128xf32>
      %c0_12 = arith.constant 0 : index
      %c0_13 = arith.constant 0 : index
      %13 = vector.load %arg5[%c0_12, %c0_13] : memref<1x128xf32, #tpu.memory_space<vmem>>, vector<1x128xf32>
      %14 = vector.broadcast %13 : vector<1x128xf32> to vector<16x128xf32>
      %15 = arith.addf %12, %14 : vector<16x128xf32>
      %c0_14 = arith.constant 0 : index
      %c0_15 = arith.constant 0 : index
      %16 = vector.load %arg6[%c0_14, %c0_15] : memref<16x128xbf16, #tpu.memory_space<vmem>>, vector<16x128xbf16>
      %17 = arith.extf %16 : vector<16x128xbf16> to vector<16x128xf32>
      %18 = arith.addf %15, %17 : vector<16x128xf32>
      %cst_16 = arith.constant dense<0.000000e+00> : vector<16xf32>
      %19 = vector.multi_reduction <add>, %18, %cst_16 [1] : vector<16x128xf32> to vector<16xf32>
      %20 = vector.shape_cast %19 : vector<16xf32> to vector<16x1xf32>
      %cst_17 = arith.constant 3.125000e-02 : f32
      %21 = vector.broadcast %cst_17 : f32 to vector<16x1xf32>
      %22 = arith.mulf %20, %21 : vector<16x1xf32>
      %23 = arith.mulf %18, %18 : vector<16x128xf32>
      %cst_18 = arith.constant dense<0.000000e+00> : vector<16xf32>
      %24 = vector.multi_reduction <add>, %23, %cst_18 [1] : vector<16x128xf32> to vector<16xf32>
      %25 = vector.shape_cast %24 : vector<16xf32> to vector<16x1xf32>
      %cst_19 = arith.constant 3.125000e-02 : f32
      %26 = vector.broadcast %cst_19 : f32 to vector<16x1xf32>
      %27 = arith.mulf %25, %26 : vector<16x1xf32>
      %28 = arith.mulf %22, %22 : vector<16x1xf32>
      %29 = arith.subf %27, %28 : vector<16x1xf32>
      %cst_20 = arith.constant 0.000000e+00 : f32
      %30 = vector.broadcast %cst_20 : f32 to vector<16x1xf32>
      %31 = arith.maximumf %29, %30 : vector<16x1xf32>
      %32 = vector.broadcast %22 : vector<16x1xf32> to vector<16x128xf32>
      %33 = arith.subf %18, %32 : vector<16x128xf32>
      %cst_21 = arith.constant 9.99999974E-6 : f32
      %34 = vector.broadcast %cst_21 : f32 to vector<16x1xf32>
      %35 = arith.addf %31, %34 : vector<16x1xf32>
      %36 = math.rsqrt %35 : vector<16x1xf32>
      %37 = vector.broadcast %36 : vector<16x1xf32> to vector<16x128xf32>
      %38 = arith.mulf %33, %37 : vector<16x128xf32>
      %c0_22 = arith.constant 0 : index
      %c0_23 = arith.constant 0 : index
      %39 = vector.load %arg7[%c0_22, %c0_23] : memref<1x128xf32, #tpu.memory_space<vmem>>, vector<1x128xf32>
      %40 = vector.broadcast %39 : vector<1x128xf32> to vector<16x128xf32>
      %41 = arith.mulf %38, %40 : vector<16x128xf32>
      %c0_24 = arith.constant 0 : index
      %c0_25 = arith.constant 0 : index
      %42 = vector.load %arg8[%c0_24, %c0_25] : memref<1x128xf32, #tpu.memory_space<vmem>>, vector<1x128xf32>
      %43 = vector.broadcast %42 : vector<1x128xf32> to vector<16x128xf32>
      %44 = arith.addf %41, %43 : vector<16x128xf32>
      %45 = arith.truncf %44 : vector<16x128xf32> to vector<16x128xbf16>
      %c0_26 = arith.constant 0 : index
      %c0_27 = arith.constant 0 : index
      %46 = vector.load %arg9[%c0_26, %c0_27] : memref<16x128xbf16, #tpu.memory_space<vmem>>, vector<16x128xbf16>
      tpu.vector_store %arg9[%c0_26, %c0_27], %45 {strides = array<i32>} : memref<16x128xbf16, #tpu.memory_space<vmem>>, vector<16x128xbf16>,
    } else {
    }
    return
  }
  func.func @transform_0(%arg0: i32, %arg1: i32, %arg2: i32) -> (i32, i32) {
    %c0_i32 = arith.constant 0 : i32
    return %arg0, %arg2 : i32, i32
  }
  func.func @transform_1(%arg0: i32, %arg1: i32, %arg2: i32) -> (i32, i32) {
    %c0_i32 = arith.constant 0 : i32
    return %arg2, %arg1 : i32, i32
  }
  func.func @transform_2(%arg0: i32, %arg1: i32, %arg2: i32) -> (i32, i32) {
    %c0_i32 = arith.constant 0 : i32
    %c0_i32_0 = arith.constant 0 : i32
    return %c0_i32, %arg1 : i32, i32
  }
  func.func @transform_3(%arg0: i32, %arg1: i32, %arg2: i32) -> (i32, i32) {
    %c0_i32 = arith.constant 0 : i32
    return %arg0, %arg1 : i32, i32
  }
  func.func @transform_4(%arg0: i32, %arg1: i32, %arg2: i32) -> (i32, i32) {
    %c0_i32 = arith.constant 0 : i32
    %c0_i32_0 = arith.constant 0 : i32
    return %c0_i32, %arg1 : i32, i32
  }
  func.func @transform_5(%arg0: i32, %arg1: i32, %arg2: i32) -> (i32, i32) {
    %c0_i32 = arith.constant 0 : i32
    %c0_i32_0 = arith.constant 0 : i32
    return %c0_i32, %arg1 : i32, i32
  }
  func.func @transform_6(%arg0: i32, %arg1: i32, %arg2: i32) -> (i32, i32) {
    %c0_i32 = arith.constant 0 : i32
    return %arg0, %arg1 : i32, i32
  }
}

module attributes {stable_mosaic.version = 11 : i64} {
  func.func @_attn_weights_kernel(%arg0: i32, %arg1: i32, %arg2: memref<1x1x8x8xbf16, #tpu.memory_space<vmem>>, %arg3: memref<1x1x10x8xbf16, #tpu.memory_space<vmem>>, %arg4: memref<1x1x10x8xbf16, #tpu.memory_space<vmem>>, %arg5: memref<1x1x10xf32, #tpu.memory_space<vmem>>, %arg6: memref<1x1x8x8xbf16, #tpu.memory_space<vmem>>, %arg7: memref<1x1x8x10xf32, #tpu.memory_space<vmem>>) attributes {dimension_semantics = [#tpu.dimension_semantics<parallel>, #tpu.dimension_semantics<parallel>], iteration_bounds = array<i64: 2, 4>, scalar_prefetch = 0 : i64, scratch_operands = 0 : i64, tpu.core_type = #tpu.core_type<tc>, window_params = [{transform_indices = @transform_0, window_bounds = array<i64: 1, 1, 8, 8>}, {transform_indices = @transform_1, window_bounds = array<i64: 1, 1, 10, 8>}, {transform_indices = @transform_2, window_bounds = array<i64: 1, 1, 10, 8>}, {transform_indices = @transform_3, window_bounds = array<i64: 1, 1, 10>}, {transform_indices = @transform_4, window_bounds = array<i64: 1, 1, 8, 8>}, {transform_indices = @transform_5, window_bounds = array<i64: 1, 1, 8, 10>}]} {
    %c0 = arith.constant 0 : index
    %c0_0 = arith.constant 0 : index
    %c0_1 = arith.constant 0 : index
    %c0_2 = arith.constant 0 : index
    %0 = vector.load %arg2[%c0, %c0_0, %c0_1, %c0_2] : memref<1x1x8x8xbf16, #tpu.memory_space<vmem>>, vector<1x1x8x8xbf16>
    %1 = vector.shape_cast %0 : vector<1x1x8x8xbf16> to vector<8x8xbf16>
    %2 = arith.extf %1 : vector<8x8xbf16> to vector<8x8xf32>
    %cst = arith.constant 0.353553385 : f32
    %3 = vector.broadcast %cst : f32 to vector<8x8xf32>
    %4 = arith.mulf %2, %3 : vector<8x8xf32>
    %5 = arith.truncf %4 : vector<8x8xf32> to vector<8x8xbf16>
    %c0_3 = arith.constant 0 : index
    %c0_4 = arith.constant 0 : index
    %c0_5 = arith.constant 0 : index
    %c0_6 = arith.constant 0 : index
    %6 = vector.load %arg3[%c0_3, %c0_4, %c0_5, %c0_6] : memref<1x1x10x8xbf16, #tpu.memory_space<vmem>>, vector<1x1x10x8xbf16>
    %7 = vector.shape_cast %6 : vector<1x1x10x8xbf16> to vector<10x8xbf16>
    %c0_7 = arith.constant 0 : index
    %c0_8 = arith.constant 0 : index
    %c0_9 = arith.constant 0 : index
    %c0_10 = arith.constant 0 : index
    %8 = vector.load %arg4[%c0_7, %c0_8, %c0_9, %c0_10] : memref<1x1x10x8xbf16, #tpu.memory_space<vmem>>, vector<1x1x10x8xbf16>
    %9 = vector.shape_cast %8 : vector<1x1x10x8xbf16> to vector<10x8xbf16>
    %cst_11 = arith.constant dense<0.000000e+00> : vector<8x10xf32>
    %10 = tpu.matmul %5, %7, %cst_11 {dimension_numbers = #tpu.dot_dimension_numbers<[1], [1], [0], [0], [0, 0, 1, 0], [], []>} : vector<8x8xbf16>, vector<10x8xbf16>, vector<8x10xf32> -> vector<8x10xf32>
    %c0_12 = arith.constant 0 : index
    %c0_13 = arith.constant 0 : index
    %c0_14 = arith.constant 0 : index
    %11 = vector.load %arg5[%c0_12, %c0_13, %c0_14] : memref<1x1x10xf32, #tpu.memory_space<vmem>>, vector<1x1x10xf32>
    %12 = vector.shape_cast %11 : vector<1x1x10xf32> to vector<1x10xf32>
    %13 = vector.broadcast %12 : vector<1x10xf32> to vector<8x10xf32>
    %14 = arith.addf %10, %13 : vector<8x10xf32>
    %cst_15 = arith.constant dense<0xFF800000> : vector<8xf32>
    %15 = vector.multi_reduction <maximumf>, %14, %cst_15 [1] : vector<8x10xf32> to vector<8xf32>
    %16 = vector.shape_cast %15 : vector<8xf32> to vector<8x1xf32>
    %17 = vector.broadcast %16 : vector<8x1xf32> to vector<8x10xf32>
    %18 = arith.subf %14, %17 : vector<8x10xf32>
    %19 = math.exp %18 : vector<8x10xf32>
    %cst_16 = arith.constant dense<0.000000e+00> : vector<8xf32>
    %20 = vector.multi_reduction <add>, %19, %cst_16 [1] : vector<8x10xf32> to vector<8xf32>
    %21 = vector.shape_cast %20 : vector<8xf32> to vector<8x1xf32>
    %22 = tpu.reciprocal %21 : vector<8x1xf32> -> vector<8x1xf32>
    %23 = vector.broadcast %22 : vector<8x1xf32> to vector<8x10xf32>
    %24 = arith.mulf %19, %23 : vector<8x10xf32>
    %c0_17 = arith.constant 0 : index
    %c0_18 = arith.constant 0 : index
    %c0_19 = arith.constant 0 : index
    %c0_20 = arith.constant 0 : index
    %25 = vector.load %arg7[%c0_17, %c0_18, %c0_19, %c0_20] : memref<1x1x8x10xf32, #tpu.memory_space<vmem>>, vector<1x1x8x10xf32>
    %26 = vector.shape_cast %25 : vector<1x1x8x10xf32> to vector<8x10xf32>
    %27 = vector.shape_cast %24 : vector<8x10xf32> to vector<1x1x8x10xf32>
    tpu.vector_store %arg7[%c0_17, %c0_18, %c0_19, %c0_20], %27 {strides = array<i32>} : memref<1x1x8x10xf32, #tpu.memory_space<vmem>>, vector<1x1x8x10xf32>,
    %28 = arith.truncf %24 : vector<8x10xf32> to vector<8x10xbf16>
    %cst_21 = arith.constant dense<0.000000e+00> : vector<8x8xf32>
    %29 = tpu.matmul %28, %9, %cst_21 {dimension_numbers = #tpu.dot_dimension_numbers<[1], [0], [0], [1], [0, 0, 1, 1], [], []>} : vector<8x10xbf16>, vector<10x8xbf16>, vector<8x8xf32> -> vector<8x8xf32>
    %30 = arith.truncf %29 : vector<8x8xf32> to vector<8x8xbf16>
    %c0_22 = arith.constant 0 : index
    %c0_23 = arith.constant 0 : index
    %c0_24 = arith.constant 0 : index
    %c0_25 = arith.constant 0 : index
    %31 = vector.load %arg6[%c0_22, %c0_23, %c0_24, %c0_25] : memref<1x1x8x8xbf16, #tpu.memory_space<vmem>>, vector<1x1x8x8xbf16>
    %32 = vector.shape_cast %31 : vector<1x1x8x8xbf16> to vector<8x8xbf16>
    %33 = vector.shape_cast %30 : vector<8x8xbf16> to vector<1x1x8x8xbf16>
    tpu.vector_store %arg6[%c0_22, %c0_23, %c0_24, %c0_25], %33 {strides = array<i32>} : memref<1x1x8x8xbf16, #tpu.memory_space<vmem>>, vector<1x1x8x8xbf16>,
    return
  }
  func.func @transform_0(%arg0: i32, %arg1: i32) -> (i32, i32, i32, i32) {
    %c0_i32 = arith.constant 0 : i32
    %c0_i32_0 = arith.constant 0 : i32
    %c0_i32_1 = arith.constant 0 : i32
    return %arg0, %arg1, %c0_i32, %c0_i32_0 : i32, i32, i32, i32
  }
  func.func @transform_1(%arg0: i32, %arg1: i32) -> (i32, i32, i32, i32) {
    %c0_i32 = arith.constant 0 : i32
    %c0_i32_0 = arith.constant 0 : i32
    %c0_i32_1 = arith.constant 0 : i32
    return %arg0, %arg1, %c0_i32, %c0_i32_0 : i32, i32, i32, i32
  }
  func.func @transform_2(%arg0: i32, %arg1: i32) -> (i32, i32, i32, i32) {
    %c0_i32 = arith.constant 0 : i32
    %c0_i32_0 = arith.constant 0 : i32
    %c0_i32_1 = arith.constant 0 : i32
    return %arg0, %arg1, %c0_i32, %c0_i32_0 : i32, i32, i32, i32
  }
  func.func @transform_3(%arg0: i32, %arg1: i32) -> (i32, i32, i32) {
    %c0_i32 = arith.constant 0 : i32
    %c0_i32_0 = arith.constant 0 : i32
    %c0_i32_1 = arith.constant 0 : i32
    return %arg0, %c0_i32, %c0_i32_0 : i32, i32, i32
  }
  func.func @transform_4(%arg0: i32, %arg1: i32) -> (i32, i32, i32, i32) {
    %c0_i32 = arith.constant 0 : i32
    %c0_i32_0 = arith.constant 0 : i32
    %c0_i32_1 = arith.constant 0 : i32
    return %arg0, %arg1, %c0_i32, %c0_i32_0 : i32, i32, i32, i32
  }
  func.func @transform_5(%arg0: i32, %arg1: i32) -> (i32, i32, i32, i32) {
    %c0_i32 = arith.constant 0 : i32
    %c0_i32_0 = arith.constant 0 : i32
    %c0_i32_1 = arith.constant 0 : i32
    return %arg0, %arg1, %c0_i32, %c0_i32_0 : i32, i32, i32, i32
  }
}

module attributes {stable_mosaic.version = 11 : i64} {
  func.func @_matmul_kernel(%arg0: i32, %arg1: i32, %arg2: i32, %arg3: memref<16x32xbf16, #tpu.memory_space<vmem>>, %arg4: memref<32x128xbf16, #tpu.memory_space<vmem>>, %arg5: memref<1x128xf32, #tpu.memory_space<vmem>>, %arg6: memref<16x128xf32, #tpu.memory_space<vmem>>, %arg7: memref<16x128xf32, #tpu.memory_space<vmem>>) attributes {dimension_semantics = [#tpu.dimension_semantics<parallel>, #tpu.dimension_semantics<parallel>, #tpu.dimension_semantics<arbitrary>], iteration_bounds = array<i64: 1, 1, 1>, scalar_prefetch = 0 : i64, scratch_operands = 1 : i64, tpu.core_type = #tpu.core_type<tc>, window_params = [{transform_indices = @transform_0, window_bounds = array<i64: 16, 32>}, {transform_indices = @transform_1, window_bounds = array<i64: 32, 128>}, {transform_indices = @transform_2, window_bounds = array<i64: 1, 128>}, {transform_indices = @transform_3, window_bounds = array<i64: 16, 128>}]} {
    %c0_i32 = arith.constant 0 : i32
    %0 = arith.cmpi eq, %arg2, %c0_i32 : i32
    %1 = arith.extui %0 : i1 to i32
    %c0_i32_0 = arith.constant 0 : i32
    %2 = arith.cmpi ne, %1, %c0_i32_0 : i32
    scf.if %2 {
      %cst_10 = arith.constant 0.000000e+00 : f32
      %12 = vector.broadcast %cst_10 : f32 to vector<16x128xf32>
      %c0_11 = arith.constant 0 : index
      %c0_12 = arith.constant 0 : index
      %13 = vector.load %arg7[%c0_11, %c0_12] : memref<16x128xf32, #tpu.memory_space<vmem>>, vector<16x128xf32>
      tpu.vector_store %arg7[%c0_11, %c0_12], %12 {strides = array<i32>} : memref<16x128xf32, #tpu.memory_space<vmem>>, vector<16x128xf32>,
    } else {
    }
    %c0 = arith.constant 0 : index
    %c0_1 = arith.constant 0 : index
    %3 = vector.load %arg7[%c0, %c0_1] : memref<16x128xf32, #tpu.memory_space<vmem>>, vector<16x128xf32>
    %c0_2 = arith.constant 0 : index
    %c0_3 = arith.constant 0 : index
    %4 = vector.load %arg3[%c0_2, %c0_3] : memref<16x32xbf16, #tpu.memory_space<vmem>>, vector<16x32xbf16>
    %c0_4 = arith.constant 0 : index
    %c0_5 = arith.constant 0 : index
    %5 = vector.load %arg4[%c0_4, %c0_5] : memref<32x128xbf16, #tpu.memory_space<vmem>>, vector<32x128xbf16>
    %cst = arith.constant dense<0.000000e+00> : vector<16x128xf32>
    %6 = tpu.matmul %4, %5, %cst {dimension_numbers = #tpu.dot_dimension_numbers<[1], [0], [0], [1], [0, 0, 1, 1], [], []>} : vector<16x32xbf16>, vector<32x128xbf16>, vector<16x128xf32> -> vector<16x128xf32>
    %7 = arith.addf %3, %6 : vector<16x128xf32>
    %c0_6 = arith.constant 0 : index
    %c0_7 = arith.constant 0 : index
    %8 = vector.load %arg7[%c0_6, %c0_7] : memref<16x128xf32, #tpu.memory_space<vmem>>, vector<16x128xf32>
    tpu.vector_store %arg7[%c0_6, %c0_7], %7 {strides = array<i32>} : memref<16x128xf32, #tpu.memory_space<vmem>>, vector<16x128xf32>,
    %c0_i32_8 = arith.constant 0 : i32
    %9 = arith.cmpi eq, %arg2, %c0_i32_8 : i32
    %10 = arith.extui %9 : i1 to i32
    %c0_i32_9 = arith.constant 0 : i32
    %11 = arith.cmpi ne, %10, %c0_i32_9 : i32
    scf.if %11 {
      %c0_10 = arith.constant 0 : index
      %c0_11 = arith.constant 0 : index
      %12 = vector.load %arg7[%c0_10, %c0_11] : memref<16x128xf32, #tpu.memory_space<vmem>>, vector<16x128xf32>
      %c0_12 = arith.constant 0 : index
      %c0_13 = arith.constant 0 : index
      %13 = vector.load %arg5[%c0_12, %c0_13] : memref<1x128xf32, #tpu.memory_space<vmem>>, vector<1x128xf32>
      %14 = vector.broadcast %13 : vector<1x128xf32> to vector<16x128xf32>
      %15 = arith.addf %12, %14 : vector<16x128xf32>
      %c0_14 = arith.constant 0 : index
      %c0_15 = arith.constant 0 : index
      %16 = vector.load %arg6[%c0_14, %c0_15] : memref<16x128xf32, #tpu.memory_space<vmem>>, vector<16x128xf32>
      tpu.vector_store %arg6[%c0_14, %c0_15], %15 {strides = array<i32>} : memref<16x128xf32, #tpu.memory_space<vmem>>, vector<16x128xf32>,
    } else {
    }
    return
  }
  func.func @transform_0(%arg0: i32, %arg1: i32, %arg2: i32) -> (i32, i32) {
    %c0_i32 = arith.constant 0 : i32
    return %arg0, %arg2 : i32, i32
  }
  func.func @transform_1(%arg0: i32, %arg1: i32, %arg2: i32) -> (i32, i32) {
    %c0_i32 = arith.constant 0 : i32
    return %arg2, %arg1 : i32, i32
  }
  func.func @transform_2(%arg0: i32, %arg1: i32, %arg2: i32) -> (i32, i32) {
    %c0_i32 = arith.constant 0 : i32
    %c0_i32_0 = arith.constant 0 : i32
    return %c0_i32, %arg1 : i32, i32
  }
  func.func @transform_3(%arg0: i32, %arg1: i32, %arg2: i32) -> (i32, i32) {
    %c0_i32 = arith.constant 0 : i32
    return %arg0, %arg1 : i32, i32
  }
}

</mosaic_0001>

<bundles_post_ra>
// kernel: transformer_forward.32
= control target key start
LH: loop header
LB: loop body
LE: loop exit
PB: predicated region body
PF: predicated region fallthrough
CT: control target
= control target key end

     0   :  { %v135_v1 = vmov 0.0   ;;  %vm52_vm0 = vcmask 261120   ;;  %s177_s1 = inlined_call_operand.vmem [shape: bf16[32,128], index: 1, kind: input, shape index: {}]   ;;  %s178_s0 = inlined_call_operand.vmem [shape: bf16[20,32], index: 0, kind: input, shape index: {}]   ;;  %s179_s2 = inlined_call_operand.vmem [shape: f32[1,128], index: 2, kind: input, shape index: {}]   ;;  %s180_s3 = inlined_call_operand.vmem [shape: bf16[20,128], index: 3, kind: output, shape index: {}]  }
   0x1   :  { %v125_v0 = vld [vmem:[%s177_s1 + $0x8] sm:$0xff]  ;;  %21 = vst [vmem:[#allocation2 + $0x8] sm:$0xf] %v135_v1  ;;  %v124_v3 = vld [vmem:[%s177_s1] sm:$0xff] }
   0x2   :  { %v27_v2 = vld [vmem:[%s178_s0 + $0x8] sm:$0x3]  ;;  %65 = vmatpush.bf16.msra.mxu0 %v125_v0  ;;  %131 = vmatpush.bf16.msra.mxu1 %v125_v0  ;;  %v123_v5 = vld [vmem:[%s178_s0] sm:$0xff] }
   0x3   :  { %v37_v4 = vunpack.c.l.b16 %v27_v2  ;;  %v134_v11 = vld [vmem:[%s179_s2] ss:$0 sm:$0xff] }
   0x5   :  { %v39_v6 = vpack.c.b16 %v37_v4, %v37_v4 }
   0x6   :  { %66 = vmatpush.bf16.msra.mxu0 %v124_v3  ;;  %132 = vmatpush.bf16.msra.mxu1 %v124_v3 }
   0x8   :  { %v24_v7 = vld [vmem:[#allocation2 + $0x8] sm:$0xf] }
   0x9   :  { %121 = vmatmul.msk.bf16.vlgmr.msra.gmra.mxu0 %vm52_vm0, %v123_v5  ;;  %122 = vmatmul.msk.bf16.vlgmr.msra.gmra.mxu1 %vm52_vm0, %v39_v6 }
  0x86   :  { %v68_v8 = vpop.f32.mrf.mxu0  ;;  %v73_v9 = vpop.f32.mrf.mxu1 }
  0x87   :  { %v79_v10 = vadd.f32 %v73_v9, %v24_v7  ;;  %v93_v14 = vadd.f32 %v134_v11, %v68_v8 }
  0x89   :  { %82 = vst [vmem:[#allocation2 + $0x8] sm:$0xf] %v79_v10  ;;  %v96_v18 = vmax.f32 %v93_v14, 0.0 }
  0x8e   :  { %v70_v12 = vpop.f32.mrf.mxu0  ;;  %v75_v13 = vpop.f32.mrf.mxu1 }
  0x8f   :  { %v94_v16 = vadd.f32 %v134_v11, %v70_v12 }
  0x90   :  { %v88_v15 = vld [vmem:[#allocation2 + $0x8] sm:$0xf] }
  0x91   :  { %v95_v17 = vadd.f32 %v134_v11, %v88_v15  ;;  %v97_v19 = vmax.f32 %v94_v16, 0.0 }
  0x93   :  { %v98_v20 = vmax.f32 %v95_v17, 0.0  ;;  %v129_v21 = vpack.c.bf16 %v97_v19, %v96_v18 }
  0x95   :  { %v101_v22 = vpack.c.bf16 %v98_v20, %v98_v20  ;;  %130 = vst [vmem:[%s180_s3] sm:$0xff] %v129_v21  }
  0x97   :  { %104 = vst [vmem:[%s180_s3 + $0x8] sm:$0x3] %v101_v22 }

// kernel: transformer_forward.29
= control target key start
LH: loop header
LB: loop body
LE: loop exit
PB: predicated region body
PF: predicated region fallthrough
CT: control target
= control target key end

     0   :  { %v132_v1 = vmov 0.0   ;;  %vm52_vm0 = vcmask 261120   ;;  %s174_s1 = inlined_call_operand.vmem [shape: bf16[32,128], index: 1, kind: input, shape index: {}]   ;;  %s175_s0 = inlined_call_operand.vmem [shape: bf16[20,32], index: 0, kind: input, shape index: {}]   ;;  %s176_s2 = inlined_call_operand.vmem [shape: f32[1,128], index: 2, kind: input, shape index: {}]   ;;  %s177_s3 = inlined_call_operand.vmem [shape: bf16[20,128], index: 3, kind: output, shape index: {}]  }
   0x1   :  { %v122_v0 = vld [vmem:[%s174_s1 + $0x8] sm:$0xff]  ;;  %21 = vst [vmem:[#allocation2 + $0x8] sm:$0xf] %v132_v1  ;;  %v121_v3 = vld [vmem:[%s174_s1] sm:$0xff] }
   0x2   :  { %v27_v2 = vld [vmem:[%s175_s0 + $0x8] sm:$0x3]  ;;  %65 = vmatpush.bf16.msra.mxu0 %v122_v0  ;;  %128 = vmatpush.bf16.msra.mxu1 %v122_v0  ;;  %v120_v5 = vld [vmem:[%s175_s0] sm:$0xff] }
   0x3   :  { %v37_v4 = vunpack.c.l.b16 %v27_v2  ;;  %v131_v11 = vld [vmem:[%s176_s2] ss:$0 sm:$0xff] }
   0x5   :  { %v39_v6 = vpack.c.b16 %v37_v4, %v37_v4 }
   0x6   :  { %66 = vmatpush.bf16.msra.mxu0 %v121_v3  ;;  %129 = vmatpush.bf16.msra.mxu1 %v121_v3 }
   0x8   :  { %v24_v7 = vld [vmem:[#allocation2 + $0x8] sm:$0xf] }
   0x9   :  { %118 = vmatmul.msk.bf16.vlgmr.msra.gmra.mxu0 %vm52_vm0, %v120_v5  ;;  %119 = vmatmul.msk.bf16.vlgmr.msra.gmra.mxu1 %vm52_vm0, %v39_v6 }
  0x86   :  { %v68_v8 = vpop.f32.mrf.mxu0  ;;  %v73_v9 = vpop.f32.mrf.mxu1 }
  0x87   :  { %v79_v10 = vadd.f32 %v73_v9, %v24_v7  ;;  %v93_v14 = vadd.f32 %v131_v11, %v68_v8 }
  0x89   :  { %82 = vst [vmem:[#allocation2 + $0x8] sm:$0xf] %v79_v10 }
  0x8e   :  { %v70_v12 = vpop.f32.mrf.mxu0  ;;  %v75_v13 = vpop.f32.mrf.mxu1 }
  0x8f   :  { %v94_v16 = vadd.f32 %v131_v11, %v70_v12 }
  0x90   :  { %v88_v15 = vld [vmem:[#allocation2 + $0x8] sm:$0xf] }
  0x91   :  { %v95_v17 = vadd.f32 %v131_v11, %v88_v15  ;;  %v126_v18 = vpack.c.bf16 %v94_v16, %v93_v14 }
  0x93   :  { %v98_v19 = vpack.c.bf16 %v95_v17, %v95_v17  ;;  %127 = vst [vmem:[%s177_s3] sm:$0xff] %v126_v18  }
  0x95   :  { %101 = vst [vmem:[%s177_s3 + $0x8] sm:$0x3] %v98_v19 }

// kernel: transformer_forward.31
= control target key start
LH: loop header
LB: loop body
LE: loop exit
PB: predicated region body
PF: predicated region fallthrough
CT: control target
= control target key end

     0   :  { %v248_v1 = vmov 0.0   ;;  %vm61_vm0 = vcmask 261120   ;;  %vm118_vm1 = vcmask 1043456   ;;  %s329_s1 = inlined_call_operand.vmem [shape: bf16[32,128], index: 1, kind: input, shape index: {}]   ;;  %s330_s0 = inlined_call_operand.vmem [shape: bf16[20,32], index: 0, kind: input, shape index: {}]   ;;  %s331_s2 = inlined_call_operand.vmem [shape: f32[1,128], index: 2, kind: input, shape index: {}]   ;;  %s332_s3 = inlined_call_operand.vmem [shape: bf16[20,128], index: 3, kind: input, shape index: {}]   ;;  %s333_s4 = inlined_call_operand.vmem [shape: f32[1,128], index: 4, kind: input, shape index: {}]   ;;  %s334_s5 = inlined_call_operand.vmem [shape: f32[1,128], index: 5, kind: input, shape index: {}]   ;;  %s335_s6 = inlined_call_operand.vmem [shape: bf16[20,128], index: 6, kind: output, shape index: {}]  }
   0x1   :  { %v226_v0 = vld [vmem:[%s329_s1 + $0x8] sm:$0xff]  ;;  %30 = vst [vmem:[#allocation2 + $0x8] sm:$0xf] %v248_v1  ;;  %v225_v3 = vld [vmem:[%s329_s1] sm:$0xff] }
   0x2   :  { %v36_v2 = vld [vmem:[%s330_s0 + $0x8] sm:$0x3]  ;;  %74 = vmatpush.bf16.msra.mxu0 %v226_v0  ;;  %236 = vmatpush.bf16.msra.mxu1 %v226_v0  ;;  %v224_v5 = vld [vmem:[%s330_s0] sm:$0xff] }
   0x3   :  { %v46_v4 = vunpack.c.l.b16 %v36_v2  ;;  %v228_v8 = vld [vmem:[%s332_s3] sm:$0xff]   ;;  %v107_v16 = vld [vmem:[%s332_s3 + $0x8] sm:$0x3] }
   0x4   :  { %v239_v9 = vld [vmem:[%s331_s2] ss:$0 sm:$0xff]  ;;  %v229_v13 = vunpack.c.l.bf16 %v228_v8  ;;  %v230_v19 = vunpack.c.h.bf16 %v228_v8  ;;  %v110_v20 = vunpack.c.l.bf16 %v107_v16 }
   0x5   :  { %v48_v6 = vpack.c.b16 %v46_v4, %v46_v4  ;;  %v240_v8 = vld [vmem:[%s333_s4] ss:$0 sm:$0xff] }
   0x6   :  { %75 = vmatpush.bf16.msra.mxu0 %v225_v3  ;;  %237 = vmatpush.bf16.msra.mxu1 %v225_v3 }
   0x8   :  { %v33_v7 = vld [vmem:[#allocation2 + $0x8] sm:$0xf] }
   0x9   :  { %222 = vmatmul.msk.bf16.vlgmr.msra.gmra.mxu0 %vm61_vm0, %v224_v5  ;;  %223 = vmatmul.msk.bf16.vlgmr.msra.gmra.mxu1 %vm61_vm0, %v48_v6 }
  0x86   :  { %v77_v10 = vpop.f32.mrf.mxu0  ;;  %v82_v11 = vpop.f32.mrf.mxu1 }
  0x87   :  { %v88_v12 = vadd.f32 %v82_v11, %v33_v7  ;;  %v102_v14 = vadd.f32 %v239_v9, %v77_v10 }
  0x89   :  { %91 = vst [vmem:[#allocation2 + $0x8] sm:$0xf] %v88_v12  ;;  %v302_v15 = vadd.f32 %v229_v13, %v102_v14 }
  0x8b   :  { %114 = vadd.xlane.f32.xlu0 %v302_v15  ;;  %v125_v29 = vmul.f32 %v302_v15, %v302_v15 }
  0x8e   :  { %v79_v17 = vpop.f32.mrf.mxu0  ;;  %v84_v18 = vpop.f32.mrf.mxu1 }
  0x8f   :  { %v103_v22 = vadd.f32 %v239_v9, %v79_v17  ;;  %v241_v17 = vld [vmem:[%s334_s5] ss:$0 sm:$0xff] }
  0x90   :  { %v97_v21 = vld [vmem:[#allocation2 + $0x8] sm:$0xf] }
  0x91   :  { %v104_v23 = vadd.f32 %v239_v9, %v97_v21  ;;  %v112_v24 = vadd.f32 %v230_v19, %v103_v22 }
  0x93   :  { %v308_v25 = vadd.f32 %v110_v20, %v104_v23  ;;  %116 = vadd.xlane.f32.xlu0 %v112_v24  ;;  %v126_v26 = vmul.f32 %v112_v24, %v112_v24 }
  0x95   :  { %v119_v27 = vsel %vm118_vm1, %v308_v25, 0.0  ;;  %130 = vadd.xlane.f32.xlu2 %v126_v26  ;;  %v127_v28 = vmul.f32 %v308_v25, %v308_v25 }
  0x96   :  { %120 = vadd.xlane.f32.xlu1 %v119_v27 }
  0x97   :  { %v132_v30 = vsel %vm118_vm1, %v127_v28, 0.0 }
  0x9d   :  { %133 = vadd.xlane.f32.xlu2 %v132_v30 }
  0x9e   :  { %128 = vadd.xlane.f32.xlu1 %v125_v29 }
  0xfe   :  { %v115_v31 = vpop.xlane.xlu0 %114 }
  0xff   :  { %v122_v39 = vmul.f32 0.03125, %v115_v31 }
 0x101   :  { %v138_v43 = vmul.f32 %v122_v39, %v122_v39  ;;  %v147_v12 = vsub.f32 %v302_v15, %v122_v39 }
 0x106   :  { %v117_v32 = vpop.xlane.xlu0 %116 }
 0x107   :  { %v123_v33 = vmul.f32 0.03125, %v117_v32 }
 0x108   :  { %v131_v35 = vpop.xlane.xlu2 %130 }
 0x109   :  { %v121_v34 = vpop.xlane.xlu1 %120  ;;  %v139_v36 = vmul.f32 %v123_v33, %v123_v33  ;;  %v136_v37 = vmul.f32 0.03125, %v131_v35  ;;  %v148_v5 = vsub.f32 %v112_v24, %v123_v33 }
 0x10a   :  { %v124_v40 = vmul.f32 0.03125, %v121_v34 }
 0x10b   :  { %v142_v38 = vsub.f32 %v136_v37, %v139_v36 }
 0x10c   :  { %v140_v46 = vmul.f32 %v124_v40, %v124_v40  ;;  %v149_v14 = vsub.f32 %v308_v25, %v124_v40 }
 0x10d   :  { %v145_v41 = vmax.f32 %v142_v38, 0.0 }
 0x10f   :  { %v151_v42 = vadd.f32 1e-05, %v145_v41 }
 0x110   :  { %v134_v45 = vpop.xlane.xlu2 %133 }
 0x111   :  { %v129_v44 = vpop.xlane.xlu1 %128  ;;  %242 = vrsqrt.f32 %v151_v42  ;;  %v137_v48 = vmul.f32 0.03125, %v134_v45  ;;  %vm169_vm3 = vweird.f32 %v151_v42 }
 0x112   :  { %v135_v47 = vmul.f32 0.03125, %v129_v44 }
 0x113   :  { %v143_v50 = vsub.f32 %v137_v48, %v140_v46 }
 0x114   :  { %v141_v49 = vsub.f32 %v135_v47, %v138_v43 }
 0x115   :  { %v146_v52 = vmax.f32 %v143_v50, 0.0 }
 0x116   :  { %v144_v51 = vmax.f32 %v141_v49, 0.0 }
 0x117   :  { %v243_v53 = vpop.eup %242  ;;  %v152_v55 = vadd.f32 1e-05, %v146_v52 }
 0x118   :  { %v150_v54 = vadd.f32 1e-05, %v144_v51  ;;  %v164_v56 = vmul.f32 %v243_v53, %v151_v42  ;;  %vm170_vm2 = vweird.f32 %v243_v53 }
 0x119   :  { %vm171_vm4 = vmor %vm169_vm3, %vm170_vm2  ;;  %vm179_vm9 = vweird.f32 %v152_v55 }
 0x11a   :  { %244 = vrsqrt.f32 %v150_v54  ;;  %v165_v57 = vmul.f32 %v243_v53, %v164_v56  ;;  %vm159_vm7 = vweird.f32 %v150_v54 }
 0x11b   :  { %246 = vrsqrt.f32 %v152_v55 }
 0x11c   :  { %v166_v58 = vmul.f32 0.5, %v165_v57 }
 0x11e   :  { %v167_v59 = vsub.f32 1.5, %v166_v58 }
 0x120   :  { %v245_v60 = vpop.eup %244  ;;  %v168_v63 = vmul.f32 %v243_v53, %v167_v59 }
 0x121   :  { %v247_v61 = vpop.eup %246  ;;  %v154_v62 = vmul.f32 %v245_v60, %v150_v54  ;;  %vm160_vm5 = vweird.f32 %v245_v60 }
 0x122   :  { %v174_v0 = vmul.f32 %v247_v61, %v152_v55  ;;  %v172_v4 = vsel %vm171_vm4, %v243_v53, %v168_v63  ;;  %vm180_vm6 = vweird.f32 %v247_v61  ;;  %vm161_vm8 = vmor %vm159_vm7, %vm160_vm5 }
 0x123   :  { %v155_v1 = vmul.f32 %v245_v60, %v154_v62  ;;  %v184_v9 = vmul.f32 %v172_v4, %v148_v5  ;;  %vm181_vm10 = vmor %vm179_vm9, %vm180_vm6 }
 0x124   :  { %v175_v2 = vmul.f32 %v247_v61, %v174_v0 }
 0x125   :  { %v156_v3 = vmul.f32 0.5, %v155_v1  ;;  %v191_v19 = vmul.f32 %v240_v8, %v184_v9 }
 0x126   :  { %v176_v6 = vmul.f32 0.5, %v175_v2 }
 0x127   :  { %v157_v7 = vsub.f32 1.5, %v156_v3  ;;  %v198_v26 = vadd.f32 %v241_v17, %v191_v19 }
 0x128   :  { %v177_v10 = vsub.f32 1.5, %v176_v6 }
 0x129   :  { %v158_v11 = vmul.f32 %v245_v60, %v157_v7 }
 0x12a   :  { %v178_v13 = vmul.f32 %v247_v61, %v177_v10 }
 0x12b   :  { %v162_v16 = vsel %vm161_vm8, %v245_v60, %v158_v11 }
 0x12c   :  { %v183_v18 = vmul.f32 %v162_v16, %v147_v12  ;;  %v182_v20 = vsel %vm181_vm10, %v247_v61, %v178_v13 }
 0x12d   :  { %v185_v21 = vmul.f32 %v182_v20, %v149_v14 }
 0x12e   :  { %v190_v22 = vmul.f32 %v240_v8, %v183_v18 }
 0x12f   :  { %v192_v23 = vmul.f32 %v240_v8, %v185_v21 }
 0x130   :  { %v197_v24 = vadd.f32 %v241_v17, %v190_v22 }
 0x131   :  { %v199_v15 = vadd.f32 %v241_v17, %v192_v23 }
 0x132   :  { %v234_v27 = vpack.c.bf16 %v198_v26, %v197_v24 }
 0x133   :  { %v202_v28 = vpack.c.bf16 %v199_v15, %v199_v15 }
 0x134   :  { %235 = vst [vmem:[%s335_s6] sm:$0xff] %v234_v27  }
 0x135   :  { %205 = vst [vmem:[%s335_s6 + $0x8] sm:$0x3] %v202_v28 }

// kernel: transformer_forward.30
= control target key start
LH: loop header
LB: loop body
LE: loop exit
PB: predicated region body
PF: predicated region fallthrough
CT: control target
= control target key end

     0   :  { %s863_s15 = smov 0   ;;  %s865_s16 = smov 0   ;;  %s948_s0 = inlined_call_operand.vmem [shape: bf16[2,4,10,8], index: 0, kind: input, shape index: {}]   ;;  %s949_s1 = inlined_call_operand.vmem [shape: bf16[2,4,10,8], index: 1, kind: input, shape index: {}]   ;;  %s950_s2 = inlined_call_operand.vmem [shape: bf16[2,4,10,8], index: 2, kind: input, shape index: {}]   ;;  %s951_s3 = inlined_call_operand.vmem [shape: f32[2,1,10], index: 3, kind: input, shape index: {}]   ;;  %s952_s4 = inlined_call_operand.vmem [shape: bf16[2,4,10,8], index: 4, kind: output, shape index: {}]  }
   0x1   :  { %s867_s17 = smov 0   ;;  %s869_s18 = smov 0  }
   0x2   :  { %s871_s19 = smov 0  }
   0x3 LB: > { %s29_s20 = sadd.s32 1, %s825_s17  ;;  %s33_s21 = sadd.s32 1, %s829_s18  ;;  %s833_s19 = sphi %s871_s19, %s14_s19   ;;  %s829_s18 = sphi %s869_s18, %s956_s18   ;;  %s825_s17 = sphi %s867_s17, %s955_s17   ;;  %s821_s16 = sphi %s865_s16, %s954_s16   ;;  %s817_s15 = sphi %s863_s15, %s953_s15  }
   0x4   : > { %p31_p0 = scmp.ge.s32.totalorder %s29_s20, 4  ;;  %p709_p1 = scmp.ge.s32.totalorder %s833_s19, 1 }
   0x5   : > { %p248_p2 = scmp.lt.s32.totalorder %s833_s19, 9 }
   0x6   : > { %s958_s20 = smov (%p31_p0, %s29_s20), 0  ;;  %s960_s21 = smov (!%p31_p0, %s33_s21), %s829_s18 }
   0x7   : > { %p249_p3 = pnand %p709_p1, %p248_p2  ;;  %p35_p4 = scmp.ge.s32.totalorder %s960_s21, 2 }
   0x8   : > { %p314_p5 = scmp.lt.s32.totalorder (!%p249_p3), %s821_s16, 1  ;;  %p316_p6 = scmp.lt.s32.totalorder (!%p249_p3), %s817_s15, 3 }
   0x9   : > { %s962_s21 = smov (%p35_p4, %s960_s21), 0  ;;  %252 = sbr.rel (%p249_p3) target bundleno = 666 (0x29a), region = 36 }
   0xe   : > { %vm377_vm0 = vcmask 64512   ;;  %vm379_vm1 = vcmask 58368   ;;  %v835_v0 = vmov 0.0   ;;  %s964_s16 = smov (!%p314_p5, %s821_s16), 1  ;;  %s966_s15 = smov (!%p316_p6, %s817_s15), 3  ;;  %vm371_vm2 = vcmask 7168  }
   0xf   : > { %378 = vst.msk [vmem:[#allocation4] sm:$0xff] %vm377_vm0, %v835_v0  ;;  %s711_s22 = sshll.u32 %s964_s16, 3  ;;  %s356_s25 = scalar_lea.vmem %s951_s3, %s964_s16  ;;  %v836_v12 = vmov -1e+30   ;;  %vm424_vm3 = vcmask 80896   ;;  %vm428_vm4 = vcmask 74752  }
  0x10   : > { %380 = vst.msk [vmem:[#allocation4 + $0x8] sm:$0x3] %vm379_vm1, %v835_v0  ;;  %s710_s26 = sshll.u32 %s966_s15, 1  ;;  %v782_v13 = vld [vmem:[%s356_s25] ss:$0 sm:$0xff]  ;;  %vm373_vm5 = vcmask 1024  }
  0x11   : > { %s320_s27 = sadd.s32 %s711_s22, %s710_s26  ;;  %372 = vst.msk [vmem:[#allocation2] sm:$0xff] %vm371_vm2, %v836_v12  ;;  %v837_v20 = vmov 0   ;;  %vm495_vm6 = vcmask 1044480   ;;  %vm543_vm7 = vcmask 60416   ;;  %vm545_vm8 = vcmask 57344  }
  0x12   : > { %s898_s28 = sshll.u32 %s320_s27, 2  ;;  %375 = vst.msk [vmem:[#allocation3] sm:$0xff] %vm371_vm2, %v835_v0  ;;  %779 = vset.pattern.permute.xlu1 %v837_v20  ;;  %780 = vset.pattern.permute.xlu0 %v837_v20 }
  0x13   : > { %s335_s5 = scalar_lea.vmem %s949_s1, %s898_s28  ;;  %s322_s8 = scalar_lea.vmem %s948_s0, %s898_s28  ;;  %374 = vst.msk [vmem:[#allocation2 + $0x8] sm:$0x3] %vm373_vm5, %v836_v12  ;;  %781 = vset.pattern.permute.xlu2 %v837_v20 }
  0x14   : > { %v724_v1 = vld [vmem:[%s335_s5] sm:$0xf]  ;;  %v734_v2 = vld [vmem:[%s335_s5] sm:$0x10]  ;;  %376 = vst.msk [vmem:[#allocation3 + $0x8] sm:$0x3] %vm373_vm5, %v835_v0  ;;  %s349_s11 = scalar_lea.vmem %s950_s2, %s898_s28  ;;  %s365_s14 = scalar_lea.vmem %s952_s4, %s898_s28 }
  0x15   : > { %v381_v3 = vld [vmem:[%s322_s8] sm:$0xf]  ;;  %v725_v4 = vor.u32 %v734_v2, %v724_v1  ;;  %v382_v5 = vld [vmem:[%s322_s8 + $0x4] sm:$0x1] }
  0x16   : > { %v383_v6 = vunpack.c.l.bf16 %v381_v3  ;;  %v384_v7 = vunpack.c.l.bf16 %v382_v5  ;;  %v729_v33 = vld [vmem:[%s349_s11] sm:$0xf]  ;;  %v735_v34 = vld [vmem:[%s349_s11] sm:$0x10] }
  0x17   : > { %v406_v8 = vsel %vm377_vm0, %v725_v4, 0  ;;  %v730_v35 = vor.u32 %v735_v34, %v729_v33  ;;  %v472_v57 = vld [vmem:[#allocation4] sm:$0xff]  ;;  %v473_v0 = vld [vmem:[#allocation4 + $0x8] sm:$0x3] }
  0x18   : > { %v385_v9 = vmul.f32 0.35355338, %v383_v6  ;;  %415 = vmatpush.bf16.xpose.msra.mxu0 %v406_v8  ;;  %v386_v10 = vmul.f32 0.35355338, %v384_v7  ;;  %v422_v21 = vld [vmem:[#allocation2] sm:$0xff] }
  0x19   : > { %v497_v36 = vsel %vm495_vm6, %v730_v35, 0  ;;  %v456_v48 = vld [vmem:[#allocation3] sm:$0xff] }
  0x1a   : > { %v387_v11 = vpack.c.bf16 %v386_v10, %v385_v9  ;;  %v423_v26 = vld [vmem:[#allocation2 + $0x8] sm:$0x3]  ;;  %506 = vmatpush.bf16.msra.mxu1 %v497_v36 }
  0x1b   : > { %v457_v52 = vld [vmem:[#allocation3 + $0x8] sm:$0x3] }
  0x1f   : > { %726 = vmatmul.msk.bf16.vlgmr.msra.gmra.mxu0 %vm377_vm0, %v387_v11 }
  0x9c   : > { %v417_v14 = vpop.f32.mrf.mxu0 }
  0x9d   : > { %v418_v15 = vadd.f32 %v782_v13, %v417_v14 }
  0x9f   : > { %v425_v16 = vsel %vm424_vm3, %v418_v15, -inf }
  0xa0   : > { %426 = vmax.xlane.f32.xlu0 %v425_v16 }
  0xa4   : > { %v419_v17 = vpop.f32.mrf.mxu0 }
  0xa5   : > { %v420_v18 = vadd.f32 %v782_v13, %v419_v17 }
  0xa7   : > { %v429_v19 = vsel %vm428_vm4, %v420_v18, -inf }
  0xa8   : > { %430 = vmax.xlane.f32.xlu0 %v429_v19 }
 0x113   : > { %v427_v22 = vpop.xlane.xlu0 %426 }
 0x114   : > { %v432_v23 = vmax.f32 %v422_v21, %v427_v22 }
 0x116   : > { %v434_v24 = vsub.f32 %v422_v21, %v432_v23  ;;  %518 = vst.msk [vmem:[#allocation2] sm:$0xff] %vm371_vm2, %v432_v23  ;;  %442 = vperm.xlu1 %779, %v432_v23  }
 0x118   : > { %v436_v25 = vmul.f32 1.442695, %v434_v24 }
 0x11a   : > { %783 = vpow2.f32 %v436_v25 }
 0x11b   : > { %v431_v27 = vpop.xlane.xlu0 %430 }
 0x11c   : > { %v433_v28 = vmax.f32 %v423_v26, %v431_v27 }
 0x11e   : > { %v435_v29 = vsub.f32 %v423_v26, %v433_v28  ;;  %519 = vst.msk [vmem:[#allocation2 + $0x8] sm:$0x3] %vm373_vm5, %v433_v28  ;;  %447 = vperm.xlu1 %779, %v433_v28  }
 0x120   : > { %v784_v30 = vpop.eup %783  ;;  %v438_v31 = vmul.f32 1.442695, %v435_v29 }
 0x121   : > { %476 = vperm.xlu0 %780, %v784_v30   ;;  %v458_v49 = vmul.f32 %v784_v30, %v456_v48 }
 0x122   : > { %785 = vpow2.f32 %v438_v31 }
 0x128   : > { %v786_v32 = vpop.eup %785 }
 0x129   : > { %481 = vperm.xlu1 %779, %v786_v32   ;;  %v459_v53 = vmul.f32 %v786_v32, %v457_v52 }
 0x188   : > { %v443_v37 = vpop.permute.xlu1 %442 }
 0x189   : > { %v450_v38 = vsub.f32 %v418_v15, %v443_v37 }
 0x18b   : > { %v452_v39 = vmul.f32 1.442695, %v450_v38 }
 0x18d   : > { %787 = vpow2.f32 %v452_v39 }
 0x190   : > { %v448_v40 = vpop.permute.xlu1 %447 }
 0x191   : > { %v451_v41 = vsub.f32 %v420_v18, %v448_v40 }
 0x193   : > { %v788_v42 = vpop.eup %787  ;;  %v454_v43 = vmul.f32 1.442695, %v451_v41  ;;  %v477_v58 = vpop.permute.xlu0 %476 }
 0x194   : > { %v460_v44 = vsel %vm424_vm3, %v788_v42, 0.0  ;;  %v484_v60 = vmul.f32 %v477_v58, %v472_v57 }
 0x195   : > { %789 = vpow2.f32 %v454_v43  ;;  %461 = vadd.xlane.f32.xlu2 %v460_v44 }
 0x19b   : > { %v790_v45 = vpop.eup %789  ;;  %v482_v1 = vpop.permute.xlu1 %481 }
 0x19c   : > { %v463_v46 = vsel %vm428_vm4, %v790_v45, 0.0  ;;  %v486_v47 = vpack.c.bf16 %v790_v45, %v788_v42  ;;  %v485_v3 = vmul.f32 %v482_v1, %v473_v0 }
 0x19d   : > { %464 = vadd.xlane.f32.xlu2 %v463_v46 }
 0x19e   : > { %731 = vmatmul.msk.bf16.vlgmr.msra.gmra.mxu1 %vm424_vm3, %v486_v47 }
 0x208   : > { %v462_v50 = vpop.xlane.xlu2 %461 }
 0x209   : > { %v466_v51 = vadd.f32 %v462_v50, %v458_v49 }
 0x20b   : > { %469 = vst.msk [vmem:[#allocation3] sm:$0xff] %vm371_vm2, %v466_v51 }
 0x210   : > { %v465_v54 = vpop.xlane.xlu2 %464 }
 0x211   : > { %v467_v55 = vadd.f32 %v465_v54, %v459_v53 }
 0x212   : > { %v525_v56 = vld [vmem:[#allocation3] sm:$0xff] }
 0x213   : > { %471 = vst.msk [vmem:[#allocation3 + $0x8] sm:$0x3] %vm373_vm5, %v467_v55  ;;  %791 = vrcp.f32 %v525_v56 }
 0x219   : > { %v792_v59 = vpop.eup %791 }
 0x21a   : > { %531 = vperm.xlu2 %781, %v792_v59   ;;  %v526_v61 = vld [vmem:[#allocation3 + $0x8] sm:$0x3] }
 0x21b   : > { %v508_v62 = vpop.f32.mrf.mxu1  ;;  %793 = vrcp.f32 %v526_v61 }
 0x21c   : > { %v513_v63 = vadd.f32 %v508_v62, %v484_v60 }
 0x21e   : > { %515 = vst.msk [vmem:[#allocation4] sm:$0xff] %vm377_vm0, %v513_v63 }
 0x221   : > { %v794_v2 = vpop.eup %793 }
 0x222   : > { %536 = vperm.xlu1 %779, %v794_v2  }
 0x223   : > { %v510_v4 = vpop.f32.mrf.mxu1 }
 0x224   : > { %v514_v5 = vadd.f32 %v510_v4, %v485_v3 }
 0x225   : > { %v523_v7 = vld [vmem:[#allocation4] sm:$0xff] }
 0x226   : > { %517 = vst.msk [vmem:[#allocation4 + $0x8] sm:$0x3] %vm379_vm1, %v514_v5 }
 0x22d   : > { %v524_v10 = vld [vmem:[#allocation4 + $0x8] sm:$0x3] }
 0x274   : > { %v532_v6 = vpop.permute.xlu2 %531 }
 0x275   : > { %v539_v8 = vmul.f32 %v532_v6, %v523_v7 }
 0x277   : > { %v541_v9 = vpack.c.bf16 %v539_v8, %v539_v8 }
 0x279   : > { %544 = vst.msk [vmem:[%s365_s14] sm:$0xf] %vm543_vm7, %v541_v9 }
 0x294   : > { %v537_v11 = vpop.permute.xlu1 %536 }
 0x295   : > { %v540_v12 = vmul.f32 %v537_v11, %v524_v10 }
 0x297   : > { %v542_v13 = vpack.c.bf16 %v540_v12, %v540_v12 }
 0x299   : > { %546 = vst.msk [vmem:[%s365_s14 + $0x4] sm:$0x1] %vm545_vm8, %v542_v13 }
 0x29a PF: > { %s14_s19 = sadd.s32 1, %s833_s19   ;;  %s953_s15 = smov %s825_s17 }
 0x29b   : > { %p11_p7 = scmp.ge.s32.totalorder %s14_s19, 10   ;;  %s954_s16 = smov %s829_s18 }
 0x29c   : > { %s955_s17 = smov %s958_s20  ;;  %s956_s18 = smov %s962_s21 }
 0x29d   :  { %13 = sbr.rel (!%p11_p7) target bundleno = 3 (0x3), region = 83 }

// kernel: transformer_forward.39
= control target key start
LH: loop header
LB: loop body
LE: loop exit
PB: predicated region body
PF: predicated region fallthrough
CT: control target
= control target key end

     0   :  { %vm46_vm0 = vcmask 261120   ;;  %s144_s1 = inlined_call_operand.vmem [shape: bf16[32,128], index: 1, kind: input, shape index: {}]   ;;  %s145_s2 = inlined_call_operand.vmem [shape: f32[1,128], index: 2, kind: input, shape index: {}]   ;;  %s146_s0 = inlined_call_operand.vmem [shape: bf16[16,32], index: 0, kind: input, shape index: {}]   ;;  %s147_s3 = inlined_call_operand.vmem [shape: bf16[16,128], index: 3, kind: output, shape index: {}]  }
   0x1   :  { %v102_v0 = vld [vmem:[%s144_s1 + $0x8] sm:$0xff]  ;;  %v101_v1 = vld [vmem:[%s144_s1] sm:$0xff] }
   0x2   :  { %56 = vmatpush.bf16.msra.mxu0 %v102_v0  ;;  %v100_v2 = vld [vmem:[%s146_s0] sm:$0xff] }
   0x3   :  { %v108_v4 = vld [vmem:[%s145_s2] ss:$0 sm:$0xff] }
   0x6   :  { %57 = vmatpush.bf16.msra.mxu0 %v101_v1 }
   0x9   :  { %99 = vmatmul.msk.bf16.vlgmr.msra.gmra.mxu0 %vm46_vm0, %v100_v2 }
  0x86   :  { %v59_v3 = vpop.f32.mrf.mxu0 }
  0x87   :  { %v77_v6 = vadd.f32 %v108_v4, %v59_v3 }
  0x8e   :  { %v61_v5 = vpop.f32.mrf.mxu0 }
  0x8f   :  { %v78_v7 = vadd.f32 %v108_v4, %v61_v5 }
  0x91   :  { %v106_v8 = vpack.c.bf16 %v78_v7, %v77_v6 }
  0x93   :  { %107 = vst [vmem:[%s147_s3] sm:$0xff] %v106_v8  }

// kernel: transformer_forward.33
= control target key start
LH: loop header
LB: loop body
LE: loop exit
PB: predicated region body
PF: predicated region fallthrough
CT: control target
= control target key end

     0   :  { %v276_v1 = vmov 0.0   ;;  %vm77_vm0 = vcmask 523264   ;;  %vm134_vm1 = vcmask 1043456   ;;  %s363_s1 = inlined_call_operand.vmem [shape: bf16[64,128], index: 1, kind: input, shape index: {}]   ;;  %s364_s0 = inlined_call_operand.vmem [shape: bf16[20,64], index: 0, kind: input, shape index: {}]   ;;  %s365_s2 = inlined_call_operand.vmem [shape: f32[1,128], index: 2, kind: input, shape index: {}]   ;;  %s366_s3 = inlined_call_operand.vmem [shape: bf16[20,128], index: 3, kind: input, shape index: {}]   ;;  %s367_s4 = inlined_call_operand.vmem [shape: f32[1,128], index: 4, kind: input, shape index: {}]   ;;  %s368_s5 = inlined_call_operand.vmem [shape: f32[1,128], index: 5, kind: input, shape index: {}]   ;;  %s369_s6 = inlined_call_operand.vmem [shape: bf16[20,128], index: 6, kind: output, shape index: {}]  }
   0x1   :  { %v252_v0 = vld [vmem:[%s363_s1 + $0x18] sm:$0xff]  ;;  %30 = vst [vmem:[#allocation2 + $0x8] sm:$0xf] %v276_v1  ;;  %v251_v2 = vld [vmem:[%s363_s1 + $0x10] sm:$0xff]  ;;  %v250_v3 = vld [vmem:[%s363_s1 + $0x8] sm:$0xff] }
   0x2   :  { %88 = vmatpush.bf16.msra.mxu0 %v252_v0  ;;  %262 = vmatpush.bf16.msra.mxu1 %v252_v0  ;;  %v36_v4 = vld [vmem:[%s364_s0 + $0x8] sm:$0x3]  ;;  %v249_v6 = vld [vmem:[%s363_s1] sm:$0xff] }
   0x3   :  { %v50_v5 = vunpack.c.l.b16 %v36_v4  ;;  %v248_v7 = vld [vmem:[%s364_s0] sm:$0xff]  ;;  %v123_v18 = vld [vmem:[%s366_s3 + $0x8] sm:$0x3] }
   0x4   :  { %v254_v10 = vld [vmem:[%s366_s3] sm:$0xff]   ;;  %v126_v22 = vunpack.c.l.bf16 %v123_v18 }
   0x5   :  { %v52_v8 = vpack.c.b16 %v50_v5, %v50_v5  ;;  %v267_v11 = vld [vmem:[%s365_s2] ss:$0 sm:$0xff]  ;;  %v255_v15 = vunpack.c.l.bf16 %v254_v10  ;;  %v256_v21 = vunpack.c.h.bf16 %v254_v10 }
   0x6   :  { %89 = vmatpush.bf16.msra.mxu0 %v251_v2  ;;  %263 = vmatpush.bf16.msra.mxu1 %v251_v2  ;;  %v268_v10 = vld [vmem:[%s367_s4] ss:$0 sm:$0xff] }
   0x8   :  { %v33_v9 = vld [vmem:[#allocation2 + $0x8] sm:$0xf] }
   0xa   :  { %90 = vmatpush.bf16.msra.mxu0 %v250_v3  ;;  %264 = vmatpush.bf16.msra.mxu1 %v250_v3 }
   0xe   :  { %91 = vmatpush.bf16.msra.mxu0 %v249_v6  ;;  %265 = vmatpush.bf16.msra.mxu1 %v249_v6 }
  0x11   :  { %246 = vmatmul.msk.bf16.vlgmr.msra.gmra.mxu0 %vm77_vm0, %v248_v7  ;;  %247 = vmatmul.msk.bf16.vlgmr.msra.gmra.mxu1 %vm77_vm0, %v52_v8 }
  0x8e   :  { %v93_v12 = vpop.f32.mrf.mxu0  ;;  %v98_v13 = vpop.f32.mrf.mxu1 }
  0x8f   :  { %v104_v14 = vadd.f32 %v98_v13, %v33_v9  ;;  %v118_v16 = vadd.f32 %v267_v11, %v93_v12 }
  0x91   :  { %107 = vst [vmem:[#allocation2 + $0x8] sm:$0xf] %v104_v14  ;;  %v336_v17 = vadd.f32 %v255_v15, %v118_v16 }
  0x93   :  { %130 = vadd.xlane.f32.xlu0 %v336_v17  ;;  %v141_v31 = vmul.f32 %v336_v17, %v336_v17 }
  0x96   :  { %v95_v19 = vpop.f32.mrf.mxu0  ;;  %v100_v20 = vpop.f32.mrf.mxu1 }
  0x97   :  { %v119_v24 = vadd.f32 %v267_v11, %v95_v19  ;;  %v269_v19 = vld [vmem:[%s368_s5] ss:$0 sm:$0xff] }
  0x98   :  { %v113_v23 = vld [vmem:[#allocation2 + $0x8] sm:$0xf] }
  0x99   :  { %v120_v25 = vadd.f32 %v267_v11, %v113_v23  ;;  %v128_v26 = vadd.f32 %v256_v21, %v119_v24 }
  0x9b   :  { %v342_v27 = vadd.f32 %v126_v22, %v120_v25  ;;  %132 = vadd.xlane.f32.xlu0 %v128_v26  ;;  %v142_v28 = vmul.f32 %v128_v26, %v128_v26 }
  0x9d   :  { %v135_v29 = vsel %vm134_vm1, %v342_v27, 0.0  ;;  %146 = vadd.xlane.f32.xlu2 %v142_v28  ;;  %v143_v30 = vmul.f32 %v342_v27, %v342_v27 }
  0x9e   :  { %136 = vadd.xlane.f32.xlu1 %v135_v29 }
  0x9f   :  { %v148_v32 = vsel %vm134_vm1, %v143_v30, 0.0 }
  0xa5   :  { %149 = vadd.xlane.f32.xlu2 %v148_v32 }
  0xa6   :  { %144 = vadd.xlane.f32.xlu1 %v141_v31 }
 0x106   :  { %v131_v33 = vpop.xlane.xlu0 %130 }
 0x107   :  { %v138_v41 = vmul.f32 0.03125, %v131_v33 }
 0x109   :  { %v154_v45 = vmul.f32 %v138_v41, %v138_v41  ;;  %v163_v14 = vsub.f32 %v336_v17, %v138_v41 }
 0x10e   :  { %v133_v34 = vpop.xlane.xlu0 %132 }
 0x10f   :  { %v139_v35 = vmul.f32 0.03125, %v133_v34 }
 0x110   :  { %v147_v37 = vpop.xlane.xlu2 %146 }
 0x111   :  { %v137_v36 = vpop.xlane.xlu1 %136  ;;  %v155_v38 = vmul.f32 %v139_v35, %v139_v35  ;;  %v152_v39 = vmul.f32 0.03125, %v147_v37  ;;  %v164_v7 = vsub.f32 %v128_v26, %v139_v35 }
 0x112   :  { %v140_v42 = vmul.f32 0.03125, %v137_v36 }
 0x113   :  { %v158_v40 = vsub.f32 %v152_v39, %v155_v38 }
 0x114   :  { %v156_v48 = vmul.f32 %v140_v42, %v140_v42  ;;  %v165_v16 = vsub.f32 %v342_v27, %v140_v42 }
 0x115   :  { %v161_v43 = vmax.f32 %v158_v40, 0.0 }
 0x117   :  { %v167_v44 = vadd.f32 1e-05, %v161_v43 }
 0x118   :  { %v150_v47 = vpop.xlane.xlu2 %149 }
 0x119   :  { %v145_v46 = vpop.xlane.xlu1 %144  ;;  %270 = vrsqrt.f32 %v167_v44  ;;  %v153_v50 = vmul.f32 0.03125, %v150_v47  ;;  %vm185_vm3 = vweird.f32 %v167_v44 }
 0x11a   :  { %v151_v49 = vmul.f32 0.03125, %v145_v46 }
 0x11b   :  { %v159_v52 = vsub.f32 %v153_v50, %v156_v48 }
 0x11c   :  { %v157_v51 = vsub.f32 %v151_v49, %v154_v45 }
 0x11d   :  { %v162_v54 = vmax.f32 %v159_v52, 0.0 }
 0x11e   :  { %v160_v53 = vmax.f32 %v157_v51, 0.0 }
 0x11f   :  { %v271_v55 = vpop.eup %270  ;;  %v168_v57 = vadd.f32 1e-05, %v162_v54 }
 0x120   :  { %v166_v56 = vadd.f32 1e-05, %v160_v53  ;;  %v180_v58 = vmul.f32 %v271_v55, %v167_v44  ;;  %vm186_vm2 = vweird.f32 %v271_v55 }
 0x121   :  { %vm187_vm4 = vmor %vm185_vm3, %vm186_vm2  ;;  %vm195_vm9 = vweird.f32 %v168_v57 }
 0x122   :  { %272 = vrsqrt.f32 %v166_v56  ;;  %v181_v59 = vmul.f32 %v271_v55, %v180_v58  ;;  %vm175_vm7 = vweird.f32 %v166_v56 }
 0x123   :  { %274 = vrsqrt.f32 %v168_v57 }
 0x124   :  { %v182_v60 = vmul.f32 0.5, %v181_v59 }
 0x126   :  { %v183_v61 = vsub.f32 1.5, %v182_v60 }
 0x128   :  { %v273_v62 = vpop.eup %272  ;;  %v184_v1 = vmul.f32 %v271_v55, %v183_v61 }
 0x129   :  { %v275_v63 = vpop.eup %274  ;;  %v170_v0 = vmul.f32 %v273_v62, %v166_v56  ;;  %vm176_vm5 = vweird.f32 %v273_v62 }
 0x12a   :  { %v190_v2 = vmul.f32 %v275_v63, %v168_v57  ;;  %v188_v6 = vsel %vm187_vm4, %v271_v55, %v184_v1  ;;  %vm196_vm6 = vweird.f32 %v275_v63  ;;  %vm177_vm8 = vmor %vm175_vm7, %vm176_vm5 }
 0x12b   :  { %v171_v3 = vmul.f32 %v273_v62, %v170_v0  ;;  %v200_v11 = vmul.f32 %v188_v6, %v164_v7  ;;  %vm197_vm10 = vmor %vm195_vm9, %vm196_vm6 }
 0x12c   :  { %v191_v4 = vmul.f32 %v275_v63, %v190_v2 }
 0x12d   :  { %v172_v5 = vmul.f32 0.5, %v171_v3  ;;  %v207_v21 = vmul.f32 %v268_v10, %v200_v11 }
 0x12e   :  { %v192_v8 = vmul.f32 0.5, %v191_v4 }
 0x12f   :  { %v173_v9 = vsub.f32 1.5, %v172_v5  ;;  %v214_v28 = vadd.f32 %v269_v19, %v207_v21 }
 0x130   :  { %v193_v12 = vsub.f32 1.5, %v192_v8 }
 0x131   :  { %v174_v13 = vmul.f32 %v273_v62, %v173_v9 }
 0x132   :  { %v194_v15 = vmul.f32 %v275_v63, %v193_v12 }
 0x133   :  { %v178_v18 = vsel %vm177_vm8, %v273_v62, %v174_v13 }
 0x134   :  { %v199_v20 = vmul.f32 %v178_v18, %v163_v14  ;;  %v198_v22 = vsel %vm197_vm10, %v275_v63, %v194_v15 }
 0x135   :  { %v201_v23 = vmul.f32 %v198_v22, %v165_v16 }
 0x136   :  { %v206_v24 = vmul.f32 %v268_v10, %v199_v20 }
 0x137   :  { %v208_v25 = vmul.f32 %v268_v10, %v201_v23 }
 0x138   :  { %v213_v26 = vadd.f32 %v269_v19, %v206_v24 }
 0x139   :  { %v215_v17 = vadd.f32 %v269_v19, %v208_v25 }
 0x13a   :  { %v260_v29 = vpack.c.bf16 %v214_v28, %v213_v26 }
 0x13b   :  { %v218_v30 = vpack.c.bf16 %v215_v17, %v215_v17 }
 0x13c   :  { %261 = vst [vmem:[%s369_s6] sm:$0xff] %v260_v29  }
 0x13d   :  { %221 = vst [vmem:[%s369_s6 + $0x8] sm:$0x3] %v218_v30 }

// kernel: transformer_forward.40
= control target key start
LH: loop header
LB: loop body
LE: loop exit
PB: predicated region body
PF: predicated region fallthrough
CT: control target
= control target key end

     0   :  { %s745_s15 = smov 0   ;;  %s747_s16 = smov 0   ;;  %s822_s0 = inlined_call_operand.vmem [shape: bf16[2,4,8,8], index: 0, kind: input, shape index: {}]   ;;  %s823_s1 = inlined_call_operand.vmem [shape: bf16[2,4,8,8], index: 1, kind: input, shape index: {}]   ;;  %s824_s2 = inlined_call_operand.vmem [shape: bf16[2,4,8,8], index: 2, kind: input, shape index: {}]   ;;  %s825_s3 = inlined_call_operand.vmem [shape: f32[2,1,8], index: 3, kind: input, shape index: {}]   ;;  %s826_s4 = inlined_call_operand.vmem [shape: bf16[2,4,8,8], index: 4, kind: output, shape index: {}]  }
   0x1   :  { %s749_s17 = smov 0   ;;  %s751_s18 = smov 0  }
   0x2   :  { %s753_s19 = smov 0  }
   0x3 LB: > { %s29_s20 = sadd.s32 1, %s707_s17  ;;  %s33_s21 = sadd.s32 1, %s711_s18  ;;  %s715_s19 = sphi %s753_s19, %s14_s19   ;;  %s711_s18 = sphi %s751_s18, %s830_s18   ;;  %s707_s17 = sphi %s749_s17, %s829_s17   ;;  %s703_s16 = sphi %s747_s16, %s828_s16   ;;  %s699_s15 = sphi %s745_s15, %s827_s15  }
   0x4   : > { %p31_p0 = scmp.ge.s32.totalorder %s29_s20, 4  ;;  %p611_p1 = scmp.ge.s32.totalorder %s715_s19, 1 }
   0x5   : > { %p241_p2 = scmp.lt.s32.totalorder %s715_s19, 9 }
   0x6   : > { %s832_s20 = smov (%p31_p0, %s29_s20), 0  ;;  %s834_s21 = smov (!%p31_p0, %s33_s21), %s711_s18 }
   0x7   : > { %p242_p3 = pnand %p611_p1, %p241_p2  ;;  %p35_p4 = scmp.ge.s32.totalorder %s834_s21, 2 }
   0x8   : > { %p301_p5 = scmp.lt.s32.totalorder (!%p242_p3), %s703_s16, 1  ;;  %p303_p6 = scmp.lt.s32.totalorder (!%p242_p3), %s699_s15, 3 }
   0x9   : > { %s836_s21 = smov (%p35_p4, %s834_s21), 0  ;;  %245 = sbr.rel (%p242_p3) target bundleno = 632 (0x278), region = 36 }
   0xe   : > { %s838_s16 = smov (!%p301_p5, %s703_s16), 1  ;;  %s840_s15 = smov (!%p303_p6, %s699_s15), 3  ;;  %vm353_vm0 = vcmask 64512   ;;  %vm350_vm1 = vcmask 7168   ;;  %v717_v6 = vmov -1e+30   ;;  %v385_v7 = vlaneseq }
   0xf   : > { %s612_s22 = sshll.u32 %s838_s16, 2  ;;  %s336_s25 = scalar_lea.vmem %s825_s3, %s838_s16  ;;  %351 = vst.msk [vmem:[#allocation2] sm:$0xff] %vm350_vm1, %v717_v6  ;;  %v718_v16 = vmov 0   ;;  %v719_v17 = vmov 0.0   ;;  %vm429_vm3 = vcmask 1043456   ;;  %vm462_vm4 = vcmask 60416  }
  0x10   : > { %s306_s26 = sadd.s32 %s612_s22, %s840_s15  ;;  %v386_v8 = vshrl.u32 %v385_v7, 7  ;;  %v388_v9 = vand.u32 127, %v385_v7  ;;  %v670_v10 = vld [vmem:[%s336_s25] ss:$0 sm:$0xff]  ;;  %667 = vset.pattern.permute.xlu0 %v718_v16  ;;  %668 = vset.pattern.permute.xlu1 %v718_v16  ;;  %352 = vst.msk [vmem:[#allocation3] sm:$0xff] %vm350_vm1, %v719_v17 }
  0x11   : > { %s778_s27 = sshll.u32 %s306_s26, 2  ;;  %669 = vset.pattern.permute.xlu2 %v718_v16  ;;  %354 = vst.msk [vmem:[#allocation4] sm:$0xff] %vm353_vm0, %v719_v17 }
  0x12   : > { %s319_s30 = scalar_lea.vmem %s823_s1, %s778_s27  ;;  %s308_s7 = scalar_lea.vmem %s822_s0, %s778_s27  ;;  %vm392_vm2 = vcmp.le.s32.totalorder %v388_v9, %v386_v8 }
  0x13   : > { %v359_v0 = vld [vmem:[%s319_s30] sm:$0xf]  ;;  %s330_s10 = scalar_lea.vmem %s824_s2, %s778_s27  ;;  %s344_s13 = scalar_lea.vmem %s826_s4, %s778_s27 }
  0x14   : > { %v355_v1 = vld [vmem:[%s308_s7] sm:$0xf]  ;;  %v370_v2 = vsel %vm353_vm0, %v359_v0, 0 }
  0x15   : > { %v356_v3 = vunpack.c.l.bf16 %v355_v1  ;;  %379 = vmatpush.bf16.xpose.msra.mxu0 %v370_v2  ;;  %v360_v22 = vld [vmem:[%s330_s10] sm:$0xf] }
  0x16   : > { %v394_v18 = vld [vmem:[#allocation2] sm:$0xff]  ;;  %v431_v23 = vsel %vm429_vm3, %v360_v22, 0 }
  0x17   : > { %v357_v4 = vmul.f32 0.35355338, %v356_v3  ;;  %440 = vmatpush.bf16.msra.mxu1 %v431_v23  ;;  %v410_v32 = vld [vmem:[#allocation3] sm:$0xff] }
  0x18   : > { %v418_v40 = vld [vmem:[#allocation4] sm:$0xff] }
  0x19   : > { %v358_v5 = vpack.c.bf16 %v357_v4, %v357_v4 }
  0x1c   : > { %620 = vmatmul.msk.bf16.vlgmr.msra.gmra.mxu0 %vm353_vm0, %v358_v5 }
  0x99   : > { %v381_v11 = vpop.f32.mrf.mxu0 }
  0x9a   : > { %v382_v12 = vadd.f32 %v670_v10, %v381_v11 }
  0x9c   : > { %v393_v13 = vsel %vm392_vm2, %v382_v12, -1e+09 }
  0x9d   : > { %v395_v14 = vsel %vm353_vm0, %v393_v13, -inf }
  0x9e   : > { %396 = vmax.xlane.f32.xlu0 %v395_v14 }
  0xa1   : > { %v383_v15 = vpop.f32.mrf.mxu0 }
 0x111   : > { %v397_v19 = vpop.xlane.xlu0 %396 }
 0x112   : > { %v398_v20 = vmax.f32 %v394_v18, %v397_v19 }
 0x114   : > { %v399_v21 = vsub.f32 %v394_v18, %v398_v20  ;;  %448 = vst.msk [vmem:[#allocation2] sm:$0xff] %vm350_vm1, %v398_v20  ;;  %404 = vperm.xlu0 %667, %v398_v20  }
 0x116   : > { %v400_v30 = vmul.f32 1.442695, %v399_v21 }
 0x186   : > { %v405_v24 = vpop.permute.xlu0 %404 }
 0x187   : > { %v407_v25 = vsub.f32 %v393_v13, %v405_v24 }
 0x189   : > { %v408_v26 = vmul.f32 1.442695, %v407_v25 }
 0x18b   : > { %671 = vpow2.f32 %v408_v26 }
 0x18c   : > { %673 = vpow2.f32 %v400_v30 }
 0x191   : > { %v672_v27 = vpop.eup %671 }
 0x192   : > { %v412_v28 = vsel %vm353_vm0, %v672_v27, 0.0  ;;  %v425_v29 = vpack.c.bf16 %v672_v27, %v672_v27  ;;  %v674_v31 = vpop.eup %673 }
 0x193   : > { %413 = vadd.xlane.f32.xlu1 %v412_v28  ;;  %v411_v33 = vmul.f32 %v674_v31, %v410_v32 }
 0x194   : > { %621 = vmatmul.msk.bf16.vlgmr.msra.gmra.mxu1 %vm353_vm0, %v425_v29 }
 0x1ac   : > { %421 = vperm.xlu1 %668, %v674_v31  }
 0x206   : > { %v414_v34 = vpop.xlane.xlu1 %413 }
 0x207   : > { %v415_v35 = vadd.f32 %v414_v34, %v411_v33 }
 0x209   : > { %417 = vst.msk [vmem:[#allocation3] sm:$0xff] %vm350_vm1, %v415_v35 }
 0x210   : > { %v453_v36 = vld [vmem:[#allocation3] sm:$0xff] }
 0x211   : > { %v442_v37 = vpop.f32.mrf.mxu1  ;;  %675 = vrcp.f32 %v453_v36 }
 0x217   : > { %v676_v38 = vpop.eup %675 }
 0x218   : > { %457 = vperm.xlu2 %669, %v676_v38  }
 0x219   : > { %v444_v39 = vpop.f32.mrf.mxu1 }
 0x21e   : > { %v422_v41 = vpop.permute.xlu1 %421 }
 0x21f   : > { %v424_v42 = vmul.f32 %v422_v41, %v418_v40 }
 0x221   : > { %v446_v43 = vadd.f32 %v442_v37, %v424_v42 }
 0x223   : > { %447 = vst.msk [vmem:[#allocation4] sm:$0xff] %vm353_vm0, %v446_v43 }
 0x22a   : > { %v452_v44 = vld [vmem:[#allocation4] sm:$0xff] }
 0x272   : > { %v458_v45 = vpop.permute.xlu2 %457 }
 0x273   : > { %v460_v46 = vmul.f32 %v458_v45, %v452_v44 }
 0x275   : > { %v461_v47 = vpack.c.bf16 %v460_v46, %v460_v46 }
 0x277   : > { %463 = vst.msk [vmem:[%s344_s13] sm:$0xf] %vm462_vm4, %v461_v47 }
 0x278 PF: > { %s14_s19 = sadd.s32 1, %s715_s19   ;;  %s827_s15 = smov %s707_s17 }
 0x279   : > { %p11_p7 = scmp.ge.s32.totalorder %s14_s19, 10   ;;  %s828_s16 = smov %s711_s18 }
 0x27a   : > { %s829_s17 = smov %s832_s20  ;;  %s830_s18 = smov %s836_s21 }
 0x27b   :  { %13 = sbr.rel (!%p11_p7) target bundleno = 3 (0x3), region = 83 }

// kernel: transformer_forward.41
= control target key start
LH: loop header
LB: loop body
LE: loop exit
PB: predicated region body
PF: predicated region fallthrough
CT: control target
= control target key end

     0   :  { %vm55_vm0 = vcmask 261120   ;;  %s251_s1 = inlined_call_operand.vmem [shape: bf16[32,128], index: 1, kind: input, shape index: {}]   ;;  %s252_s2 = inlined_call_operand.vmem [shape: f32[1,128], index: 2, kind: input, shape index: {}]   ;;  %s253_s0 = inlined_call_operand.vmem [shape: bf16[16,32], index: 0, kind: input, shape index: {}]   ;;  %s254_s3 = inlined_call_operand.vmem [shape: bf16[16,128], index: 3, kind: input, shape index: {}]   ;;  %s255_s4 = inlined_call_operand.vmem [shape: f32[1,128], index: 4, kind: input, shape index: {}]   ;;  %s256_s5 = inlined_call_operand.vmem [shape: f32[1,128], index: 5, kind: input, shape index: {}]   ;;  %s257_s6 = inlined_call_operand.vmem [shape: bf16[16,128], index: 6, kind: output, shape index: {}]  }
   0x1   :  { %v175_v0 = vld [vmem:[%s251_s1 + $0x8] sm:$0xff]  ;;  %v174_v1 = vld [vmem:[%s251_s1] sm:$0xff] }
   0x2   :  { %65 = vmatpush.bf16.msra.mxu0 %v175_v0  ;;  %v173_v2 = vld [vmem:[%s253_s0] sm:$0xff] }
   0x3   :  { %v177_v3 = vld [vmem:[%s254_s3] sm:$0xff]  }
   0x4   :  { %v185_v4 = vld [vmem:[%s252_s2] ss:$0 sm:$0xff]  ;;  %v178_v5 = vunpack.c.l.bf16 %v177_v3  ;;  %v179_v10 = vunpack.c.h.bf16 %v177_v3 }
   0x5   :  { %v186_v44 = vld [vmem:[%s255_s4] ss:$0 sm:$0xff] }
   0x6   :  { %66 = vmatpush.bf16.msra.mxu0 %v174_v1  ;;  %v187_v49 = vld [vmem:[%s256_s5] ss:$0 sm:$0xff] }
   0x9   :  { %172 = vmatmul.msk.bf16.vlgmr.msra.gmra.mxu0 %vm55_vm0, %v173_v2 }
  0x86   :  { %v68_v6 = vpop.f32.mrf.mxu0 }
  0x87   :  { %v86_v7 = vadd.f32 %v185_v4, %v68_v6 }
  0x89   :  { %v92_v8 = vadd.f32 %v178_v5, %v86_v7 }
  0x8b   :  { %94 = vadd.xlane.f32.xlu0 %v92_v8  ;;  %v100_v9 = vmul.f32 %v92_v8, %v92_v8 }
  0x8d   :  { %102 = vadd.xlane.f32.xlu1 %v100_v9 }
  0x8e   :  { %v70_v11 = vpop.f32.mrf.mxu0 }
  0x8f   :  { %v87_v12 = vadd.f32 %v185_v4, %v70_v11 }
  0x91   :  { %v93_v13 = vadd.f32 %v179_v10, %v87_v12 }
  0x93   :  { %96 = vadd.xlane.f32.xlu0 %v93_v13  ;;  %v101_v14 = vmul.f32 %v93_v13, %v93_v13 }
  0x95   :  { %104 = vadd.xlane.f32.xlu1 %v101_v14 }
  0xfe   :  { %v95_v15 = vpop.xlane.xlu0 %94 }
  0xff   :  { %v98_v16 = vmul.f32 0.03125, %v95_v15 }
 0x100   :  { %v103_v17 = vpop.xlane.xlu1 %102 }
 0x101   :  { %v108_v18 = vmul.f32 %v98_v16, %v98_v16  ;;  %v106_v19 = vmul.f32 0.03125, %v103_v17  ;;  %v114_v42 = vsub.f32 %v92_v8, %v98_v16 }
 0x103   :  { %v110_v20 = vsub.f32 %v106_v19, %v108_v18 }
 0x105   :  { %v112_v21 = vmax.f32 %v110_v20, 0.0 }
 0x106   :  { %v97_v22 = vpop.xlane.xlu0 %96 }
 0x107   :  { %v116_v23 = vadd.f32 1e-05, %v112_v21  ;;  %v99_v24 = vmul.f32 0.03125, %v97_v22 }
 0x108   :  { %v105_v25 = vpop.xlane.xlu1 %104 }
 0x109   :  { %188 = vrsqrt.f32 %v116_v23  ;;  %v109_v26 = vmul.f32 %v99_v24, %v99_v24  ;;  %v107_v27 = vmul.f32 0.03125, %v105_v25  ;;  %vm124_vm2 = vweird.f32 %v116_v23 }
 0x10a   :  { %v115_v47 = vsub.f32 %v93_v13, %v99_v24 }
 0x10b   :  { %v111_v28 = vsub.f32 %v107_v27, %v109_v26 }
 0x10d   :  { %v113_v29 = vmax.f32 %v111_v28, 0.0 }
 0x10f   :  { %v189_v30 = vpop.eup %188  ;;  %v117_v32 = vadd.f32 1e-05, %v113_v29 }
 0x110   :  { %v119_v31 = vmul.f32 %v189_v30, %v116_v23  ;;  %vm125_vm1 = vweird.f32 %v189_v30 }
 0x111   :  { %190 = vrsqrt.f32 %v117_v32  ;;  %vm126_vm3 = vmor %vm124_vm2, %vm125_vm1  ;;  %vm134_vm5 = vweird.f32 %v117_v32 }
 0x112   :  { %v120_v33 = vmul.f32 %v189_v30, %v119_v31 }
 0x114   :  { %v121_v34 = vmul.f32 0.5, %v120_v33 }
 0x116   :  { %v122_v35 = vsub.f32 1.5, %v121_v34 }
 0x117   :  { %v191_v36 = vpop.eup %190 }
 0x118   :  { %v123_v37 = vmul.f32 %v189_v30, %v122_v35  ;;  %v129_v38 = vmul.f32 %v191_v36, %v117_v32  ;;  %vm135_vm4 = vweird.f32 %v191_v36 }
 0x119   :  { %vm136_vm6 = vmor %vm134_vm5, %vm135_vm4 }
 0x11a   :  { %v130_v39 = vmul.f32 %v191_v36, %v129_v38  ;;  %v127_v40 = vsel %vm126_vm3, %v189_v30, %v123_v37 }
 0x11b   :  { %v138_v45 = vmul.f32 %v127_v40, %v114_v42 }
 0x11c   :  { %v131_v41 = vmul.f32 0.5, %v130_v39 }
 0x11d   :  { %v144_v50 = vmul.f32 %v186_v44, %v138_v45 }
 0x11e   :  { %v132_v43 = vsub.f32 1.5, %v131_v41 }
 0x11f   :  { %v150_v53 = vadd.f32 %v187_v49, %v144_v50 }
 0x120   :  { %v133_v46 = vmul.f32 %v191_v36, %v132_v43 }
 0x122   :  { %v137_v48 = vsel %vm136_vm6, %v191_v36, %v133_v46 }
 0x123   :  { %v139_v51 = vmul.f32 %v137_v48, %v115_v47 }
 0x125   :  { %v145_v52 = vmul.f32 %v186_v44, %v139_v51 }
 0x127   :  { %v151_v54 = vadd.f32 %v187_v49, %v145_v52 }
 0x129   :  { %v183_v55 = vpack.c.bf16 %v151_v54, %v150_v53 }
 0x12b   :  { %184 = vst [vmem:[%s257_s6] sm:$0xff] %v183_v55  }

// kernel: transformer_forward.44
= control target key start
LH: loop header
LB: loop body
LE: loop exit
PB: predicated region body
PF: predicated region fallthrough
CT: control target
= control target key end

     0   :  { %s783_s15 = smov 0   ;;  %s785_s16 = smov 0   ;;  %s868_s0 = inlined_call_operand.vmem [shape: bf16[2,4,8,8], index: 0, kind: input, shape index: {}]   ;;  %s869_s1 = inlined_call_operand.vmem [shape: bf16[2,4,10,8], index: 1, kind: input, shape index: {}]   ;;  %s870_s2 = inlined_call_operand.vmem [shape: bf16[2,4,10,8], index: 2, kind: input, shape index: {}]   ;;  %s871_s3 = inlined_call_operand.vmem [shape: f32[2,1,10], index: 3, kind: input, shape index: {}]   ;;  %s872_s4 = inlined_call_operand.vmem [shape: bf16[2,4,8,8], index: 4, kind: output, shape index: {}]  }
   0x1   :  { %s787_s17 = smov 0   ;;  %s789_s18 = smov 0  }
   0x2   :  { %s791_s19 = smov 0  }
   0x3 LB: > { %s29_s20 = sadd.s32 1, %s745_s17  ;;  %s33_s21 = sadd.s32 1, %s749_s18  ;;  %s753_s19 = sphi %s791_s19, %s14_s19   ;;  %s749_s18 = sphi %s789_s18, %s876_s18   ;;  %s745_s17 = sphi %s787_s17, %s875_s17   ;;  %s741_s16 = sphi %s785_s16, %s874_s16   ;;  %s737_s15 = sphi %s783_s15, %s873_s15  }
   0x4   : > { %p31_p0 = scmp.ge.s32.totalorder %s29_s20, 4  ;;  %p637_p1 = scmp.ge.s32.totalorder %s753_s19, 1 }
   0x5   : > { %p247_p2 = scmp.lt.s32.totalorder %s753_s19, 9 }
   0x6   : > { %s878_s20 = smov (%p31_p0, %s29_s20), 0  ;;  %s880_s21 = smov (!%p31_p0, %s33_s21), %s749_s18 }
   0x7   : > { %p248_p3 = pnand %p637_p1, %p247_p2  ;;  %p35_p4 = scmp.ge.s32.totalorder %s880_s21, 2 }
   0x8   : > { %p311_p5 = scmp.lt.s32.totalorder (!%p248_p3), %s741_s16, 1  ;;  %p313_p6 = scmp.lt.s32.totalorder (!%p248_p3), %s737_s15, 3 }
   0x9   : > { %s882_s21 = smov (%p35_p4, %s880_s21), 0  ;;  %251 = sbr.rel (%p248_p3) target bundleno = 634 (0x27a), region = 36 }
   0xe   : > { %vm366_vm0 = vcmask 7168   ;;  %v755_v0 = vmov 0.0   ;;  %vm369_vm1 = vcmask 64512   ;;  %s884_s16 = smov (!%p311_p5, %s741_s16), 1  ;;  %s886_s15 = smov (!%p313_p6, %s737_s15), 3  ;;  %vm409_vm2 = vcmask 80896  }
   0xf   : > { %368 = vst.msk [vmem:[#allocation3] sm:$0xff] %vm366_vm0, %v755_v0  ;;  %s641_s22 = sshll.u32 %s884_s16, 3  ;;  %s638_s23 = sshll.u32 %s884_s16, 2  ;;  %v756_v9 = vmov -1e+30   ;;  %v757_v15 = vmov 0  }
  0x10   : > { %370 = vst.msk [vmem:[#allocation4] sm:$0xff] %vm369_vm1, %v755_v0  ;;  %s640_s24 = sshll.u32 %s886_s15, 1  ;;  %s815_s25 = sadd.s32 %s638_s23, %s886_s15  ;;  %705 = vset.pattern.permute.xlu0 %v757_v15  ;;  %706 = vset.pattern.permute.xlu1 %v757_v15  ;;  %vm449_vm3 = vcmask 1044480   ;;  %vm482_vm4 = vcmask 60416  }
  0x11   : > { %s817_s26 = sadd.s32 %s641_s22, %s640_s24  ;;  %s639_s27 = sshll.u32 %s815_s25, 2  ;;  %367 = vst.msk [vmem:[#allocation2] sm:$0xff] %vm366_vm0, %v756_v9  ;;  %707 = vset.pattern.permute.xlu2 %v757_v15 }
  0x12   : > { %s642_s28 = sshll.u32 %s817_s26, 2  ;;  %s318_s5 = scalar_lea.vmem %s868_s0, %s639_s27 }
  0x13   : > { %s331_s8 = scalar_lea.vmem %s869_s1, %s642_s28  ;;  %v371_v1 = vld [vmem:[%s318_s5] sm:$0xf]  ;;  %s352_s11 = scalar_lea.vmem %s871_s3, %s884_s16 }
  0x14   : > { %v650_v2 = vld [vmem:[%s331_s8] sm:$0xf]  ;;  %v660_v3 = vld [vmem:[%s331_s8] sm:$0x10]  ;;  %v372_v4 = vunpack.c.l.bf16 %v371_v1  ;;  %s345_s14 = scalar_lea.vmem %s870_s2, %s642_s28  ;;  %s360_s22 = scalar_lea.vmem %s872_s4, %s639_s27 }
  0x15   : > { %v651_v5 = vor.u32 %v660_v3, %v650_v2  ;;  %v708_v10 = vld [vmem:[%s352_s11] ss:$0 sm:$0xff]  ;;  %v661_v21 = vld [vmem:[%s345_s14] sm:$0x10] }
  0x16   : > { %v373_v7 = vmul.f32 0.35355338, %v372_v4  ;;  %v655_v20 = vld [vmem:[%s345_s14] sm:$0xf]  ;;  %v425_v32 = vld [vmem:[#allocation3] sm:$0xff] }
  0x17   : > { %v393_v6 = vsel %vm369_vm1, %v651_v5, 0  ;;  %v656_v22 = vor.u32 %v661_v21, %v655_v20  ;;  %v433_v40 = vld [vmem:[#allocation4] sm:$0xff] }
  0x18   : > { %402 = vmatpush.bf16.xpose.msra.mxu0 %v393_v6  ;;  %v374_v8 = vpack.c.bf16 %v373_v7, %v373_v7  ;;  %v408_v16 = vld [vmem:[#allocation2] sm:$0xff] }
  0x19   : > { %v451_v23 = vsel %vm449_vm3, %v656_v22, 0 }
  0x1a   : > { %460 = vmatpush.bf16.msra.mxu1 %v451_v23 }
  0x1f   : > { %652 = vmatmul.msk.bf16.vlgmr.msra.gmra.mxu0 %vm369_vm1, %v374_v8 }
  0x9c   : > { %v404_v11 = vpop.f32.mrf.mxu0 }
  0x9d   : > { %v405_v12 = vadd.f32 %v708_v10, %v404_v11 }
  0x9f   : > { %v410_v13 = vsel %vm409_vm2, %v405_v12, -inf }
  0xa0   : > { %411 = vmax.xlane.f32.xlu0 %v410_v13 }
  0xa4   : > { %v406_v14 = vpop.f32.mrf.mxu0 }
 0x113   : > { %v412_v17 = vpop.xlane.xlu0 %411 }
 0x114   : > { %v413_v18 = vmax.f32 %v408_v16, %v412_v17 }
 0x116   : > { %v414_v19 = vsub.f32 %v408_v16, %v413_v18  ;;  %468 = vst.msk [vmem:[#allocation2] sm:$0xff] %vm366_vm0, %v413_v18  ;;  %419 = vperm.xlu0 %705, %v413_v18  }
 0x118   : > { %v415_v30 = vmul.f32 1.442695, %v414_v19 }
 0x188   : > { %v420_v24 = vpop.permute.xlu0 %419 }
 0x189   : > { %v422_v25 = vsub.f32 %v405_v12, %v420_v24 }
 0x18b   : > { %v423_v26 = vmul.f32 1.442695, %v422_v25 }
 0x18d   : > { %709 = vpow2.f32 %v423_v26 }
 0x18e   : > { %711 = vpow2.f32 %v415_v30 }
 0x193   : > { %v710_v27 = vpop.eup %709 }
 0x194   : > { %v427_v28 = vsel %vm409_vm2, %v710_v27, 0.0  ;;  %v440_v29 = vpack.c.bf16 %v710_v27, %v710_v27  ;;  %v712_v31 = vpop.eup %711 }
 0x195   : > { %428 = vadd.xlane.f32.xlu1 %v427_v28  ;;  %v426_v33 = vmul.f32 %v712_v31, %v425_v32 }
 0x196   : > { %657 = vmatmul.msk.bf16.vlgmr.msra.gmra.mxu1 %vm409_vm2, %v440_v29 }
 0x1ae   : > { %436 = vperm.xlu1 %706, %v712_v31  }
 0x208   : > { %v429_v34 = vpop.xlane.xlu1 %428 }
 0x209   : > { %v430_v35 = vadd.f32 %v429_v34, %v426_v33 }
 0x20b   : > { %432 = vst.msk [vmem:[#allocation3] sm:$0xff] %vm366_vm0, %v430_v35 }
 0x212   : > { %v473_v36 = vld [vmem:[#allocation3] sm:$0xff] }
 0x213   : > { %v462_v37 = vpop.f32.mrf.mxu1  ;;  %713 = vrcp.f32 %v473_v36 }
 0x219   : > { %v714_v38 = vpop.eup %713 }
 0x21a   : > { %477 = vperm.xlu2 %707, %v714_v38  }
 0x21b   : > { %v464_v39 = vpop.f32.mrf.mxu1 }
 0x220   : > { %v437_v41 = vpop.permute.xlu1 %436 }
 0x221   : > { %v439_v42 = vmul.f32 %v437_v41, %v433_v40 }
 0x223   : > { %v466_v43 = vadd.f32 %v462_v37, %v439_v42 }
 0x225   : > { %467 = vst.msk [vmem:[#allocation4] sm:$0xff] %vm369_vm1, %v466_v43 }
 0x22c   : > { %v472_v44 = vld [vmem:[#allocation4] sm:$0xff] }
 0x274   : > { %v478_v45 = vpop.permute.xlu2 %477 }
 0x275   : > { %v480_v46 = vmul.f32 %v478_v45, %v472_v44 }
 0x277   : > { %v481_v47 = vpack.c.bf16 %v480_v46, %v480_v46 }
 0x279   : > { %483 = vst.msk [vmem:[%s360_s22] sm:$0xf] %vm482_vm4, %v481_v47 }
 0x27a PF: > { %s14_s19 = sadd.s32 1, %s753_s19   ;;  %s873_s15 = smov %s745_s17 }
 0x27b   : > { %p11_p7 = scmp.ge.s32.totalorder %s14_s19, 10   ;;  %s874_s16 = smov %s749_s18 }
 0x27c   : > { %s875_s17 = smov %s878_s20  ;;  %s876_s18 = smov %s882_s21 }
 0x27d   :  { %13 = sbr.rel (!%p11_p7) target bundleno = 3 (0x3), region = 83 }

// kernel: transformer_forward.46
= control target key start
LH: loop header
LB: loop body
LE: loop exit
PB: predicated region body
PF: predicated region fallthrough
CT: control target
= control target key end

     0   :  { %vm46_vm0 = vcmask 261120   ;;  %s146_s1 = inlined_call_operand.vmem [shape: bf16[32,128], index: 1, kind: input, shape index: {}]   ;;  %s147_s2 = inlined_call_operand.vmem [shape: f32[1,128], index: 2, kind: input, shape index: {}]   ;;  %s148_s0 = inlined_call_operand.vmem [shape: bf16[16,32], index: 0, kind: input, shape index: {}]   ;;  %s149_s3 = inlined_call_operand.vmem [shape: bf16[16,128], index: 3, kind: output, shape index: {}]  }
   0x1   :  { %v104_v0 = vld [vmem:[%s146_s1 + $0x8] sm:$0xff]  ;;  %v103_v1 = vld [vmem:[%s146_s1] sm:$0xff] }
   0x2   :  { %56 = vmatpush.bf16.msra.mxu0 %v104_v0  ;;  %v102_v2 = vld [vmem:[%s148_s0] sm:$0xff] }
   0x3   :  { %v110_v4 = vld [vmem:[%s147_s2] ss:$0 sm:$0xff] }
   0x6   :  { %57 = vmatpush.bf16.msra.mxu0 %v103_v1 }
   0x9   :  { %101 = vmatmul.msk.bf16.vlgmr.msra.gmra.mxu0 %vm46_vm0, %v102_v2 }
  0x86   :  { %v59_v3 = vpop.f32.mrf.mxu0 }
  0x87   :  { %v77_v5 = vadd.f32 %v110_v4, %v59_v3 }
  0x89   :  { %v79_v8 = vmax.f32 %v77_v5, 0.0 }
  0x8e   :  { %v61_v6 = vpop.f32.mrf.mxu0 }
  0x8f   :  { %v78_v7 = vadd.f32 %v110_v4, %v61_v6 }
  0x91   :  { %v80_v9 = vmax.f32 %v78_v7, 0.0 }
  0x93   :  { %v108_v10 = vpack.c.bf16 %v80_v9, %v79_v8 }
  0x95   :  { %109 = vst [vmem:[%s149_s3] sm:$0xff] %v108_v10  }

// kernel: transformer_forward.47
= control target key start
LH: loop header
LB: loop body
LE: loop exit
PB: predicated region body
PF: predicated region fallthrough
CT: control target
= control target key end

     0   :  { %vm71_vm0 = vcmask 523264   ;;  %s283_s1 = inlined_call_operand.vmem [shape: bf16[64,128], index: 1, kind: input, shape index: {}]   ;;  %s284_s2 = inlined_call_operand.vmem [shape: f32[1,128], index: 2, kind: input, shape index: {}]   ;;  %s285_s0 = inlined_call_operand.vmem [shape: bf16[16,64], index: 0, kind: input, shape index: {}]   ;;  %s286_s3 = inlined_call_operand.vmem [shape: bf16[16,128], index: 3, kind: input, shape index: {}]   ;;  %s287_s4 = inlined_call_operand.vmem [shape: f32[1,128], index: 4, kind: input, shape index: {}]   ;;  %s288_s5 = inlined_call_operand.vmem [shape: f32[1,128], index: 5, kind: input, shape index: {}]   ;;  %s289_s6 = inlined_call_operand.vmem [shape: bf16[16,128], index: 6, kind: output, shape index: {}]  }
   0x1   :  { %v201_v0 = vld [vmem:[%s283_s1 + $0x18] sm:$0xff]  ;;  %v200_v1 = vld [vmem:[%s283_s1 + $0x10] sm:$0xff]  ;;  %v199_v2 = vld [vmem:[%s283_s1 + $0x8] sm:$0xff] }
   0x2   :  { %79 = vmatpush.bf16.msra.mxu0 %v201_v0  ;;  %v198_v3 = vld [vmem:[%s283_s1] sm:$0xff] }
   0x3   :  { %v197_v4 = vld [vmem:[%s285_s0] sm:$0xff] }
   0x4   :  { %v203_v5 = vld [vmem:[%s286_s3] sm:$0xff]  }
   0x5   :  { %v211_v6 = vld [vmem:[%s284_s2] ss:$0 sm:$0xff]  ;;  %v204_v7 = vunpack.c.l.bf16 %v203_v5  ;;  %v205_v12 = vunpack.c.h.bf16 %v203_v5 }
   0x6   :  { %80 = vmatpush.bf16.msra.mxu0 %v200_v1  ;;  %v212_v46 = vld [vmem:[%s287_s4] ss:$0 sm:$0xff] }
   0x7   :  { %v213_v51 = vld [vmem:[%s288_s5] ss:$0 sm:$0xff] }
   0xa   :  { %81 = vmatpush.bf16.msra.mxu0 %v199_v2 }
   0xe   :  { %82 = vmatpush.bf16.msra.mxu0 %v198_v3 }
  0x11   :  { %196 = vmatmul.msk.bf16.vlgmr.msra.gmra.mxu0 %vm71_vm0, %v197_v4 }
  0x8e   :  { %v84_v8 = vpop.f32.mrf.mxu0 }
  0x8f   :  { %v102_v9 = vadd.f32 %v211_v6, %v84_v8 }
  0x91   :  { %v108_v10 = vadd.f32 %v204_v7, %v102_v9 }
  0x93   :  { %110 = vadd.xlane.f32.xlu0 %v108_v10  ;;  %v116_v11 = vmul.f32 %v108_v10, %v108_v10 }
  0x95   :  { %118 = vadd.xlane.f32.xlu1 %v116_v11 }
  0x96   :  { %v86_v13 = vpop.f32.mrf.mxu0 }
  0x97   :  { %v103_v14 = vadd.f32 %v211_v6, %v86_v13 }
  0x99   :  { %v109_v15 = vadd.f32 %v205_v12, %v103_v14 }
  0x9b   :  { %112 = vadd.xlane.f32.xlu0 %v109_v15  ;;  %v117_v16 = vmul.f32 %v109_v15, %v109_v15 }
  0x9d   :  { %120 = vadd.xlane.f32.xlu1 %v117_v16 }
 0x106   :  { %v111_v17 = vpop.xlane.xlu0 %110 }
 0x107   :  { %v114_v18 = vmul.f32 0.03125, %v111_v17 }
 0x108   :  { %v119_v19 = vpop.xlane.xlu1 %118 }
 0x109   :  { %v124_v20 = vmul.f32 %v114_v18, %v114_v18  ;;  %v122_v21 = vmul.f32 0.03125, %v119_v19  ;;  %v130_v44 = vsub.f32 %v108_v10, %v114_v18 }
 0x10b   :  { %v126_v22 = vsub.f32 %v122_v21, %v124_v20 }
 0x10d   :  { %v128_v23 = vmax.f32 %v126_v22, 0.0 }
 0x10e   :  { %v113_v24 = vpop.xlane.xlu0 %112 }
 0x10f   :  { %v132_v25 = vadd.f32 1e-05, %v128_v23  ;;  %v115_v26 = vmul.f32 0.03125, %v113_v24 }
 0x110   :  { %v121_v27 = vpop.xlane.xlu1 %120 }
 0x111   :  { %214 = vrsqrt.f32 %v132_v25  ;;  %v125_v28 = vmul.f32 %v115_v26, %v115_v26  ;;  %v123_v29 = vmul.f32 0.03125, %v121_v27  ;;  %vm140_vm2 = vweird.f32 %v132_v25 }
 0x112   :  { %v131_v49 = vsub.f32 %v109_v15, %v115_v26 }
 0x113   :  { %v127_v30 = vsub.f32 %v123_v29, %v125_v28 }
 0x115   :  { %v129_v31 = vmax.f32 %v127_v30, 0.0 }
 0x117   :  { %v215_v32 = vpop.eup %214  ;;  %v133_v34 = vadd.f32 1e-05, %v129_v31 }
 0x118   :  { %v135_v33 = vmul.f32 %v215_v32, %v132_v25  ;;  %vm141_vm1 = vweird.f32 %v215_v32 }
 0x119   :  { %216 = vrsqrt.f32 %v133_v34  ;;  %vm142_vm3 = vmor %vm140_vm2, %vm141_vm1  ;;  %vm150_vm5 = vweird.f32 %v133_v34 }
 0x11a   :  { %v136_v35 = vmul.f32 %v215_v32, %v135_v33 }
 0x11c   :  { %v137_v36 = vmul.f32 0.5, %v136_v35 }
 0x11e   :  { %v138_v37 = vsub.f32 1.5, %v137_v36 }
 0x11f   :  { %v217_v38 = vpop.eup %216 }
 0x120   :  { %v139_v39 = vmul.f32 %v215_v32, %v138_v37  ;;  %v145_v40 = vmul.f32 %v217_v38, %v133_v34  ;;  %vm151_vm4 = vweird.f32 %v217_v38 }
 0x121   :  { %vm152_vm6 = vmor %vm150_vm5, %vm151_vm4 }
 0x122   :  { %v146_v41 = vmul.f32 %v217_v38, %v145_v40  ;;  %v143_v42 = vsel %vm142_vm3, %v215_v32, %v139_v39 }
 0x123   :  { %v154_v47 = vmul.f32 %v143_v42, %v130_v44 }
 0x124   :  { %v147_v43 = vmul.f32 0.5, %v146_v41 }
 0x125   :  { %v160_v52 = vmul.f32 %v212_v46, %v154_v47 }
 0x126   :  { %v148_v45 = vsub.f32 1.5, %v147_v43 }
 0x127   :  { %v166_v55 = vadd.f32 %v213_v51, %v160_v52 }
 0x128   :  { %v149_v48 = vmul.f32 %v217_v38, %v148_v45 }
 0x12a   :  { %v153_v50 = vsel %vm152_vm6, %v217_v38, %v149_v48 }
 0x12b   :  { %v155_v53 = vmul.f32 %v153_v50, %v131_v49 }
 0x12d   :  { %v161_v54 = vmul.f32 %v212_v46, %v155_v53 }
 0x12f   :  { %v167_v56 = vadd.f32 %v213_v51, %v161_v54 }
 0x131   :  { %v209_v57 = vpack.c.bf16 %v167_v56, %v166_v55 }
 0x133   :  { %210 = vst [vmem:[%s289_s6] sm:$0xff] %v209_v57  }

// kernel: transformer_forward.53
= control target key start
LH: loop header
LB: loop body
LE: loop exit
PB: predicated region body
PF: predicated region fallthrough
CT: control target
= control target key end

     0   :  { %11 = vsyncpa [#allocation3], 0  ;;  %s1025_s0 = inlined_call_operand.vmem [shape: bf16[2,4,8,8], index: 0, kind: input, shape index: {}]   ;;  %s1026_s1 = inlined_call_operand.vmem [shape: bf16[2,4,10,8], index: 1, kind: input, shape index: {}]   ;;  %s1027_s2 = inlined_call_operand.vmem [shape: bf16[2,4,10,8], index: 2, kind: input, shape index: {}]   ;;  %s1028_s3 = inlined_call_operand.vmem [shape: f32[2,1,10], index: 3, kind: input, shape index: {}]   ;;  %s1029_s4 = inlined_call_operand.vmem [shape: bf16[2,4,8,8], index: 4, kind: output, shape index: {0}]   ;;  %s1030_s5 = inlined_call_operand.hbm [shape: f32[2,4,8,10], index: 5, kind: output, shape index: {1}]  }
   0x1   :  { %13 = vsyncpa [#allocation3 + $0x1], 0  ;;  %s873_s18 = smov 0   ;;  %s875_s19 = smov 0  }
   0x2   :  { %s877_s20 = smov 0   ;;  %s879_s21 = smov 0  }
   0x3   :  { %s881_s22 = smov 0   ;;  %s883_s23 = smov 0  }
   0x4   :  { %s885_s24 = smov 0   ;;  %s887_s25 = smov 0  }
   0x5 LB: > { %1035 = sst [smem:[#allocation5_spill]] %s837_s24  ;;  %s638_s26 = sadd.s32 4294967295, %s841_s25   ;;  %s841_s25 = sphi %s887_s25, %s19_s25   ;;  %s837_s24 = sphi %s885_s24, %s1043_s24   ;;  %s833_s23 = sphi %s883_s23, %s1048_s23   ;;  %s829_s22 = sphi %s881_s22, %s1041_s22   ;;  %s825_s21 = sphi %s879_s21, %s1047_s21   ;;  %s821_s20 = sphi %s877_s20, %s1046_s20   ;;  %s817_s19 = sphi %s875_s19, %s1045_s19   ;;  %s813_s18 = sphi %s873_s18, %s1044_s18  }
   0x6   : > { %s639_s27 = sadd.s32 4294967294, %s841_s25   ;;  %s28_s28 = sadd.s32 1, %s833_s23 }
   0x7   : > { %p29_p0 = scmp.ge.s32.totalorder %s28_s28, 4  ;;  %s31_s29 = sadd.s32 1, %s837_s24 }
   0x8   : > { %p188_p1 = scmp.ne.s32.totalorder %s821_s20, %s817_s19  ;;  %p189_p2 = scmp.eq.s32.totalorder %s638_s26, 7 }
   0x9   : > { %s1050_s28 = smov (%p29_p0, %s28_s28), 0  ;;  %s1052_s29 = smov (!%p29_p0, %s31_s29), %s837_s24 }
   0xa   : > { %1036 = sst [smem:[#allocation6_spill]] %s1050_s28  ;;  %s174_s30 = ssub.s32 %s833_s23, %s1050_s28 }
   0xb   : > { %p924_p3 = por %p189_p2, %p188_p1  ;;  %p33_p4 = scmp.ge.s32.totalorder %s1052_s29, 2 }
   0xc   : > { %p194_p5 = scmp.ne.s32.totalorder %s817_s19, %s813_s18  ;;  %p195_p6 = scmp.eq.s32.totalorder %s639_s27, 7 }
   0xd   : > { %p642_p7 = scmp.ge.s32.totalorder %s841_s25, 1  ;;  %s1054_s29 = smov (%p33_p4, %s1052_s29), 0 }
   0xe   : > { %1038 = sst [smem:[#allocation7_spill]] %s1054_s29  ;;  %p933_p8 = por %p195_p6, %p194_p5 }
   0xf   : > { %p254_p9 = scmp.lt.s32.totalorder %s841_s25, 9  ;;  %s173_s8 = ssub.s32 %s837_s24, %s1054_s29 }
  0x10   : > { %s178_s9 = sadd.s32 1, %s821_s20  ;;  %s175_s10 = sor.u32 %s174_s30, %s173_s8 }
  0x11   : > { %p255_p10 = pnand %p642_p7, %p254_p9  ;;  %p176_p11 = scmp.eq.s32.totalorder %s175_s10, 0 }
  0x12   : > { %p314_p12 = scmp.lt.s32.totalorder (!%p255_p10), %s829_s22, 1  ;;  %p316_p13 = scmp.lt.s32.totalorder (!%p255_p10), %s825_s21, 3 }
  0x13   : > { %s942_s11 = scalar_select %p176_p11, %s821_s20, %s178_s9  }
  0x14   : > { %258 = sbr.rel (%p255_p10) target bundleno = 571 (0x23b), region = 36 }
  0x19   : > { %s315_s12 = scalar_select %p314_p12, %s829_s22, 1  ;;  %vm369_vm0 = vcmask 64512   ;;  %vm389_vm1 = vcmask 80896   ;;  %vm424_vm2 = vcmask 1044480  }
  0x1a   : > { %s317_s13 = scalar_select %p316_p13, %s825_s21, 3 }
  0x1b   : > { %s647_s14 = sshll.u32 %s315_s12, 3  ;;  %s644_s15 = sshll.u32 %s315_s12, 2 }
  0x1c   : > { %s646_s16 = sshll.u32 %s317_s13, 1  ;;  %s948_s17 = sadd.s32 %s644_s15, %s317_s13 }
  0x1d   : > { %s950_s26 = sadd.s32 %s647_s14, %s646_s16  ;;  %s1034_s27 = sshll.u32 %s948_s17, 2 }
  0x1e   : > { %s648_s30 = sshll.u32 %s950_s26, 2  ;;  %s321_s10 = scalar_lea.vmem %s1025_s0, %s1034_s27 }
  0x1f   : > { %s330_s24 = scalar_lea.vmem %s1026_s1, %s648_s30  ;;  %v352_v0 = vld [vmem:[%s321_s10] sm:$0xf]  ;;  %s342_s14 = scalar_lea.vmem %s1028_s3, %s315_s12 }
  0x20   : > { %v656_v1 = vld [vmem:[%s330_s24] sm:$0xf]  ;;  %v669_v2 = vld [vmem:[%s330_s24] sm:$0x10]  ;;  %v353_v3 = vunpack.c.l.bf16 %v352_v0  ;;  %s339_s29 = scalar_lea.vmem %s1027_s2, %s648_s30  ;;  %s311_s12 = sand.u32 1, %s817_s19  }
  0x21   : > { %v657_v4 = vor.u32 %v669_v2, %v656_v1  ;;  %v742_v8 = vld [vmem:[%s342_s14] ss:$0 sm:$0xff]  ;;  %v670_v19 = vld [vmem:[%s339_s29] sm:$0x10]  ;;  %s643_s16 = sshll.u32 %s311_s12, 3  ;;  %s665_s30 = sshll.u32 %s829_s22, 2 }
  0x22   : > { %v354_v6 = vmul.f32 0.35355338, %v353_v3  ;;  %v661_v18 = vld [vmem:[%s339_s29] sm:$0xf]  ;;  %s313_s26 = scalar_lea.vmem [#allocation2], %s643_s16  ;;  %s466_s8 = sadd.s32 %s825_s21, %s665_s30 }
  0x23   : > { %v374_v5 = vsel %vm369_vm0, %v657_v4, 0  ;;  %v662_v20 = vor.u32 %v670_v19, %v661_v18  ;;  %s666_s9 = sshll.u32 %s466_s8, 3  ;;  %s470_s14 = sshll.u32 %s313_s26, 4  ;;  %s471_s14 = int_to_ptr.vmem [resolvable:$true] %s470_s14 }
  0x24   : > { %383 = vmatpush.bf16.xpose.msra.mxu0 %v374_v5  ;;  %v355_v7 = vpack.c.bf16 %v354_v6, %v354_v6  ;;  %s468_s15 = scalar_lea.hbm %s1030_s5, %s666_s9  ;;  %s453_s28 = scalar_lea.sflag [#allocation3], %s311_s12 }
  0x25   : > { %v426_v21 = vsel %vm424_vm2, %v662_v20, 0  ;;  %s472_s24 = sshll.u32 %s468_s15, 4  ;;  %s767_s21 = scalar_lea.hbm %s1030_s5, 64  ;;  %s473_s24 = int_to_ptr.hbm [resolvable:$true] %s472_s24 }
  0x26   : > { %435 = vmatpush.bf16.msra.mxu1 %v426_v21  ;;  %s761_s29 = sshra.s32 %s473_s24, 4  ;;  %s762_s29 = int_to_ptr.hbm [resolvable:$true] %s761_s29 }
  0x27   : > { %s763_s16 = scalar_lea.hbm %s762_s29, 8  ;;  %p768_p4 = scmp.lt.s32.totalorder %s762_s29, %s1030_s5 }
  0x28   : > { %p764_p0 = scmp.ne.s32.totalorder %s762_s29, %s763_s16  ;;  %p769_p5 = scmp.lt.s32.totalorder %s767_s21, %s763_s16 }
  0x2a   : > { %p765_p1 = pnand %p764_p0, %p924_p3  ;;  %p770_p6 = por %p769_p5, %p768_p4 }
  0x2b   : > { %658 = vmatmul.msk.bf16.vlgmr.msra.gmra.mxu0 %vm369_vm0, %v355_v7 }
  0x2c   : > { %p766_p2 = pneg %p765_p1 }
  0x2e   : > { %p771_p7 = pnand %p770_p6, %p766_p2 }
  0xa8   : > { %v385_v9 = vpop.f32.mrf.mxu0 }
  0xa9   : > { %v386_v10 = vadd.f32 %v742_v8, %v385_v9 }
  0xab   : > { %v390_v11 = vsel %vm389_vm1, %v386_v10, -inf }
  0xac   : > { %391 = vmax.xlane.f32.xlu0 %v390_v11 }
  0xb0   : > { %v387_v12 = vpop.f32.mrf.mxu0 }
 0x11f   : > { %v392_v13 = vpop.xlane.xlu0 %391 }
 0x120   : > { %v393_v14 = vsub.f32 %v386_v10, %v392_v13 }
 0x122   : > { %v394_v15 = vmul.f32 1.442695, %v393_v14 }
 0x124   : > { %743 = vpow2.f32 %v394_v15 }
 0x12a   : > { %v744_v16 = vpop.eup %743 }
 0x12b   : > { %v396_v17 = vsel %vm389_vm1, %v744_v16, 0.0 }
 0x12c   : > { %397 = vadd.xlane.f32.xlu0 %v396_v17 }
 0x19f   : > { %v398_v22 = vpop.xlane.xlu0 %397 }
 0x1a0   : > { %745 = vrcp.f32 %v398_v22  ;;  %v410_v26 = vand.u32 2147483648, %v398_v22  ;;  %v408_v28 = vand.u32 2147483647, %v398_v22  ;;  %vm404_vm4 = vweird.f32 %v398_v22 }
 0x1a2   : > { %v411_v30 = vor.u32 1.1754944e-38, %v410_v26  ;;  %vm409_vm6 = vcmp.eq.f32.partialorder %v408_v28, 8.507059e+37 }
 0x1a6   : > { %v746_v23 = vpop.eup %745 }
 0x1a7   : > { %v400_v24 = vmul.f32 %v746_v23, %v398_v22  ;;  %vm405_vm3 = vweird.f32 %v746_v23 }
 0x1a8   : > { %vm406_vm5 = vmor %vm404_vm4, %vm405_vm3 }
 0x1a9   : > { %v401_v25 = vsub.f32 1.0, %v400_v24 }
 0x1ab   : > { %v402_v27 = vmul.f32 %v746_v23, %v401_v25 }
 0x1ad   : > { %v403_v29 = vadd.f32 %v746_v23, %v402_v27 }
 0x1af   : > { %v407_v31 = vsel %vm406_vm5, %v746_v23, %v403_v29 }
 0x1b0   : > { %v412_v32 = vsel %vm409_vm6, %v411_v30, %v407_v31 }
 0x1b1   : > { %v413_v33 = vmul.f32 %v744_v16, %v412_v32 }
 0x1b3   : > { %v415_v34 = vpack.c.bf16 %v413_v33, %v413_v33  ;;  %414 = vst.msk [vmem:[%s313_s26] sm:$0xff] %vm389_vm1, %v413_v33 }
 0x1b5   : > { %663 = vmatmul.msk.bf16.vlgmr.msra.gmra.mxu1 %vm389_vm1, %v415_v34 }
 0x1b6   : > { %774 = shalt.err (!%p771_p7)
}
 0x1b7   : > { %671 = dma.vmem_to_hbm [thread:$0]  (%p924_p3), %s471_s14, 128, %s473_s24, %s453_s28   ;;  %vm442_vm7 = vcmask 60416  }
 0x1b8   : > { %s1040_s12 = sshll.u32 %s948_s17, 2 }
 0x1b9   : > { %s350_s10 = scalar_lea.vmem %s1029_s4, %s1040_s12 }
 0x232   : > { %v437_v35 = vpop.f32.mrf.mxu1 }
 0x233   : > { %v441_v36 = vpack.c.bf16 %v437_v35, %v437_v35 }
 0x235   : > { %443 = vst.msk [vmem:[%s350_s10] sm:$0xf] %vm442_vm7, %v441_v36 }
 0x23a   : > { %v439_v37 = vpop.f32.mrf.mxu1 }
 0x23b PF: > { %p677_p9 = scmp.ge.s32.totalorder %s841_s25, 2  ;;  %s495_s27 = sand.u32 1, %s813_s18  }
 0x23c   : > { %s496_s6 = scalar_lea.sflag [#allocation3], %s495_s27 }
 0x23d   : > { %p674_p10 = pnand %p677_p9, %p933_p8 }
 0x23f   : > { %p675_p11 = pneg %p674_p10 }
 0x241   : > { %808 = dma.done.wait (%p675_p11), %s496_s6, 128  }
 0x242   : > { %810 = vsyncadd (%p675_p11), %s496_s6, 4294967168  ;;  %s19_s25 = sadd.s32 1, %s841_s25   ;;  %s1041_s22 = sld [smem:[#allocation5_spill]] }
 0x243   : > { %p16_p3 = scmp.ge.s32.totalorder %s19_s25, 10   ;;  %s1042_s17 = sld [smem:[#allocation6_spill]] }
 0x244   : > { %s1043_s24 = sld [smem:[#allocation7_spill]]  ;;  %s1044_s18 = smov %s817_s19 }
 0x245   : > { %s1045_s19 = smov %s821_s20  ;;  %s1046_s20 = smov %s942_s11 }
 0x246   : > { %s1047_s21 = smov %s833_s23  ;;  %18 = sbr.rel (!%p16_p3) target bundleno = 5 (0x5), region = 92 }
 0x249   : > { %s1048_s23 = smov %s1042_s17 }
 0x24b   :  { %502 = vsyncpa [#allocation3], 1 }
 0x24c   :  { %504 = vsyncpa [#allocation3 + $0x1], 1 }

// kernel: transformer_forward.57
= control target key start
LH: loop header
LB: loop body
LE: loop exit
PB: predicated region body
PF: predicated region fallthrough
CT: control target
= control target key end

     0   :  { %vm46_vm0 = vcmask 261120   ;;  %s140_s1 = inlined_call_operand.vmem [shape: bf16[32,128], index: 1, kind: input, shape index: {}]   ;;  %s141_s2 = inlined_call_operand.vmem [shape: f32[1,128], index: 2, kind: input, shape index: {}]   ;;  %s142_s0 = inlined_call_operand.vmem [shape: bf16[16,32], index: 0, kind: input, shape index: {}]   ;;  %s143_s3 = inlined_call_operand.vmem [shape: f32[16,128], index: 3, kind: output, shape index: {}]  }
   0x1   :  { %v100_v0 = vld [vmem:[%s140_s1 + $0x8] sm:$0xff]  ;;  %v99_v1 = vld [vmem:[%s140_s1] sm:$0xff] }
   0x2   :  { %56 = vmatpush.bf16.msra.mxu0 %v100_v0  ;;  %v98_v2 = vld [vmem:[%s142_s0] sm:$0xff] }
   0x3   :  { %v101_v3 = vld [vmem:[%s141_s2] ss:$0 sm:$0xff] }
   0x6   :  { %57 = vmatpush.bf16.msra.mxu0 %v99_v1 }
   0x9   :  { %97 = vmatmul.msk.bf16.vlgmr.msra.gmra.mxu0 %vm46_vm0, %v98_v2 }
  0x86   :  { %v59_v4 = vpop.f32.mrf.mxu0 }
  0x87   :  { %v77_v5 = vadd.f32 %v101_v3, %v59_v4 }
  0x89   :  { %79 = vst [vmem:[%s143_s3] sm:$0xff] %v77_v5 }
  0x8e   :  { %v61_v6 = vpop.f32.mrf.mxu0 }
  0x8f   :  { %v78_v7 = vadd.f32 %v101_v3, %v61_v6 }
  0x91   :  { %80 = vst [vmem:[%s143_s3 + $0x8] sm:$0xff] %v78_v7 }

</bundles_post_ra>
